<compile_context>
chip_gen: v6e
topology: v6e:2x2x1
jax: 0.10.0
libtpu: 0.0.40
codegen_flags: <defaults>
</compile_context>

<pallas_src>
import jax
import jax.numpy as jnp
from jax.experimental import pallas as pl
from jax.experimental.pallas import tpu as pltpu

IN_DIM = 500
HID_DIM = 100
OUT_DIM = 500
HID_PAD = 128            # hidden dim padded to one full lane group (MXU friendly)

MAX_TB = 1024            # max batch rows per grid step
SINGLE_STEP_MAX_B = 64   # below this, a single full-array block is cheapest


def mlp_kernel(x_ref, w1_ref, b1_ref, w2_ref, b2_ref, o_ref):
    # Layer 1: (tb, 500) @ (500, 128) + (1, 128) -> ReLU
    h = jnp.dot(x_ref[...], w1_ref[...],
                preferred_element_type=jnp.float32,
                precision=jax.lax.Precision.HIGHEST)
    h = jnp.maximum(h + b1_ref[...], 0.0)
    # Layer 2: (tb, 128) @ (128, 500) + (1, 500) -> ReLU
    y = jnp.dot(h, w2_ref[...],
                preferred_element_type=jnp.float32,
                precision=jax.lax.Precision.HIGHEST)
    y = jnp.maximum(y + b2_ref[...], 0.0)
    o_ref[...] = y.astype(o_ref.dtype)


def prepare_params(w1, b1, w2, b2):
    """One-time parameter prep (hoisted out of the per-call forward path).

    PyTorch layout: w1 [100, 500], b1 [100], w2 [500, 100], b2 [500].
    Returns transposed weights with ONLY the hidden dim zero-padded to 128;
    input/output feature dims stay at their native 500.
    """
    w1t = jnp.zeros((IN_DIM, HID_PAD), jnp.float32).at[:, :HID_DIM].set(
        jnp.transpose(w1).astype(jnp.float32))
    b1p = jnp.zeros((1, HID_PAD), jnp.float32).at[0, :HID_DIM].set(
        b1.astype(jnp.float32))
    w2t = jnp.zeros((HID_PAD, OUT_DIM), jnp.float32).at[:HID_DIM, :].set(
        jnp.transpose(w2).astype(jnp.float32))
    b2p = b2.astype(jnp.float32).reshape(1, OUT_DIM)
    return w1t, b1p, w2t, b2p


def _round_up(v, m):
    return ((v + m - 1) // m) * m


@jax.jit
def blackbox_forward(x, w1t, b1p, w2t, b2p):
    """x: [B, 500] f32; params from prepare_params(). Returns [B, 500] f32."""
    B = x.shape[0]
    x = x.astype(jnp.float32)

    if B <= SINGLE_STEP_MAX_B:
        # One block equal to the full array (always layout-legal, no padding).
        tb = B
    else:
        # >= 2 grid steps so the "parallel" batch axis shards across both v7x
        # TensorCores; tb is a multiple of 8 and the uneven final block is
        # handled by Pallas' output write masking (no batch padding needed).
        tb = min(MAX_TB, _round_up(pl.cdiv(B, 2), 8))
    n_steps = pl.cdiv(B, tb)

    flops = 2 * B * IN_DIM * HID_PAD + 2 * B * HID_PAD * OUT_DIM
    bytes_accessed = 4 * (B * IN_DIM + B * OUT_DIM
                          + IN_DIM * HID_PAD + HID_PAD * OUT_DIM
                          + HID_PAD + OUT_DIM)

    out = pl.pallas_call(
        mlp_kernel,
        out_shape=jax.ShapeDtypeStruct((B, OUT_DIM), jnp.float32),
        grid_spec=pltpu.PrefetchScalarGridSpec(
            num_scalar_prefetch=0,
            grid=(n_steps,),
            in_specs=[
                # x streams per grid step at native width; weights/biases stay
                # resident in VMEM (constant index_map).
                pl.BlockSpec((tb, IN_DIM), lambda i: (i, 0)),
                pl.BlockSpec((IN_DIM, HID_PAD), lambda i: (0, 0)),
                pl.BlockSpec((1, HID_PAD), lambda i: (0, 0)),
                pl.BlockSpec((HID_PAD, OUT_DIM), lambda i: (0, 0)),
                pl.BlockSpec((1, OUT_DIM), lambda i: (0, 0)),
            ],
            out_specs=pl.BlockSpec((tb, OUT_DIM), lambda i: (i, 0)),
        ),
        compiler_params=pltpu.CompilerParams(
            dimension_semantics=("parallel",),
            vmem_limit_bytes=32 * 1024 * 1024,
        ),
        cost_estimate=pl.CostEstimate(
            flops=flops, transcendentals=0, bytes_accessed=bytes_accessed),
    )(x, w1t, b1p, w2t, b2p)

    return out


def _reference(x, w1, b1, w2, b2):
    """Plain-JAX reference, same math as the PyTorch forward (exact f32)."""
    h = jnp.maximum(
        jnp.dot(x, w1.T, precision=jax.lax.Precision.HIGHEST) + b1, 0.0)
    return jnp.maximum(
        jnp.dot(h, w2.T, precision=jax.lax.Precision.HIGHEST) + b2, 0.0)


if __name__ == "__main__":
    key = jax.random.PRNGKey(0)
    kx, kw1, kb1, kw2, kb2, kx2 = jax.random.split(key, 6)

    # Deterministic synthetic init (PyTorch-like uniform fan-in bound),
    # PyTorch (out_features, in_features) layout.
    bound1 = 1.0 / (IN_DIM ** 0.5)
    bound2 = 1.0 / (HID_DIM ** 0.5)
    w1 = jax.random.uniform(kw1, (HID_DIM, IN_DIM), jnp.float32, -bound1, bound1)
    b1 = jax.random.uniform(kb1, (HID_DIM,), jnp.float32, -bound1, bound1)
    w2 = jax.random.uniform(kw2, (OUT_DIM, HID_DIM), jnp.float32, -bound2, bound2)
    b2 = jax.random.uniform(kb2, (OUT_DIM,), jnp.float32, -bound2, bound2)

    params = prepare_params(w1, b1, w2, b2)

    # Case 1: small batch, single full-array block (B not a multiple of 8).
    B1 = 20
    x1 = jax.random.normal(kx, (B1, IN_DIM), dtype=jnp.float32)
    out1 = jax.block_until_ready(blackbox_forward(x1, *params))
    ref1 = _reference(x1, w1, b1, w2, b2)
    assert out1.shape == (B1, OUT_DIM)
    assert jnp.allclose(out1, ref1, atol=1e-4, rtol=1e-4)

    # Case 2: multi-step grid with an uneven final block (exercises masking).
    B2 = 300
    x2 = jax.random.normal(kx2, (B2, IN_DIM), dtype=jnp.float32)
    out2 = jax.block_until_ready(blackbox_forward(x2, *params))
    ref2 = _reference(x2, w1, b1, w2, b2)
    assert out2.shape == (B2, OUT_DIM)
    assert jnp.allclose(out2, ref2, atol=1e-4, rtol=1e-4)

    print("KERNEL_OK")
</pallas_src>

<mosaic_0001>
module attributes {stable_mosaic.version = 11 : i64} {
  func.func @mlp_kernel(%arg0: i32, %arg1: memref<20x500xf32, #tpu.memory_space<vmem>>, %arg2: memref<500x128xf32, #tpu.memory_space<vmem>>, %arg3: memref<1x128xf32, #tpu.memory_space<vmem>>, %arg4: memref<128x500xf32, #tpu.memory_space<vmem>>, %arg5: memref<1x500xf32, #tpu.memory_space<vmem>>, %arg6: memref<20x500xf32, #tpu.memory_space<vmem>>) attributes {dimension_semantics = [#tpu.dimension_semantics<parallel>], iteration_bounds = array<i64: 1>, scalar_prefetch = 0 : i64, scratch_operands = 0 : i64, tpu.core_type = #tpu.core_type<tc>, window_params = [{transform_indices = @transform_0, window_bounds = array<i64: 20, 500>}, {pipeline_mode = #tpu.pipeline_mode<synchronous>, transform_indices = @transform_1, window_bounds = array<i64: 500, 128>}, {pipeline_mode = #tpu.pipeline_mode<synchronous>, transform_indices = @transform_2, window_bounds = array<i64: 1, 128>}, {pipeline_mode = #tpu.pipeline_mode<synchronous>, transform_indices = @transform_3, window_bounds = array<i64: 128, 500>}, {pipeline_mode = #tpu.pipeline_mode<synchronous>, transform_indices = @transform_4, window_bounds = array<i64: 1, 500>}, {transform_indices = @transform_5, window_bounds = array<i64: 20, 500>}]} {
    %c0 = arith.constant 0 : index
    %c0_0 = arith.constant 0 : index
    %0 = vector.load %arg1[%c0, %c0_0] : memref<20x500xf32, #tpu.memory_space<vmem>>, vector<20x500xf32>
    %c0_1 = arith.constant 0 : index
    %c0_2 = arith.constant 0 : index
    %1 = vector.load %arg2[%c0_1, %c0_2] : memref<500x128xf32, #tpu.memory_space<vmem>>, vector<500x128xf32>
    %cst = arith.constant dense<0.000000e+00> : vector<20x128xf32>
    %2 = tpu.matmul %0, %1, %cst {dimension_numbers = #tpu.dot_dimension_numbers<[1], [0], [0], [1], [0, 0, 1, 1], [], []>, precision = #tpu.contract_precision<fp32>} : vector<20x500xf32>, vector<500x128xf32>, vector<20x128xf32> -> vector<20x128xf32>
    %c0_3 = arith.constant 0 : index
    %c0_4 = arith.constant 0 : index
    %3 = vector.load %arg3[%c0_3, %c0_4] : memref<1x128xf32, #tpu.memory_space<vmem>>, vector<1x128xf32>
    %4 = vector.broadcast %3 : vector<1x128xf32> to vector<20x128xf32>
    %5 = arith.addf %2, %4 : vector<20x128xf32>
    %cst_5 = arith.constant 0.000000e+00 : f32
    %6 = vector.broadcast %cst_5 : f32 to vector<20x128xf32>
    %7 = arith.maximumf %5, %6 : vector<20x128xf32>
    %c0_6 = arith.constant 0 : index
    %c0_7 = arith.constant 0 : index
    %8 = vector.load %arg4[%c0_6, %c0_7] : memref<128x500xf32, #tpu.memory_space<vmem>>, vector<128x500xf32>
    %cst_8 = arith.constant dense<0.000000e+00> : vector<20x500xf32>
    %9 = tpu.matmul %7, %8, %cst_8 {dimension_numbers = #tpu.dot_dimension_numbers<[1], [0], [0], [1], [0, 0, 1, 1], [], []>, precision = #tpu.contract_precision<fp32>} : vector<20x128xf32>, vector<128x500xf32>, vector<20x500xf32> -> vector<20x500xf32>
    %c0_9 = arith.constant 0 : index
    %c0_10 = arith.constant 0 : index
    %10 = vector.load %arg5[%c0_9, %c0_10] : memref<1x500xf32, #tpu.memory_space<vmem>>, vector<1x500xf32>
    %11 = vector.broadcast %10 : vector<1x500xf32> to vector<20x500xf32>
    %12 = arith.addf %9, %11 : vector<20x500xf32>
    %cst_11 = arith.constant 0.000000e+00 : f32
    %13 = vector.broadcast %cst_11 : f32 to vector<20x500xf32>
    %14 = arith.maximumf %12, %13 : vector<20x500xf32>
    %c0_12 = arith.constant 0 : index
    %c0_13 = arith.constant 0 : index
    %15 = vector.load %arg6[%c0_12, %c0_13] : memref<20x500xf32, #tpu.memory_space<vmem>>, vector<20x500xf32>
    tpu.vector_store %arg6[%c0_12, %c0_13], %14 {strides = array<i32>} : memref<20x500xf32, #tpu.memory_space<vmem>>, vector<20x500xf32>,
    return
  }
  func.func @transform_0(%arg0: i32) -> (i32, i32) {
    %c0_i32 = arith.constant 0 : i32
    %c0_i32_0 = arith.constant 0 : i32
    return %arg0, %c0_i32 : i32, i32
  }
  func.func @transform_1(%arg0: i32) -> (i32, i32) {
    %c0_i32 = arith.constant 0 : i32
    %c0_i32_0 = arith.constant 0 : i32
    %c0_i32_1 = arith.constant 0 : i32
    return %c0_i32, %c0_i32_0 : i32, i32
  }
  func.func @transform_2(%arg0: i32) -> (i32, i32) {
    %c0_i32 = arith.constant 0 : i32
    %c0_i32_0 = arith.constant 0 : i32
    %c0_i32_1 = arith.constant 0 : i32
    return %c0_i32, %c0_i32_0 : i32, i32
  }
  func.func @transform_3(%arg0: i32) -> (i32, i32) {
    %c0_i32 = arith.constant 0 : i32
    %c0_i32_0 = arith.constant 0 : i32
    %c0_i32_1 = arith.constant 0 : i32
    return %c0_i32, %c0_i32_0 : i32, i32
  }
  func.func @transform_4(%arg0: i32) -> (i32, i32) {
    %c0_i32 = arith.constant 0 : i32
    %c0_i32_0 = arith.constant 0 : i32
    %c0_i32_1 = arith.constant 0 : i32
    return %c0_i32, %c0_i32_0 : i32, i32
  }
  func.func @transform_5(%arg0: i32) -> (i32, i32) {
    %c0_i32 = arith.constant 0 : i32
    %c0_i32_0 = arith.constant 0 : i32
    return %arg0, %c0_i32 : i32, i32
  }
}

</mosaic_0001>

<bundles_post_ra>
// kernel: blackbox_forward.1
= control target key start
LH: loop header
LB: loop body
LE: loop exit
PB: predicated region body
PF: predicated region fallthrough
CT: control target
= control target key end

     0   :  { %s7362_s0 = inlined_call_operand.vmem [shape: f32[20,500], index: 0, kind: input, shape index: {}]   ;;  %s7363_s1 = inlined_call_operand.vmem [shape: f32[500,128], index: 1, kind: input, shape index: {}]   ;;  %s7364_s2 = inlined_call_operand.vmem [shape: f32[1,128], index: 2, kind: input, shape index: {}]   ;;  %s7365_s3 = inlined_call_operand.vmem [shape: f32[128,500], index: 3, kind: input, shape index: {}]   ;;  %s7366_s4 = inlined_call_operand.vmem [shape: f32[1,500], index: 4, kind: input, shape index: {}]   ;;  %s7367_s5 = inlined_call_operand.hbm [shape: f32[20,500], index: 5, kind: output, shape index: {}]  }
   0x1   :  { %v64_v0 = vld [vmem:[%s7363_s1 + $0xf8] sm:$0xff]  ;;  %v63_v2 = vld [vmem:[%s7363_s1 + $0xf0] sm:$0xff]  ;;  %v62_v7 = vld [vmem:[%s7363_s1 + $0xe8] sm:$0xff] }
   0x2   :  { %v48_v1 = vld [vmem:[%s7363_s1 + $0x78] sm:$0xff]  ;;  %v4404_v3 = vand.u32 4294901760, %v64_v0  ;;  %v4408_v5 = vand.u32 4294901760, %v63_v2  ;;  %v47_v6 = vld [vmem:[%s7363_s1 + $0x70] sm:$0xff]  ;;  %v46_v8 = vld [vmem:[%s7363_s1 + $0x68] sm:$0xff]  ;;  %v4421_v10 = vand.u32 4294901760, %v62_v7 }
   0x3   :  { %v4406_v4 = vand.u32 4294901760, %v48_v1  ;;  %v4419_v9 = vand.u32 4294901760, %v47_v6  ;;  %v4423_v11 = vand.u32 4294901760, %v46_v8  ;;  %v61_v12 = vld [vmem:[%s7363_s1 + $0xe0] sm:$0xff]  ;;  %v60_v14 = vld [vmem:[%s7363_s1 + $0xd8] sm:$0xff]  ;;  %v4452_v20 = vld [vmem:[%s7363_s1 + $0xd0] sm:$0xff] }
   0x4   :  { %v45_v13 = vld [vmem:[%s7363_s1 + $0x60] sm:$0xff]  ;;  %4089 = vmatprep.subr.mxu0 %v4404_v3  ;;  %v4435_v15 = vand.u32 4294901760, %v61_v12  ;;  %v4439_v17 = vand.u32 4294901760, %v60_v14  ;;  %v4442_v18 = vsub.f32 %v64_v0, %v4404_v3  ;;  %v4447_v19 = vld [vmem:[%s7363_s1 + $0x58] sm:$0xff]  ;;  %v4457_v21 = vld [vmem:[%s7363_s1 + $0x50] sm:$0xff]  ;;  %v4467_v24 = vand.u32 4294901760, %v4452_v20 }
   0x5   :  { %v4437_v16 = vand.u32 4294901760, %v45_v13  ;;  %4090 = vmatpush3.msra.mxu0 %v4406_v4  ;;  %v4461_v22 = vand.u32 4294901760, %v4447_v19  ;;  %v4464_v23 = vsub.f32 %v48_v1, %v4406_v4  ;;  %v4470_v25 = vsub.f32 %v63_v2, %v4408_v5  ;;  %v4475_v26 = vld [vmem:[%s7363_s1 + $0xc8] sm:$0xff]  ;;  %v4485_v28 = vld [vmem:[%s7363_s1 + $0xc0] sm:$0xff]  ;;  %v4537_v46 = vld [vmem:[%s7363_s1 + $0xb8] sm:$0xff] }
   0x6   :  { %7687 = vst [vmem:[#allocation5_spill] sm:$0xff] %v4439_v17  ;;  %v4480_v27 = vld [vmem:[%s7363_s1 + $0x48] sm:$0xff]  ;;  %4091 = vmatprep.subr.mxu0 %v4408_v5  ;;  %v7381_v29 = vand.u32 4294901760, %v4442_v18  ;;  %v4490_v30 = vand.u32 4294901760, %v4457_v21  ;;  %v4493_v31 = vsub.f32 %v47_v6, %v4419_v9  ;;  %v4496_v32 = vand.u32 4294901760, %v4475_v26  ;;  %v4510_v37 = vld [vmem:[%s7363_s1 + $0x40] sm:$0xff] }
   0x7   :  { %7688 = vst [vmem:[#allocation6_spill] sm:$0xff] %v4461_v22  ;;  %4092 = vmatpush3.msra.mxu0 %v4419_v9  ;;  %v7380_v33 = vand.u32 4294901760, %v4464_v23  ;;  %v7378_v34 = vand.u32 4294901760, %v4470_v25  ;;  %v4502_v35 = vsub.f32 %v62_v7, %v4421_v10  ;;  %v4505_v36 = vand.u32 4294901760, %v4480_v27  ;;  %v4550_v51 = vld [vmem:[%s7363_s1 + $0x38] sm:$0xff]  ;;  %v4560_v56 = vld [vmem:[%s7363_s1 + $0xb0] sm:$0xff] }
   0x8   :  { %7689 = vst [vmem:[#allocation7_spill] sm:$0xff] %v4490_v30  ;;  %7690 = vst [vmem:[#allocation8_spill] sm:$0xff] %v4496_v32  ;;  %4093 = vmatprep.subr.mxu0 %v4421_v10  ;;  %v375_v38 = vsub.f32 %v4442_v18, %v7381_v29  ;;  %v7377_v39 = vand.u32 4294901760, %v4493_v31  ;;  %v4518_v40 = vsub.f32 %v46_v8, %v4423_v11  ;;  %v4521_v41 = vand.u32 4294901760, %v4485_v28  ;;  %v4575_v61 = vld [vmem:[%s7363_s1 + $0x30] sm:$0xff]  ;;  %v4590_v2 = vld [vmem:[%s7363_s1 + $0xa8] sm:$0xff] }
   0x9   :  { %7691 = vst [vmem:[#allocation9_spill] sm:$0xff] %v4505_v36  ;;  %4094 = vmatpush3.msra.mxu0 %v4423_v11  ;;  %v263_v42 = vsub.f32 %v4464_v23, %v7380_v33  ;;  %v382_v43 = vsub.f32 %v4470_v25, %v7378_v34  ;;  %v7375_v44 = vand.u32 4294901760, %v4502_v35  ;;  %v4532_v45 = vsub.f32 %v61_v12, %v4435_v15 }
   0xa   :  { %7692 = vst [vmem:[#allocation10_spill] sm:$0xff] %v4521_v41  ;;  %4095 = vmatprep.subr.mxu0 %v4435_v15  ;;  %v376_v47 = vand.u32 4294901760, %v375_v38  ;;  %v270_v48 = vsub.f32 %v4493_v31, %v7377_v39  ;;  %v7373_v49 = vand.u32 4294901760, %v4518_v40  ;;  %v4545_v50 = vand.u32 4294901760, %v4510_v37 }
   0xb   :  { %4096 = vmatpush3.msra.mxu0 %v4437_v16  ;;  %v264_v52 = vand.u32 4294901760, %v263_v42  ;;  %v383_v53 = vand.u32 4294901760, %v382_v43  ;;  %v389_v54 = vsub.f32 %v4502_v35, %v7375_v44  ;;  %v7372_v55 = vand.u32 4294901760, %v4532_v45 }
   0xc   :  { %7693 = vst [vmem:[#allocation11_spill] sm:$0xff] %v4545_v50  ;;  %4097 = vmatprep.subr.mxu0 %v4439_v17  ;;  %4130 = vmatprep.subr.mxu1 %v376_v47  ;;  %v271_v57 = vand.u32 4294901760, %v270_v48  ;;  %v277_v58 = vsub.f32 %v4518_v40, %v7373_v49  ;;  %v4567_v59 = vsub.f32 %v45_v13, %v4437_v16  ;;  %v4570_v60 = vand.u32 4294901760, %v4537_v46  ;;  %v4604_v13 = vld [vmem:[%s7363_s1 + $0x28] sm:$0xff] }
   0xd   :  { %4098 = vmatpush3.msra.mxu0 %v4461_v22  ;;  %4131 = vmatpush3.msra.mxu1 %v264_v52  ;;  %v390_v62 = vand.u32 4294901760, %v389_v54  ;;  %v396_v63 = vsub.f32 %v4532_v45, %v7372_v55  ;;  %v4582_v0 = vsub.f32 %v60_v14, %v4439_v17  ;;  %v4585_v1 = vand.u32 4294901760, %v4550_v51 }
   0xe   :  { %7694 = vst [vmem:[#allocation12_spill] sm:$0xff] %v4570_v60  ;;  %4099 = vmatprep.subr.mxu0 %v4467_v24  ;;  %4132 = vmatprep.subr.mxu1 %v383_v53  ;;  %v278_v6 = vand.u32 4294901760, %v277_v58  ;;  %v7370_v7 = vand.u32 4294901760, %v4567_v59  ;;  %v4596_v8 = vsub.f32 %v4447_v19, %v4461_v22  ;;  %v4599_v12 = vand.u32 4294901760, %v4560_v56 }
   0xf   :  { %7695 = vst [vmem:[#allocation13_spill] sm:$0xff] %v4585_v1  ;;  %4100 = vmatpush3.msra.mxu0 %v4490_v30  ;;  %4133 = vmatpush3.msra.mxu1 %v271_v57  ;;  %v397_v14 = vand.u32 4294901760, %v396_v63  ;;  %v7369_v38 = vand.u32 4294901760, %v4582_v0  ;;  %v4610_v42 = vsub.f32 %v4452_v20, %v4467_v24  ;;  %v4613_v19 = vand.u32 4294901760, %v4575_v61  ;;  %v4630_v20 = vld [vmem:[%s7363_s1 + $0xa0] sm:$0xff] }
  0x10   :  { %7696 = vst [vmem:[#allocation14_spill] sm:$0xff] %v4599_v12  ;;  %4101 = vmatprep.subr.mxu0 %v4496_v32  ;;  %4134 = vmatprep.subr.mxu1 %v390_v62  ;;  %v284_v43 = vsub.f32 %v4567_v59, %v7370_v7  ;;  %v7368_v47 = vand.u32 4294901760, %v4596_v8  ;;  %v4622_v48 = vsub.f32 %v4457_v21, %v4490_v30  ;;  %v4625_v52 = vand.u32 4294901760, %v4590_v2 }
  0x11   :  { %7697 = vst [vmem:[#allocation15_spill] sm:$0xff] %v4613_v19  ;;  %4102 = vmatpush3.msra.mxu0 %v4505_v36  ;;  %4135 = vmatpush3.msra.mxu1 %v278_v6  ;;  %v403_v53 = vsub.f32 %v4582_v0, %v7369_v38  ;;  %v7371_v54 = vand.u32 4294901760, %v4610_v42  ;;  %v4639_v21 = vsub.f32 %v4475_v26, %v4496_v32  ;;  %v4642_v57 = vand.u32 4294901760, %v4604_v13  ;;  %v4656_v26 = vld [vmem:[%s7363_s1 + $0x20] sm:$0xff] }
  0x12   :  { %7698 = vst [vmem:[#allocation16_spill] sm:$0xff] %v4625_v52  ;;  %4103 = vmatprep.subr.mxu0 %v4521_v41  ;;  %4136 = vmatprep.subr.mxu1 %v397_v14  ;;  %v285_v58 = vand.u32 4294901760, %v284_v43  ;;  %v291_v62 = vsub.f32 %v4596_v8, %v7368_v47  ;;  %v7374_v63 = vand.u32 4294901760, %v4622_v48  ;;  %v4651_v6 = vsub.f32 %v4480_v27, %v4505_v36 }
  0x13   :  { %7699 = vst [vmem:[#allocation17_spill] sm:$0xff] %v4642_v57 }
  0x14   :  { %10 = vsyncpa [#allocation3], 0  ;;  %4104 = vmatpush3.msra.mxu0 %v4545_v50  ;;  %v404_v14 = vand.u32 4294901760, %v403_v53  ;;  %v410_v43 = vsub.f32 %v4610_v42, %v7371_v54  ;;  %v7376_v47 = vand.u32 4294901760, %v4639_v21  ;;  %v4664_v38 = vand.u32 4294901760, %v4630_v20  ;;  %v4669_v27 = vld [vmem:[%s7363_s1 + $0x98] sm:$0xff]  ;;  %4137 = vmatpush3.msra.mxu1 %v285_v58 }
  0x15   :  { %4105 = vmatprep.subr.mxu0 %v4570_v60  ;;  %v292_v7 = vand.u32 4294901760, %v291_v62  ;;  %v298_v53 = vsub.f32 %v4622_v48, %v7374_v63  ;;  %v7379_v54 = vand.u32 4294901760, %v4651_v6  ;;  %v4678_v55 = vsub.f32 %v4485_v28, %v4521_v41  ;;  %v4683_v49 = vld [vmem:[%s7363_s1 + $0x18] sm:$0xff]  ;;  %v4699_v44 = vld [vmem:[%s7363_s1 + $0x90] sm:$0xff]  ;;  %v4726_v33 = vld [vmem:[%s7363_s1 + $0x88] sm:$0xff] }
  0x16   :  { %7700 = vst [vmem:[#allocation18_spill] sm:$0xff] %v4664_v38  ;;  %4138 = vmatprep.subr.mxu1 %v404_v14  ;;  %4106 = vmatpush3.msra.mxu0 %v4585_v1  ;;  %v411_v58 = vand.u32 4294901760, %v410_v43  ;;  %v417_v62 = vsub.f32 %v4639_v21, %v7376_v47  ;;  %v4690_v63 = vand.u32 4294901760, %v4656_v26  ;;  %v4694_v28 = vsub.f32 %v4510_v37, %v4545_v50  ;;  %v4712_v37 = vld [vmem:[%s7363_s1 + $0x10] sm:$0xff]  ;;  %v21_v41 = vld [vmem:[%s7362_s0] sm:$0xff] }
  0x17   :  { %4139 = vmatpush3.msra.mxu1 %v292_v7  ;;  %4107 = vmatprep.subr.mxu0 %v4599_v12  ;;  %v299_v14 = vand.u32 4294901760, %v298_v53  ;;  %v305_v43 = vsub.f32 %v4651_v6, %v7379_v54  ;;  %v7384_v47 = vand.u32 4294901760, %v4678_v55  ;;  %v4707_v39 = vand.u32 4294901760, %v4669_v27 }
  0x18   :  { %4140 = vmatprep.subr.mxu1 %v411_v58  ;;  %4108 = vmatpush3.msra.mxu0 %v4613_v19  ;;  %v418_v7 = vand.u32 4294901760, %v417_v62  ;;  %v7385_v53 = vand.u32 4294901760, %v4694_v28  ;;  %v4718_v34 = vsub.f32 %v4537_v46, %v4570_v60  ;;  %v4721_v54 = vand.u32 4294901760, %v4683_v49 }
  0x19   :  { %7701 = vst [vmem:[#allocation19_spill] sm:$0xff] %v4707_v39  ;;  %4141 = vmatpush3.msra.mxu1 %v299_v14  ;;  %4109 = vmatprep.subr.mxu0 %v4625_v52  ;;  %v306_v58 = vand.u32 4294901760, %v305_v43  ;;  %v424_v62 = vsub.f32 %v4678_v55, %v7384_v47  ;;  %v4734_v46 = vsub.f32 %v4550_v51, %v4585_v1  ;;  %v4737_v29 = vand.u32 4294901760, %v4699_v44  ;;  %v4754_v51 = vld [vmem:[%s7363_s1 + $0x8] sm:$0xff] }
  0x1a   :  { %7702 = vst [vmem:[#allocation20_spill] sm:$0xff] %v4721_v54  ;;  %4142 = vmatprep.subr.mxu1 %v418_v7  ;;  %4110 = vmatpush3.msra.mxu0 %v4642_v57  ;;  %v312_v14 = vsub.f32 %v4694_v28, %v7385_v53  ;;  %v4746_v60 = vsub.f32 %v4560_v56, %v4599_v12  ;;  %v4749_v47 = vand.u32 4294901760, %v4712_v37  ;;  %v4763_v56 = vand.u32 4294901760, %v4726_v33  ;;  %v4768_v12 = vld [vmem:[%s7363_s1 + $0x80] sm:$0xff] }
  0x1b   :  { %7703 = vst [vmem:[#allocation21_spill] sm:$0xff] %v4734_v46  ;;  %7704 = vst [vmem:[#allocation22_spill] sm:$0xff] %v4737_v29  ;;  %4143 = vmatpush3.msra.mxu1 %v306_v58  ;;  %4111 = vmatprep.subr.mxu0 %v4664_v38  ;;  %v425_v7 = vand.u32 4294901760, %v424_v62  ;;  %v4760_v43 = vsub.f32 %v4575_v61, %v4613_v19  ;;  %v7709_v1 = vand.u32 4294901760, %v4718_v34  ;;  %v7711_v19 = vand.u32 4294901760, %v4734_v46 }
  0x1c   :  { %7705 = vst [vmem:[#allocation23_spill] sm:$0xff] %v4746_v60  ;;  %7706 = vst [vmem:[#allocation24_spill] sm:$0xff] %v4749_v47  ;;  %4112 = vmatpush3.msra.mxu0 %v4690_v63  ;;  %v313_v58 = vand.u32 4294901760, %v312_v14  ;;  %v7402_v53 = vand.u32 4294901760, %v4746_v60  ;;  %v4777_v61 = vsub.f32 %v4590_v2, %v4625_v52  ;;  %v4785_v14 = vand.u32 4294901760, %v4754_v51  ;;  %v4794_v2 = vld [vmem:[%s7363_s1] sm:$0xff] }
  0x1d   :  { %7707 = vst [vmem:[#allocation25_spill] sm:$0xff] %v4760_v43  ;;  %7708 = vst [vmem:[#allocation26_spill] sm:$0xff] %v4763_v56  ;;  %v431_v62 = vsub.f32 %v4718_v34, %v7709_v1  ;;  %4144 = vmatprep.subr.mxu1 %v425_v7  ;;  %4113 = vmatprep.subr.mxu0 %v4707_v39  ;;  %v319_v50 = vsub.f32 %v4734_v46, %v7711_v19  ;;  %v4802_v52 = vand.u32 4294901760, %v4768_v12  ;;  %vm113_vm0 = vcmask 1043456  }
  0x1e   :  { %7710 = vst [vmem:[#allocation27_spill] sm:$0xff] %v4777_v61  ;;  %v4789_v1 = vsub.f32 %v4604_v13, %v4642_v57  ;;  %4145 = vmatpush3.msra.mxu1 %v313_v58  ;;  %4114 = vmatpush3.msra.mxu0 %v4721_v54  ;;  %v438_v19 = vsub.f32 %v4746_v60, %v7402_v53  ;;  %v22_v13 = vld [vmem:[%s7362_s0 + $0x8] sm:$0xff]  ;;  %v7712_v58 = vand.u32 4294901760, %v4760_v43  ;;  %vm103_vm1 = vcmask 949248  }
  0x1f   :  { %v432_v7 = vand.u32 4294901760, %v431_v62  ;;  %v320_v57 = vand.u32 4294901760, %v319_v50  ;;  %4115 = vmatprep.subr.mxu0 %v4737_v29  ;;  %v4814_v53 = vsub.f32 %v4630_v20, %v4664_v38  ;;  %v7714_v50 = vand.u32 4294901760, %v4777_v61 }
  0x20   :  { %v326_v62 = vsub.f32 %v4760_v43, %v7712_v58  ;;  %v439_v32 = vand.u32 4294901760, %v438_v19  ;;  %4116 = vmatpush3.msra.mxu0 %v4749_v47  ;;  %v4824_v58 = vand.u32 4294901760, %v4794_v2  ;;  %v4828_v36 = vsub.f32 %v4656_v26, %v4690_v63 }
  0x21   :  { %7713 = vst [vmem:[#allocation28_spill] sm:$0xff] %v4814_v53  ;;  %4146 = vmatprep.subr.mxu1 %v432_v7  ;;  %v445_v30 = vsub.f32 %v4777_v61, %v7714_v50  ;;  %4117 = vmatprep.subr.mxu0 %v4763_v56  ;;  %v7715_v7 = vand.u32 4294901760, %v4789_v1  ;;  %v7413_v38 = vand.u32 4294901760, %v4814_v53  ;;  %v4835_v43 = vand.u32 4294901760, %v22_v13 }
  0x22   :  { %4147 = vmatpush3.msra.mxu1 %v320_v57  ;;  %v327_v20 = vand.u32 4294901760, %v326_v62  ;;  %4118 = vmatpush3.msra.mxu0 %v4785_v14  ;;  %v7414_v61 = vand.u32 4294901760, %v4828_v36  ;;  %v4841_v57 = vsub.f32 %v4669_v27, %v4707_v39  ;;  %v4843_v26 = vand.u32 4294901760, %v21_v41 }
  0x23   :  { %v333_v19 = vsub.f32 %v4789_v1, %v7715_v7  ;;  %7716 = vst [vmem:[#allocation29_spill] sm:$0xff] %v4835_v43  ;;  %4148 = vmatprep.subr.mxu1 %v439_v32  ;;  %v446_v50 = vand.u32 4294901760, %v445_v30  ;;  %4119 = vmatprep.subr.mxu0 %v4802_v52  ;;  %v452_v7 = vsub.f32 %v4814_v53, %v7413_v38  ;;  %vm4070_vm2 = vcmask 945152  }
  0x24   :  { %7717 = vst [vmem:[#allocation30_spill] sm:$0xff] %v4843_v26  ;;  %4149 = vmatpush3.msra.mxu1 %v327_v20  ;;  %v4850_v30 = vsub.f32 %v22_v13, %v4835_v43  ;;  %v4854_v32 = vsub.f32 %v4683_v49, %v4721_v54  ;;  %4120 = vmatpush3.msra.mxu0 %v4824_v58 }
  0x25   :  { %v334_v62 = vand.u32 4294901760, %v333_v19  ;;  %4150 = vmatprep.subr.mxu1 %v446_v50  ;;  %v340_v27 = vsub.f32 %v4828_v36, %v7414_v61  ;;  %v4862_v19 = vsub.f32 %v21_v41, %v4843_v26  ;;  %v4866_v13 = vsub.f32 %v4699_v44, %v4737_v29  ;;  %4171 = vmatprep.subr.mxu0 %v4442_v18 }
  0x26   :  { %v453_v38 = vand.u32 4294901760, %v452_v7  ;;  %v7419_v49 = vand.u32 4294901760, %v4850_v30  ;;  %v7422_v50 = vand.u32 4294901760, %v4854_v32  ;;  %v4873_v61 = vsub.f32 %v4712_v37, %v4749_v47  ;;  %484 = vmatprep.mubr.f32.mxu1 %v4835_v43 }
  0x27   :  { %4151 = vmatpush3.msra.mxu1 %v334_v62  ;;  %v341_v20 = vand.u32 4294901760, %v340_v27  ;;  %v7718_v41 = vand.u32 4294901760, %v4841_v57  ;;  %v7719_v62 = vand.u32 4294901760, %v4862_v19  ;;  %v7720_v43 = vand.u32 4294901760, %v4866_v13 }
  0x28   :  { %4152 = vmatprep.subr.mxu1 %v453_v38  ;;  %v216_v7 = vsub.f32 %v4850_v30, %v7419_v49  ;;  %v347_v37 = vsub.f32 %v4854_v32, %v7422_v50  ;;  %v4900_v47 = vsub.f32 %v4754_v51, %v4785_v14  ;;  %v7721_v29 = vand.u32 4294901760, %v4873_v61 }
  0x29   :  { %v459_v54 = vsub.f32 %v4841_v57, %v7718_v41  ;;  %v4890_v41 = vsub.f32 %v4726_v33, %v4763_v56  ;;  %4153 = vmatpush3.msra.mxu1 %v341_v20  ;;  %v222_v38 = vsub.f32 %v4862_v19, %v7719_v62  ;;  %v466_v49 = vsub.f32 %v4866_v13, %v7720_v43 }
  0x2a   :  { %v217_v50 = vand.u32 4294901760, %v216_v7  ;;  %v348_v27 = vand.u32 4294901760, %v347_v37  ;;  %v354_v33 = vsub.f32 %v4873_v61, %v7721_v29  ;;  %v7429_v62 = vand.u32 4294901760, %v4900_v47 }
  0x2b   :  { %v460_v44 = vand.u32 4294901760, %v459_v54  ;;  %v7430_v54 = vand.u32 4294901760, %v4890_v41  ;;  %v223_v20 = vand.u32 4294901760, %v222_v38  ;;  %v467_v56 = vand.u32 4294901760, %v466_v49 }
  0x2c   :  { %v4909_v43 = vsub.f32 %v4768_v12, %v4802_v52  ;;  %218 = vmatprep.mubr.f32.mxu0 %v217_v50  ;;  %v355_v51 = vand.u32 4294901760, %v354_v33  ;;  %v4916_v29 = vsub.f32 %v4794_v2, %v4824_v58  ;;  %v361_v49 = vsub.f32 %v4900_v47, %v7429_v62  ;;  %v26_v50 = vld [vmem:[%s7362_s0 + $0x28] sm:$0xff] }
  0x2d   :  { %4154 = vmatprep.subr.mxu1 %v460_v44  ;;  %v473_v7 = vsub.f32 %v4890_v41, %v7430_v54  ;;  %224 = vmatmul.mubr.f32.vlgmr.msra.gmra.mxu0 %v223_v20  ;;  %v4938_v33 = vand.u32 4294901760, %v26_v50  ;;  %v7725_v54 = vld [vmem:[#allocation25_spill] sm:$0xff] }
  0x2e   :  { %4155 = vmatpush3.msra.mxu1 %v348_v27  ;;  %7722 = vst [vmem:[#allocation31_spill] sm:$0xff] %v4916_v29  ;;  %v7428_v12 = vand.u32 4294901760, %v4909_v43  ;;  %4172 = vmatpush3.msra.mxu0 %v4464_v23  ;;  %v7427_v37 = vand.u32 4294901760, %v4916_v29  ;;  %v362_v2 = vand.u32 4294901760, %v361_v49  ;;  %v25_v27 = vld [vmem:[%s7362_s0 + $0x20] sm:$0xff] }
  0x2f   :  { %4156 = vmatprep.subr.mxu1 %v467_v56  ;;  %v474_v44 = vand.u32 4294901760, %v473_v7  ;;  %4173 = vmatprep.subr.mxu0 %v4470_v25  ;;  %7723 = vst [vmem:[#allocation32_spill] sm:$0xff] %v4938_v33  ;;  %v4942_v7 = vand.u32 4294901760, %v25_v27  ;;  %v30_v49 = vld [vmem:[%s7362_s0 + $0x48] sm:$0xf] }
  0x30   :  { %4157 = vmatpush3.msra.mxu1 %v355_v51  ;;  %v480_v56 = vsub.f32 %v4909_v43, %v7428_v12  ;;  %4174 = vmatpush3.msra.mxu0 %v4493_v31  ;;  %v368_v38 = vsub.f32 %v4916_v29, %v7427_v37  ;;  %v7726_v12 = vld [vmem:[#allocation7_spill] sm:$0xff] }
  0x31   :  { %4158 = vmatprep.subr.mxu1 %v474_v44  ;;  %4175 = vmatprep.subr.mxu0 %v4502_v35  ;;  %7724 = vst [vmem:[#allocation33_spill] sm:$0xff] %v4942_v7  ;;  %v4950_v44 = vsub.f32 %v26_v50, %v4938_v33 }
  0x32   :  { %4159 = vmatpush3.msra.mxu1 %v362_v2  ;;  %v481_v20 = vand.u32 4294901760, %v480_v56  ;;  %4176 = vmatpush3.msra.mxu0 %v4518_v40  ;;  %v369_v51 = vand.u32 4294901760, %v368_v38  ;;  %v29_v2 = vld [vmem:[%s7362_s0 + $0x40] sm:$0xf]  ;;  %v4957_v56 = vand.u32 4294901760, %v30_v49  ;;  %v4962_v38 = vsub.f32 %v25_v27, %v4942_v7 }
  0x33   :  { %4177 = vmatprep.subr.mxu0 %v4532_v45  ;;  %v4966_v50 = vand.u32 4294901760, %v29_v2 }
  0x34   :  { %4160 = vmatprep.subr.mxu1 %v481_v20  ;;  %4178 = vmatpush3.msra.mxu0 %v4567_v59  ;;  %v7431_v20 = vand.u32 4294901760, %v4950_v44  ;;  %v7436_v27 = vand.u32 4294901760, %v4962_v38 }
  0x35   :  { %4161 = vmatpush3.msra.mxu1 %v369_v51  ;;  %4179 = vmatprep.subr.mxu0 %v4582_v0  ;;  %v4974_v51 = vsub.f32 %v30_v49, %v4957_v56  ;;  %v4982_v37 = vsub.f32 %v29_v2, %v4966_v50 }
  0x36   :  { %486 = vmatmul.mubr.f32.vlgmr.msra.gmra.mxu1 %v4843_v26  ;;  %4212 = vmatprep.subr.mxu1 %v4404_v3  ;;  %v231_v49 = vsub.f32 %v4950_v44, %v7431_v20  ;;  %v237_v2 = vsub.f32 %v4962_v38, %v7436_v27  ;;  %v7727_v26 = vld [vmem:[#allocation27_spill] sm:$0xff]  ;;  %v7729_v27 = vld [vmem:[#allocation8_spill] sm:$0xff] }
  0x37   :  { %4180 = vmatpush3.msra.mxu0 %v4596_v8  ;;  %4213 = vmatpush3.msra.mxu1 %v4406_v4  ;;  %v7440_v62 = vand.u32 4294901760, %v4982_v37 }
  0x38   :  { %4181 = vmatprep.subr.mxu0 %v4610_v42  ;;  %4214 = vmatprep.subr.mxu1 %v4408_v5  ;;  %v232_v20 = vand.u32 4294901760, %v231_v49 }
  0x39   :  { %4182 = vmatpush3.msra.mxu0 %v4622_v48  ;;  %4215 = vmatpush3.msra.mxu1 %v4419_v9  ;;  %v252_v49 = vsub.f32 %v4982_v37, %v7440_v62  ;;  %v7735_v62 = vld [vmem:[#allocation14_spill] sm:$0xff] }
  0x3a   :  { %4183 = vmatprep.subr.mxu0 %v4639_v21  ;;  %4216 = vmatprep.subr.mxu1 %v4421_v10 }
  0x3b   :  { %4184 = vmatpush3.msra.mxu0 %v4651_v6  ;;  %4217 = vmatpush3.msra.mxu1 %v4423_v11 }
  0x3c   :  { %4185 = vmatprep.subr.mxu0 %v4678_v55  ;;  %4218 = vmatprep.subr.mxu1 %v4435_v15 }
  0x3d   :  { %4186 = vmatpush3.msra.mxu0 %v4694_v28  ;;  %4219 = vmatpush3.msra.mxu1 %v4437_v16 }
  0x3e   :  { %4187 = vmatprep.subr.mxu0 %v4718_v34  ;;  %4220 = vmatprep.subr.mxu1 %v4439_v17 }
  0x3f   :  { %4188 = vmatpush3.msra.mxu0 %v4734_v46  ;;  %4221 = vmatpush3.msra.mxu1 %v4461_v22  ;;  %v7728_v46 = vand.u32 4294901760, %v4974_v51  ;;  %v7730_v22 = vld [vmem:[#allocation9_spill] sm:$0xff] }
  0x40   :  { %4189 = vmatprep.subr.mxu0 %v4746_v60  ;;  %4222 = vmatprep.subr.mxu1 %v4467_v24  ;;  %v238_v60 = vand.u32 4294901760, %v237_v2  ;;  %v7733_v2 = vld [vmem:[#allocation12_spill] sm:$0xff] }
  0x41   :  { %4190 = vmatpush3.msra.mxu0 %v7725_v54  ;;  %4223 = vmatpush3.msra.mxu1 %v7726_v12  ;;  %v246_v17 = vsub.f32 %v4974_v51, %v7728_v46  ;;  %v7731_v12 = vld [vmem:[#allocation10_spill] sm:$0xff] }
  0x42   :  { %4191 = vmatprep.subr.mxu0 %v7727_v26  ;;  %4224 = vmatprep.subr.mxu1 %v7729_v27  ;;  %v7732_v26 = vld [vmem:[#allocation11_spill] sm:$0xff] }
  0x43   :  { %4192 = vmatpush3.msra.mxu0 %v4789_v1  ;;  %4225 = vmatpush3.msra.mxu1 %v7730_v22  ;;  %v247_v46 = vand.u32 4294901760, %v246_v17  ;;  %v7734_v22 = vld [vmem:[#allocation13_spill] sm:$0xff]  ;;  %v7737_v17 = vld [vmem:[#allocation16_spill] sm:$0xff] }
  0x44   :  { %4193 = vmatprep.subr.mxu0 %v4814_v53  ;;  %4226 = vmatprep.subr.mxu1 %v7731_v12  ;;  %v253_v53 = vand.u32 4294901760, %v252_v49  ;;  %v7739_v49 = vld [vmem:[#allocation18_spill] sm:$0xff] }
  0x45   :  { %233 = vmatprep.mubr.f32.mxu0 %v232_v20  ;;  %4194 = vmatpush3.msra.mxu0 %v4828_v36  ;;  %v7736_v20 = vld [vmem:[#allocation15_spill] sm:$0xff] }
  0x46   :  { %4227 = vmatpush3.msra.mxu1 %v7732_v26  ;;  %239 = vmatmul.mubr.f32.gmra.mxu0 %v238_v60  ;;  %v7738_v60 = vld [vmem:[#allocation17_spill] sm:$0xff] }
  0x47   :  { %4195 = vmatprep.subr.mxu0 %v4841_v57  ;;  %4228 = vmatprep.subr.mxu1 %v7733_v2 }
  0x48   :  { %4196 = vmatpush3.msra.mxu0 %v4854_v32  ;;  %4229 = vmatpush3.msra.mxu1 %v7734_v22 }
  0x49   :  { %4197 = vmatprep.subr.mxu0 %v4866_v13  ;;  %4230 = vmatprep.subr.mxu1 %v7735_v62 }
  0x4a   :  { %248 = vmatprep.mubr.f32.mxu0 %v247_v46  ;;  %4198 = vmatpush3.msra.mxu0 %v4873_v61  ;;  %v7741_v46 = vld [vmem:[#allocation20_spill] sm:$0xff] }
  0x4b   :  { %4231 = vmatpush3.msra.mxu1 %v7736_v20  ;;  %254 = vmatmul.mubr.f32.gmra.mxu0 %v253_v53  ;;  %v7740_v53 = vand.u32 4294901760, %v4442_v18  ;;  %v7746_v18 = vand.u32 4294901760, %v4493_v31  ;;  %v7751_v31 = vand.u32 4294901760, %v4850_v30 }
  0x4c   :  { %4199 = vmatprep.subr.mxu0 %v4890_v41  ;;  %4232 = vmatprep.subr.mxu1 %v7737_v17 }
  0x4d   :  { %4200 = vmatpush3.msra.mxu0 %v4900_v47  ;;  %4233 = vmatpush3.msra.mxu1 %v7738_v60 }
  0x4e   :  { %491 = vmatprep.mubr.f32.mxu1 %v4938_v33  ;;  %4201 = vmatprep.subr.mxu0 %v4909_v43  ;;  %v7742_v33 = vand.u32 4294901760, %v4464_v23  ;;  %v7747_v23 = vld [vmem:[#allocation26_spill] sm:$0xff] }
  0x4f   :  { %4234 = vmatprep.subr.mxu1 %v7739_v49  ;;  %493 = vmatmul.mubr.f32.gmra.mxu1 %v4942_v7  ;;  %v7743_v7 = vld [vmem:[#allocation22_spill] sm:$0xff] }
  0x50   :  { %4202 = vmatpush3.msra.mxu0 %v4916_v29  ;;  %635 = vmatprep.mubr.f32.mxu0 %v4850_v30  ;;  %v7744_v29 = vand.u32 4294901760, %v4470_v25  ;;  %v7749_v25 = vand.u32 4294901760, %v4518_v40  ;;  %v7754_v40 = vand.u32 4294901760, %v4582_v0  ;;  %v7756_v30 = vand.u32 4294901760, %v4610_v42 }
  0x51   :  { %4235 = vmatpush3.msra.mxu1 %v4690_v63  ;;  %638 = vmatmul.mubr.f32.vlgmr.msra.gmra.mxu0 %v4862_v19  ;;  %v7760_v0 = vand.u32 4294901760, %v4639_v21  ;;  %v7766_v42 = vand.u32 4294901760, %v4718_v34  ;;  %v7771_v21 = vld [vmem:[#allocation23_spill] sm:$0xff] }
  0x52   :  { %4236 = vmatprep.subr.mxu1 %v4707_v39  ;;  %4253 = vmatprep.subr.mxu0 %v7740_v53  ;;  %v7745_v39 = vld [vmem:[#allocation24_spill] sm:$0xff]  ;;  %v7753_v53 = vand.u32 4294901760, %v4862_v19  ;;  %v7758_v19 = vand.u32 4294901760, %v4622_v48 }
  0x53   :  { %4237 = vmatpush3.msra.mxu1 %v7741_v46  ;;  %4254 = vmatpush3.msra.mxu0 %v7742_v33  ;;  %v7748_v33 = vand.u32 4294901760, %v4502_v35  ;;  %v7752_v35 = vand.u32 4294901760, %v4567_v59  ;;  %v7757_v59 = vand.u32 4294901760, %v4950_v44 }
  0x54   :  { %498 = vmatprep.mubr.f32.mxu1 %v4957_v56  ;;  %4238 = vmatprep.subr.mxu1 %v7743_v7 }
  0x55   :  { %4255 = vmatprep.subr.mxu0 %v7744_v29  ;;  %500 = vmatmul.mubr.f32.gmra.mxu1 %v4966_v50  ;;  %v7750_v29 = vand.u32 4294901760, %v4532_v45  ;;  %v7755_v45 = vand.u32 4294901760, %v4596_v8  ;;  %v7764_v8 = vand.u32 4294901760, %v4694_v28  ;;  %v7774_v28 = vld [vmem:[#allocation7_spill] sm:$0xff] }
  0x56   :  { %644 = vmatprep.mubr.f32.mxu0 %v4950_v44  ;;  %4239 = vmatpush3.msra.mxu1 %v7745_v39  ;;  %v7777_v44 = vand.u32 4294901760, %v4789_v1  ;;  %v7783_v1 = vand.u32 4294901760, %v4854_v32 }
  0x57   :  { %4256 = vmatpush3.msra.mxu0 %v7746_v18  ;;  %4240 = vmatprep.subr.mxu1 %v7747_v23 }
  0x58   :  { %647 = vmatmul.mubr.f32.gmra.mxu0 %v4962_v38  ;;  %4257 = vmatprep.subr.mxu0 %v7748_v33 }
  0x59   :  { %4241 = vmatpush3.msra.mxu1 %v4785_v14  ;;  %4258 = vmatpush3.msra.mxu0 %v7749_v25  ;;  %v7793_v25 = vld [vmem:[#allocation19_spill] sm:$0xff] }
  0x5a   :  { %4242 = vmatprep.subr.mxu1 %v4802_v52  ;;  %4259 = vmatprep.subr.mxu0 %v7750_v29 }
  0x5b   :  { %653 = vmatprep.mubr.f32.mxu0 %v4974_v51  ;;  %4243 = vmatpush3.msra.mxu1 %v4824_v58 }
  0x5c   :  { %760 = vmatprep.mubr.f32.mxu1 %v7751_v31  ;;  %4260 = vmatpush3.msra.mxu0 %v7752_v35  ;;  %v7557_v31 = vmov 0.0   ;;  %v75_v35 = vld [vmem:[%s7363_s1 + $0x150] sm:$0xff] }
  0x5d   :  { %764 = vmatmul.mubr.f32.vlgmr.msra.gmra.mxu1 %v7753_v53  ;;  %656 = vmatmul.mubr.f32.gmra.mxu0 %v4982_v37 }
  0x5e   :  { %4261 = vmatprep.subr.mxu0 %v7754_v40  ;;  %4294 = vmatprep.subr.mxu1 %v4404_v3  ;;  %v7759_v3 = vand.u32 4294901760, %v4962_v38  ;;  %v7778_v38 = vld [vmem:[#allocation9_spill] sm:$0xff]  ;;  %v7794_v40 = vld [vmem:[#allocation32_spill] sm:$0xff] }
  0x5f   :  { %4262 = vmatpush3.msra.mxu0 %v7755_v45  ;;  %4295 = vmatpush3.msra.mxu1 %v4406_v4  ;;  %v7761_v4 = vand.u32 4294901760, %v4651_v6  ;;  %v7772_v6 = vand.u32 4294901760, %v7771_v21  ;;  %v70_v21 = vld [vmem:[%s7363_s1 + $0x128] sm:$0xff] }
  0x60   :  { %4263 = vmatprep.subr.mxu0 %v7756_v30  ;;  %4296 = vmatprep.subr.mxu1 %v4408_v5  ;;  %v7762_v5 = vand.u32 4294901760, %v4678_v55  ;;  %v7768_v55 = vld [vmem:[#allocation21_spill] sm:$0xff] }
  0x61   :  { %771 = vmatprep.mubr.f32.mxu1 %v7757_v59  ;;  %4264 = vmatpush3.msra.mxu0 %v7758_v19  ;;  %v7769_v48 = vand.u32 4294901760, %v7768_v55  ;;  %v5204_v59 = vand.u32 4294901760, %v75_v35  ;;  %v7795_v19 = vld [vmem:[#allocation33_spill] sm:$0xff] }
  0x62   :  { %4297 = vmatpush3.msra.mxu1 %v4419_v9  ;;  %4265 = vmatprep.subr.mxu0 %v7760_v0  ;;  %v7763_v9 = vand.u32 4294901760, %v4974_v51  ;;  %v7779_v51 = vld [vmem:[#allocation28_spill] sm:$0xff]  ;;  %v73_v0 = vld [vmem:[%s7363_s1 + $0x140] sm:$0xff] }
  0x63   :  { %775 = vmatmul.mubr.f32.gmra.mxu1 %v7759_v3  ;;  %4298 = vmatprep.subr.mxu1 %v4421_v10  ;;  %v7765_v10 = vand.u32 4294901760, %v4982_v37  ;;  %v7775_v37 = vld [vmem:[#allocation27_spill] sm:$0xff]  ;;  %v7780_v18 = vand.u32 4294901760, %v7779_v51 }
  0x64   :  { %4266 = vmatpush3.msra.mxu0 %v7761_v4  ;;  %4299 = vmatpush3.msra.mxu1 %v4423_v11  ;;  %v7767_v11 = vld [vmem:[#allocation5_spill] sm:$0xff]  ;;  %v7776_v34 = vand.u32 4294901760, %v7775_v37 }
  0x65   :  { %4267 = vmatprep.subr.mxu0 %v7762_v5  ;;  %4300 = vmatprep.subr.mxu1 %v4435_v15  ;;  %v7770_v15 = vld [vmem:[#allocation6_spill] sm:$0xff] }
  0x66   :  { %782 = vmatprep.mubr.f32.mxu1 %v7763_v9  ;;  %4268 = vmatpush3.msra.mxu0 %v7764_v8 }
  0x67   :  { %4301 = vmatpush3.msra.mxu1 %v4437_v16  ;;  %4269 = vmatprep.subr.mxu0 %v7766_v42  ;;  %v7773_v16 = vand.u32 4294901760, %v7725_v54  ;;  %v80_v54 = vld [vmem:[%s7363_s1 + $0x178] sm:$0xff] }
  0x68   :  { %786 = vmatmul.mubr.f32.gmra.mxu1 %v7765_v10  ;;  %4302 = vmatprep.subr.mxu1 %v7767_v11  ;;  %v5141_v33 = vand.u32 4294901760, %v80_v54  ;;  %v5241_v10 = vand.u32 4294901760, %v73_v0  ;;  %v71_v11 = vld [vmem:[%s7363_s1 + $0x130] sm:$0xff] }
  0x69   :  { %4270 = vmatpush3.msra.mxu0 %v7769_v48  ;;  %4303 = vmatpush3.msra.mxu1 %v7770_v15  ;;  %v5272_v37 = vand.u32 4294901760, %v71_v11 }
  0x6a   :  { %4271 = vmatprep.subr.mxu0 %v7772_v6  ;;  %4304 = vmatprep.subr.mxu1 %v4467_v24  ;;  %v7781_v24 = vand.u32 4294901760, %v4828_v36  ;;  %v7784_v36 = vand.u32 4294901760, %v4866_v13  ;;  %v7787_v13 = vand.u32 4294901760, %v4900_v47  ;;  %v7791_v47 = vld [vmem:[#allocation29_spill] sm:$0xff] }
  0x6b   :  { %4272 = vmatpush3.msra.mxu0 %v7773_v16  ;;  %4305 = vmatpush3.msra.mxu1 %v7774_v28  ;;  %v5270_v28 = vsub.f32 %v73_v0, %v5241_v10 }
  0x6c   :  { %4273 = vmatprep.subr.mxu0 %v7776_v34  ;;  %4306 = vmatprep.subr.mxu1 %v7729_v27  ;;  %v7782_v27 = vand.u32 4294901760, %v4841_v57  ;;  %v7785_v57 = vand.u32 4294901760, %v4873_v61  ;;  %v7788_v61 = vand.u32 4294901760, %v4909_v43  ;;  %v69_v34 = vld [vmem:[%s7363_s1 + $0x120] sm:$0xff] }
  0x6d   :  { %4274 = vmatpush3.msra.mxu0 %v7777_v44  ;;  %4307 = vmatpush3.msra.mxu1 %v7778_v38  ;;  %v5279_v38 = vand.u32 4294901760, %v70_v21 }
  0x6e   :  { %4275 = vmatprep.subr.mxu0 %v7780_v18  ;;  %4308 = vmatprep.subr.mxu1 %v7731_v12  ;;  %v79_v12 = vld [vmem:[%s7363_s1 + $0x170] sm:$0xff] }
  0x6f   :  { %4276 = vmatpush3.msra.mxu0 %v7781_v24  ;;  %4309 = vmatpush3.msra.mxu1 %v7732_v26  ;;  %v7786_v26 = vand.u32 4294901760, %v4890_v41  ;;  %v5149_v32 = vand.u32 4294901760, %v79_v12  ;;  %v77_v41 = vld [vmem:[%s7363_s1 + $0x160] sm:$0xff] }
  0x70   :  { %4277 = vmatprep.subr.mxu0 %v7782_v27  ;;  %4310 = vmatprep.subr.mxu1 %v7733_v2  ;;  %v7789_v2 = vld [vmem:[#allocation31_spill] sm:$0xff]  ;;  %v5178_v29 = vand.u32 4294901760, %v77_v41 }
  0x71   :  { %4278 = vmatpush3.msra.mxu0 %v7783_v1  ;;  %4311 = vmatpush3.msra.mxu1 %v7734_v22  ;;  %v78_v22 = vld [vmem:[%s7363_s1 + $0x168] sm:$0xff]  ;;  %v5174_v43 = vsub.f32 %v79_v12, %v5149_v32  ;;  %v5294_v1 = vand.u32 4294901760, %v69_v34  ;;  %v68_v12 = vld [vmem:[%s7363_s1 + $0x118] sm:$0xff] }
  0x72   :  { %4279 = vmatprep.subr.mxu0 %v7784_v36  ;;  %4312 = vmatprep.subr.mxu1 %v7735_v62  ;;  %v5161_v62 = vsub.f32 %v80_v54, %v5141_v33  ;;  %v5202_v30 = vsub.f32 %v77_v41, %v5178_v29  ;;  %v5302_v36 = vsub.f32 %v71_v11, %v5272_v37  ;;  %v5317_v41 = vand.u32 4294901760, %v68_v12 }
  0x73   :  { %4280 = vmatpush3.msra.mxu0 %v7785_v57  ;;  %4313 = vmatpush3.msra.mxu1 %v7736_v20  ;;  %v7790_v20 = vand.u32 4294901760, %v7789_v2  ;;  %v7455_v57 = vand.u32 4294901760, %v5270_v28 }
  0x74   :  { %4281 = vmatprep.subr.mxu0 %v7786_v26  ;;  %4314 = vmatprep.subr.mxu1 %v7737_v17  ;;  %v5169_v17 = vand.u32 4294901760, %v78_v22  ;;  %v7460_v9 = vand.u32 4294901760, %v5202_v30  ;;  %v5307_v26 = vsub.f32 %v70_v21, %v5279_v38 }
  0x75   :  { %4282 = vmatpush3.msra.mxu0 %v7787_v13  ;;  %4315 = vmatpush3.msra.mxu1 %v7738_v60  ;;  %v7792_v60 = vld [vmem:[#allocation30_spill] sm:$0xff] }
  0x76   :  { %4283 = vmatprep.subr.mxu0 %v7788_v61  ;;  %4316 = vmatprep.subr.mxu1 %v7739_v49  ;;  %v76_v49 = vld [vmem:[%s7363_s1 + $0x158] sm:$0xff]  ;;  %v5192_v53 = vsub.f32 %v78_v22, %v5169_v17  ;;  %v1257_v6 = vsub.f32 %v5202_v30, %v7460_v9  ;;  %v67_v22 = vld [vmem:[%s7363_s1 + $0x110] sm:$0xff] }
  0x77   :  { %4284 = vmatpush3.msra.mxu0 %v7790_v20  ;;  %952 = vmatprep.mubr.f32.mxu0 %v7791_v47  ;;  %v5196_v45 = vand.u32 4294901760, %v76_v49  ;;  %v24_v9 = vld [vmem:[%s7362_s0 + $0x18] sm:$0xff] }
  0x78   :  { %4317 = vmatpush3.msra.mxu1 %v4690_v63  ;;  %954 = vmatmul.mubr.f32.vlgmr.msra.gmra.mxu0 %v7792_v60  ;;  %v7464_v63 = vand.u32 4294901760, %v5161_v62  ;;  %v1258_v54 = vand.u32 4294901760, %v1257_v6  ;;  %v94_v6 = vld [vmem:[%s7363_s1 + $0x1e8] sm:$0xff] }
  0x79   :  { %4318 = vmatprep.subr.mxu1 %v7793_v25  ;;  %1091 = vmatprep.subr.mxu0 %v7557_v31  ;;  %v5332_v25 = vand.u32 4294901760, %v67_v22 }
  0x7a   :  { %4319 = vmatpush3.msra.mxu1 %v7741_v46  ;;  %1093 = vmatpush1.msra.mxu0 %v5141_v33  ;;  %v7463_v46 = vand.u32 4294901760, %v5174_v43  ;;  %v1236_v3 = vsub.f32 %v5161_v62, %v7464_v63  ;;  %v84_v63 = vld [vmem:[%s7363_s1 + $0x198] sm:$0xff] }
  0x7b   :  { %4320 = vmatprep.subr.mxu1 %v7743_v7  ;;  %1094 = vmatprep.subr.mxu0 %v7557_v31  ;;  %v74_v7 = vld [vmem:[%s7363_s1 + $0x148] sm:$0xff]  ;;  %7796 = vst [vmem:[#allocation25_spill] sm:$0xff] %v5332_v25 }
  0x7c   :  { %959 = vmatprep.mubr.f32.mxu0 %v7794_v40  ;;  %4321 = vmatpush3.msra.mxu1 %v7745_v39  ;;  %v7462_v39 = vand.u32 4294901760, %v5192_v53  ;;  %v1243_v4 = vsub.f32 %v5174_v43, %v7463_v46  ;;  %v5228_v5 = vand.u32 4294901760, %v74_v7  ;;  %v1237_v8 = vand.u32 4294901760, %v1236_v3 }
  0x7d   :  { %1096 = vmatpush1.msra.mxu0 %v5149_v32  ;;  %4322 = vmatprep.subr.mxu1 %v7747_v23  ;;  %v5223_v23 = vsub.f32 %v76_v49, %v5196_v45  ;;  %v7451_v49 = vand.u32 4294901760, %v5302_v36 }
  0x7e   :  { %961 = vmatmul.mubr.f32.gmra.mxu0 %v7795_v19  ;;  %1097 = vmatprep.subr.mxu0 %v7557_v31  ;;  %v1250_v42 = vsub.f32 %v5192_v53, %v7462_v39  ;;  %v5254_v55 = vsub.f32 %v74_v7, %v5228_v5 }
  0x7f   :  { %4323 = vmatpush3.msra.mxu1 %v4785_v14  ;;  %1099 = vmatpush1.msra.mxu0 %v5169_v17  ;;  %v5233_v14 = vsub.f32 %v75_v35, %v5204_v59  ;;  %v7459_v15 = vand.u32 4294901760, %v5223_v23  ;;  %v65_v35 = vld [vmem:[%s7363_s1 + $0x100] sm:$0xff]  ;;  %v1299_v11 = vsub.f32 %v5302_v36, %v7451_v49 }
  0x80   :  { %4324 = vmatprep.subr.mxu1 %v4802_v52  ;;  %1100 = vmatprep.subr.mxu0 %v7557_v31  ;;  %v72_v52 = vld [vmem:[%s7363_s1 + $0x138] sm:$0xff]  ;;  %v1251_v44 = vand.u32 4294901760, %v1250_v42  ;;  %v7456_v24 = vand.u32 4294901760, %v5254_v55  ;;  %v5359_v42 = vsub.f32 %v67_v22, %v5332_v25 }
  0x81   :  { %966 = vmatprep.mubr.f32.mxu0 %v4957_v56  ;;  %4325 = vmatpush3.msra.mxu1 %v4824_v58  ;;  %v1244_v58 = vand.u32 4294901760, %v1243_v4  ;;  %v5256_v48 = vand.u32 4294901760, %v72_v52  ;;  %v7457_v16 = vand.u32 4294901760, %v5233_v14  ;;  %v1264_v18 = vsub.f32 %v5223_v23, %v7459_v15 }
  0x82   :  { %1070 = vmatprep.mubr.f32.mxu1 %v7791_v47  ;;  %1102 = vmatpush1.msra.mxu0 %v5178_v29  ;;  %v1278_v61 = vsub.f32 %v5254_v55, %v7456_v24  ;;  %v5322_v47 = vsub.f32 %v69_v34, %v5294_v1  ;;  %v5355_v4 = vand.u32 4294901760, %v65_v35  ;;  %v1300_v22 = vand.u32 4294901760, %v1299_v11 }
  0x83   :  { %1072 = vmatmul.mubr.f32.vlgmr.msra.gmra.mxu1 %v7792_v60  ;;  %968 = vmatmul.mubr.f32.gmra.mxu0 %v4966_v50  ;;  %v5283_v51 = vsub.f32 %v72_v52, %v5256_v48  ;;  %v1271_v27 = vsub.f32 %v5233_v14, %v7457_v16  ;;  %v1265_v13 = vand.u32 4294901760, %v1264_v18  ;;  %v1285_v60 = vsub.f32 %v5270_v28, %v7455_v57  ;;  %v88_v57 = vld [vmem:[%s7363_s1 + $0x1b8] sm:$0xff] }
  0x84   :  { %1103 = vmatprep.subr.mxu0 %v7557_v31  ;;  %1232 = vmatprep.subr.mxu1 %v7557_v31  ;;  %v1279_v7 = vand.u32 4294901760, %v1278_v61  ;;  %7798 = vst [vmem:[#allocation10_spill] sm:$0xff] %v5355_v4  ;;  %v5392_v61 = vand.u32 4294901760, %v94_v6 }
  0x85   :  { %1105 = vmatpush1.msra.mxu0 %v5196_v45  ;;  %1238 = vmatpush1.msra.mxu1 %v1237_v8  ;;  %v7453_v2 = vand.u32 4294901760, %v5283_v51  ;;  %v1272_v20 = vand.u32 4294901760, %v1271_v27  ;;  %v1286_v8 = vand.u32 4294901760, %v1285_v60  ;;  %v5383_v27 = vsub.f32 %v65_v35, %v5355_v4  ;;  %v92_v60 = vld [vmem:[%s7363_s1 + $0x1d8] sm:$0xff] }
  0x86   :  { %1106 = vmatprep.subr.mxu0 %v7557_v31  ;;  %1239 = vmatprep.subr.mxu1 %v7557_v31  ;;  %7800 = vst [vmem:[#allocation12_spill] sm:$0xff] %v5392_v61 }
  0x87   :  { %1077 = vmatprep.mubr.f32.mxu1 %v7794_v40  ;;  %1108 = vmatpush1.msra.mxu0 %v5204_v59  ;;  %v95_v40 = vld [vmem:[%s7363_s1 + $0x1f0] sm:$0xf]  ;;  %v1292_v3 = vsub.f32 %v5283_v51, %v7453_v2  ;;  %v7454_v11 = vand.u32 4294901760, %v5383_v27 }
  0x88   :  { %1245 = vmatpush1.msra.mxu1 %v1244_v58  ;;  %1109 = vmatprep.subr.mxu0 %v7557_v31  ;;  %v115_v52 = vsel %vm113_vm0, %v95_v40, 0  ;;  %v7448_v58 = vand.u32 4294901760, %v5322_v47 }
  0x89   :  { %1079 = vmatmul.mubr.f32.gmra.mxu1 %v7795_v19  ;;  %1246 = vmatprep.subr.mxu1 %v7557_v31  ;;  %v5346_v19 = vsub.f32 %v68_v12, %v5317_v41  ;;  %v1293_v34 = vand.u32 4294901760, %v1292_v3  ;;  %v5377_v18 = vand.u32 4294901760, %v115_v52  ;;  %v93_v12 = vld [vmem:[%s7363_s1 + $0x1e0] sm:$0xff] }
  0x8a   :  { %1111 = vmatpush1.msra.mxu0 %v5228_v5  ;;  %1252 = vmatpush1.msra.mxu1 %v1251_v44 }
  0x8b   :  { %1112 = vmatprep.subr.mxu0 %v7557_v31  ;;  %1253 = vmatprep.subr.mxu1 %v7557_v31  ;;  %7799 = vst [vmem:[#allocation11_spill] sm:$0xff] %v5377_v18  ;;  %v5402_v35 = vsub.f32 %v115_v52, %v5377_v18 }
  0x8c   :  { %1084 = vmatprep.mubr.f32.mxu1 %v4957_v56  ;;  %1114 = vmatpush1.msra.mxu0 %v5241_v10  ;;  %v66_v56 = vld [vmem:[%s7363_s1 + $0x108] sm:$0xff] }
  0x8d   :  { %1259 = vmatpush1.msra.mxu1 %v1258_v54  ;;  %1115 = vmatprep.subr.mxu0 %v7557_v31  ;;  %v5351_v0 = vand.u32 4294901760, %v66_v56  ;;  %v7447_v54 = vand.u32 4294901760, %v5346_v19 }
  0x8e   :  { %1086 = vmatmul.mubr.f32.gmra.mxu1 %v4966_v50  ;;  %1260 = vmatprep.subr.mxu1 %v7557_v31  ;;  %v7450_v50 = vand.u32 4294901760, %v5307_v26 }
  0x8f   :  { %1117 = vmatpush1.msra.mxu0 %v5256_v48  ;;  %1266 = vmatpush1.msra.mxu1 %v1265_v13  ;;  %7797 = vst [vmem:[#allocation8_spill] sm:$0xff] %v5351_v0  ;;  %v5375_v44 = vsub.f32 %v66_v56, %v5351_v0  ;;  %v1313_v13 = vsub.f32 %v5322_v47, %v7448_v58  ;;  %v90_v58 = vld [vmem:[%s7363_s1 + $0x1c8] sm:$0xff] }
  0x90   :  { %1118 = vmatprep.subr.mxu0 %v7557_v31  ;;  %1267 = vmatprep.subr.mxu1 %v7557_v31  ;;  %v1306_v21 = vsub.f32 %v5307_v26, %v7450_v50  ;;  %v1320_v40 = vsub.f32 %v5346_v19, %v7447_v54  ;;  %v5423_v54 = vand.u32 4294901760, %v92_v60  ;;  %v7458_v50 = vand.u32 4294901760, %v5402_v35 }
  0x91   :  { %1120 = vmatpush1.msra.mxu0 %v5272_v37  ;;  %1273 = vmatpush1.msra.mxu1 %v1272_v20  ;;  %v7449_v20 = vand.u32 4294901760, %v5359_v42  ;;  %v7452_v3 = vand.u32 4294901760, %v5375_v44  ;;  %v1314_v52 = vand.u32 4294901760, %v1313_v13  ;;  %v5445_v49 = vand.u32 4294901760, %v90_v58 }
  0x92   :  { %1121 = vmatprep.subr.mxu0 %v7557_v31  ;;  %1274 = vmatprep.subr.mxu1 %v7557_v31  ;;  %v1307_v56 = vand.u32 4294901760, %v1306_v21  ;;  %v5418_v21 = vsub.f32 %v94_v6, %v5392_v61  ;;  %7803 = vst [vmem:[#allocation15_spill] sm:$0xff] %v5423_v54  ;;  %v1321_v6 = vand.u32 4294901760, %v1320_v40 }
  0x93   :  { %1123 = vmatpush1.msra.mxu0 %v5279_v38  ;;  %1280 = vmatpush1.msra.mxu1 %v1279_v7  ;;  %v5407_v7 = vand.u32 4294901760, %v93_v12  ;;  %7806 = vst [vmem:[#allocation18_spill] sm:$0xff] %v5445_v49  ;;  %v5476_v16 = vsub.f32 %v90_v58, %v5445_v49 }
  0x94   :  { %1124 = vmatprep.subr.mxu0 %v7557_v31  ;;  %1281 = vmatprep.subr.mxu1 %v7557_v31  ;;  %7802 = vst [vmem:[#allocation14_spill] sm:$0xff] %v5418_v21  ;;  %v7461_v2 = vand.u32 4294901760, %v5418_v21 }
  0x95   :  { %1126 = vmatpush1.msra.mxu0 %v5294_v1  ;;  %1287 = vmatpush1.msra.mxu1 %v1286_v8  ;;  %7801 = vst [vmem:[#allocation13_spill] sm:$0xff] %v5407_v7  ;;  %v91_v8 = vld [vmem:[%s7363_s1 + $0x1d0] sm:$0xff]  ;;  %v5434_v13 = vsub.f32 %v93_v12, %v5407_v7  ;;  %v89_v12 = vld [vmem:[%s7363_s1 + $0x1c0] sm:$0xff]  ;;  %7810 = vst [vmem:[#allocation26_spill] sm:$0xff] %v5476_v16 }
  0x96   :  { %1127 = vmatprep.subr.mxu0 %v7557_v31  ;;  %1288 = vmatprep.subr.mxu1 %v7557_v31 }
  0x97   :  { %1129 = vmatpush1.msra.mxu0 %v5317_v41  ;;  %1294 = vmatpush1.msra.mxu1 %v1293_v34  ;;  %v1327_v34 = vsub.f32 %v5359_v42, %v7449_v20  ;;  %7805 = vst [vmem:[#allocation17_spill] sm:$0xff] %v5434_v13  ;;  %v1334_v20 = vsub.f32 %v5375_v44, %v7452_v3  ;;  %v7465_v24 = vand.u32 4294901760, %v5434_v13 }
  0x98   :  { %1130 = vmatprep.subr.mxu0 %v7557_v31  ;;  %1295 = vmatprep.subr.mxu1 %v7557_v31  ;;  %v5452_v3 = vsub.f32 %v92_v60, %v5423_v54  ;;  %v1350_v60 = vsub.f32 %v5402_v35, %v7458_v50  ;;  %v5482_v50 = vand.u32 4294901760, %v88_v57 }
  0x99   :  { %1132 = vmatpush1.msra.mxu0 %v5332_v25  ;;  %1301 = vmatpush1.msra.mxu1 %v1300_v22  ;;  %v5430_v22 = vand.u32 4294901760, %v91_v8  ;;  %v1328_v40 = vand.u32 4294901760, %v1327_v34  ;;  %v5467_v34 = vand.u32 4294901760, %v89_v12  ;;  %v1364_v46 = vsub.f32 %v5434_v13, %v7465_v24 }
  0x9a   :  { %1133 = vmatprep.subr.mxu0 %v7557_v31  ;;  %1302 = vmatprep.subr.mxu1 %v7557_v31  ;;  %7807 = vst [vmem:[#allocation20_spill] sm:$0xff] %v5452_v3  ;;  %7811 = vst [vmem:[#allocation5_spill] sm:$0xff] %v5482_v50  ;;  %v7468_v15 = vand.u32 4294901760, %v5452_v3 }
  0x9b   :  { %1135 = vmatpush1.msra.mxu0 %v5351_v0  ;;  %7804 = vst [vmem:[#allocation16_spill] sm:$0xff] %v5430_v22  ;;  %1308 = vmatpush1.msra.mxu1 %v1307_v56  ;;  %v1341_v56 = vsub.f32 %v5383_v27, %v7454_v11  ;;  %v5458_v11 = vsub.f32 %v91_v8, %v5430_v22  ;;  %7809 = vst [vmem:[#allocation24_spill] sm:$0xff] %v5467_v34  ;;  %v87_v8 = vld [vmem:[%s7363_s1 + $0x1b0] sm:$0xff] }
  0x9c   :  { %1136 = vmatprep.subr.mxu0 %v7557_v31  ;;  %1309 = vmatprep.subr.mxu1 %v7557_v31  ;;  %v5490_v58 = vand.u32 4294901760, %v87_v8  ;;  %v5498_v39 = vsub.f32 %v89_v12, %v5467_v34  ;;  %v1371_v24 = vsub.f32 %v5452_v3, %v7468_v15  ;;  %v5547_v3 = vand.u32 4294901760, %v84_v63 }
  0x9d   :  { %1138 = vmatpush1.msra.mxu0 %v5355_v4  ;;  %1315 = vmatpush1.msra.mxu1 %v1314_v52  ;;  %7808 = vst [vmem:[#allocation22_spill] sm:$0xff] %v5458_v11  ;;  %v1335_v52 = vand.u32 4294901760, %v1334_v20  ;;  %v1357_v20 = vsub.f32 %v5418_v21, %v7461_v2  ;;  %v1351_v2 = vand.u32 4294901760, %v1350_v60  ;;  %v5512_v60 = vsub.f32 %v88_v57, %v5482_v50 }
  0x9e   :  { %1141 = vmatprep.subr.mxu0 %v7557_v31  ;;  %1316 = vmatprep.subr.mxu1 %v7557_v31  ;;  %7812 = vst [vmem:[#allocation21_spill] sm:$0xff] %v5490_v58  ;;  %7813 = vst [vmem:[#allocation6_spill] sm:$0xff] %v5498_v39  ;;  %v5531_v57 = vsub.f32 %v87_v8, %v5490_v58  ;;  %v7820_v8 = vand.u32 4294901760, %v5476_v16 }
  0x9f   :  { %1143 = vmatpush2.msra.mxu0 %v5377_v18  ;;  %1322 = vmatpush1.msra.mxu1 %v1321_v6  ;;  %v1342_v6 = vand.u32 4294901760, %v1341_v56  ;;  %v105_v56 = vsel %vm103_vm1, %v24_v9, 0  ;;  %v1358_v12 = vand.u32 4294901760, %v1357_v20  ;;  %7814 = vst [vmem:[#allocation23_spill] sm:$0xff] %v5512_v60  ;;  %v23_v9 = vld [vmem:[%s7362_s0 + $0x10] sm:$0xff]  ;;  %v7817_v20 = vand.u32 4294901760, %v5458_v11 }
  0xa0   :  { %1144 = vmatprep.subr.mxu0 %v7557_v31  ;;  %1323 = vmatprep.subr.mxu1 %v7557_v31  ;;  %7816 = vst [vmem:[#allocation27_spill] sm:$0xff] %v5531_v57  ;;  %v5540_v4 = vand.u32 4294901760, %v105_v56  ;;  %7821 = vst [vmem:[#allocation31_spill] sm:$0xff] %v5547_v3 }
  0xa1   :  { %1146 = vmatpush2.msra.mxu0 %v5392_v61  ;;  %1329 = vmatpush1.msra.mxu1 %v1328_v40  ;;  %v86_v40 = vld [vmem:[%s7363_s1 + $0x1a8] sm:$0xff]  ;;  %v1378_v15 = vsub.f32 %v5458_v11, %v7817_v20  ;;  %v1372_v20 = vand.u32 4294901760, %v1371_v24  ;;  %v27_v24 = vld [vmem:[%s7362_s0 + $0x30] sm:$0xff]  ;;  %v7825_v11 = vand.u32 4294901760, %v5498_v39 }
  0xa2   :  { %1147 = vmatprep.subr.mxu0 %v7557_v31  ;;  %1330 = vmatprep.subr.mxu1 %v7557_v31  ;;  %7819 = vst [vmem:[#allocation28_spill] sm:$0xff] %v5540_v4 }
  0xa3   :  { %1149 = vmatpush2.msra.mxu0 %v5407_v7  ;;  %1336 = vmatpush1.msra.mxu1 %v1335_v52  ;;  %v85_v52 = vld [vmem:[%s7363_s1 + $0x1a0] sm:$0xff]  ;;  %v1365_v7 = vand.u32 4294901760, %v1364_v46 }
  0xa4   :  { %1150 = vmatprep.subr.mxu0 %v7557_v31  ;;  %1337 = vmatprep.subr.mxu1 %v7557_v31  ;;  %v5537_v61 = vand.u32 4294901760, %v85_v52 }
  0xa5   :  { %1152 = vmatpush2.msra.mxu0 %v5423_v54  ;;  %1343 = vmatpush1.msra.mxu1 %v1342_v6  ;;  %v5517_v54 = vand.u32 4294901760, %v86_v40  ;;  %v28_v6 = vld [vmem:[%s7362_s0 + $0x38] sm:$0xff] }
  0xa6   :  { %1153 = vmatprep.subr.mxu0 %v7557_v31  ;;  %1346 = vmatprep.subr.mxu1 %v7557_v31  ;;  %7818 = vst [vmem:[#allocation9_spill] sm:$0xff] %v5537_v61  ;;  %v108_v46 = vsel %vm103_vm1, %v28_v6, 0  ;;  %v82_v6 = vld [vmem:[%s7363_s1 + $0x188] sm:$0xff] }
  0xa7   :  { %7815 = vst [vmem:[#allocation7_spill] sm:$0xff] %v5517_v54  ;;  %1155 = vmatpush2.msra.mxu0 %v5430_v22  ;;  %1352 = vmatpush2.msra.mxu1 %v1351_v2  ;;  %v1385_v22 = vsub.f32 %v5476_v16, %v7820_v8  ;;  %v5549_v2 = vand.u32 4294901760, %v23_v9  ;;  %v5554_v18 = vsub.f32 %v86_v40, %v5517_v54  ;;  %v1379_v8 = vand.u32 4294901760, %v1378_v15  ;;  %v32_v40 = vld [vmem:[%s7362_s0 + $0x58] sm:$0xf] }
  0xa8   :  { %1156 = vmatprep.subr.mxu0 %v7557_v31  ;;  %1353 = vmatprep.subr.mxu1 %v7557_v31  ;;  %v1392_v15 = vsub.f32 %v5498_v39, %v7825_v11  ;;  %v5582_v16 = vand.u32 4294901760, %v108_v46  ;;  %v5610_v25 = vand.u32 4294901760, %v82_v6 }
  0xa9   :  { %1158 = vmatpush2.msra.mxu0 %v5445_v49  ;;  %7822 = vst [vmem:[#allocation29_spill] sm:$0xff] %v5549_v2  ;;  %1359 = vmatpush2.msra.mxu1 %v1358_v12  ;;  %7823 = vst [vmem:[#allocation30_spill] sm:$0xff] %v5554_v18  ;;  %v83_v49 = vld [vmem:[%s7363_s1 + $0x190] sm:$0xff]  ;;  %v5571_v12 = vsub.f32 %v85_v52, %v5537_v61  ;;  %v5587_v52 = vsub.f32 %v84_v63, %v5547_v3  ;;  %v5602_v63 = vand.u32 4294901760, %v27_v24 }
  0xaa   :  { %1159 = vmatprep.subr.mxu0 %v7557_v31  ;;  %1360 = vmatprep.subr.mxu1 %v7557_v31  ;;  %7827 = vst [vmem:[#allocation33_spill] sm:$0xff] %v5582_v16  ;;  %v5589_v0 = vand.u32 4294901760, %v83_v49  ;;  %v5592_v11 = vsub.f32 %v23_v9, %v5549_v2  ;;  %v7832_v9 = vand.u32 4294901760, %v5531_v57  ;;  %7833 = vst [vmem:[#allocation37_spill] sm:$0xff] %v5610_v25 }
  0xab   :  { %1161 = vmatpush2.msra.mxu0 %v5467_v34  ;;  %1366 = vmatpush2.msra.mxu1 %v1365_v7  ;;  %7824 = vst [vmem:[#allocation19_spill] sm:$0xff] %v5571_v12  ;;  %v5580_v34 = vsub.f32 %v105_v56, %v5540_v4  ;;  %v1386_v7 = vand.u32 4294901760, %v1385_v22  ;;  %7828 = vst [vmem:[#allocation34_spill] sm:$0xff] %v5587_v52  ;;  %v7830_v56 = vand.u32 4294901760, %v5512_v60  ;;  %v81_v22 = vld [vmem:[%s7363_s1 + $0x180] sm:$0xff] }
  0xac   :  { %1162 = vmatprep.subr.mxu0 %v7557_v31  ;;  %1367 = vmatprep.subr.mxu1 %v7557_v31  ;;  %7829 = vst [vmem:[#allocation35_spill] sm:$0xff] %v5589_v0  ;;  %7831 = vst [vmem:[#allocation36_spill] sm:$0xff] %v5602_v63  ;;  %v5642_v21 = vsub.f32 %v82_v6, %v5610_v25  ;;  %v7840_v6 = vand.u32 4294901760, %v5592_v11 }
  0xad   :  { %7826 = vst [vmem:[#allocation32_spill] sm:$0xff] %v5580_v34  ;;  %1164 = vmatpush2.msra.mxu0 %v5482_v50  ;;  %1373 = vmatpush2.msra.mxu1 %v1372_v20  ;;  %v1399_v39 = vsub.f32 %v5512_v60, %v7830_v56  ;;  %v111_v50 = vsel %vm103_vm1, %v32_v40, 0  ;;  %v1406_v20 = vsub.f32 %v5531_v57, %v7832_v9  ;;  %v1393_v56 = vand.u32 4294901760, %v1392_v15  ;;  %v31_v15 = vld [vmem:[%s7362_s0 + $0x50] sm:$0xf] }
  0xae   :  { %1165 = vmatprep.subr.mxu0 %v7557_v31  ;;  %1374 = vmatprep.subr.mxu1 %v7557_v31  ;;  %v5616_v40 = vsub.f32 %v108_v46, %v5582_v16  ;;  %v5623_v9 = vand.u32 4294901760, %v81_v22  ;;  %v5626_v57 = vand.u32 4294901760, %v111_v50  ;;  %v7836_v60 = vand.u32 4294901760, %v5554_v18 }
  0xaf   :  { %1167 = vmatpush2.msra.mxu0 %v5490_v58  ;;  %1380 = vmatpush2.msra.mxu1 %v1379_v8  ;;  %v5621_v58 = vsub.f32 %v83_v49, %v5589_v0  ;;  %v1400_v46 = vand.u32 4294901760, %v1399_v39  ;;  %v1407_v8 = vand.u32 4294901760, %v1406_v20  ;;  %v7837_v39 = vand.u32 4294901760, %v5580_v34 }
  0xb0   :  { %1168 = vmatprep.subr.mxu0 %v7557_v31  ;;  %1381 = vmatprep.subr.mxu1 %v7557_v31  ;;  %7834 = vst [vmem:[#allocation38_spill] sm:$0xff] %v5623_v9  ;;  %7835 = vst [vmem:[#allocation39_spill] sm:$0xff] %v5626_v57  ;;  %v1413_v13 = vsub.f32 %v5554_v18, %v7836_v60  ;;  %v5652_v18 = vand.u32 4294901760, %v31_v15  ;;  %v1195_v20 = vsub.f32 %v5592_v11, %v7840_v6 }
  0xb1   :  { %1170 = vmatpush2.msra.mxu0 %v5517_v54  ;;  %1387 = vmatpush2.msra.mxu1 %v1386_v7  ;;  %v5637_v54 = vsub.f32 %v27_v24, %v5602_v63  ;;  %v1189_v60 = vsub.f32 %v5580_v34, %v7837_v39  ;;  %v7838_v7 = vand.u32 4294901760, %v5571_v12  ;;  %v5661_v39 = vsub.f32 %v111_v50, %v5626_v57 }
  0xb2   :  { %1171 = vmatprep.subr.mxu0 %v7557_v31  ;;  %1388 = vmatprep.subr.mxu1 %v7557_v31  ;;  %7839 = vst [vmem:[#allocation40_spill] sm:$0xff] %v5652_v18  ;;  %v5665_v49 = vsub.f32 %v81_v22, %v5623_v9  ;;  %v7843_v22 = vand.u32 4294901760, %v5616_v40  ;;  %v7844_v34 = vand.u32 4294901760, %v5621_v58 }
  0xb3   :  { %1173 = vmatpush2.msra.mxu0 %v5537_v61  ;;  %1394 = vmatpush2.msra.mxu1 %v1393_v56  ;;  %v1420_v24 = vsub.f32 %v5571_v12, %v7838_v7  ;;  %v1414_v7 = vand.u32 4294901760, %v1413_v13  ;;  %v7842_v61 = vand.u32 4294901760, %v5587_v52  ;;  %v5679_v56 = vsub.f32 %v31_v15, %v5652_v18 }
  0xb4   :  { %1174 = vmatprep.subr.mxu0 %v7557_v31  ;;  %1395 = vmatprep.subr.mxu1 %v7557_v31  ;;  %7841 = vst [vmem:[#allocation41_spill] sm:$0xff] %v5665_v49  ;;  %v1204_v6 = vsub.f32 %v5616_v40, %v7843_v22 }
  0xb5   :  { %1176 = vmatpush2.msra.mxu0 %v5547_v3  ;;  %1401 = vmatpush2.msra.mxu1 %v1400_v46  ;;  %v1427_v3 = vsub.f32 %v5587_v52, %v7842_v61  ;;  %v1190_v46 = vand.u32 4294901760, %v1189_v60  ;;  %v1421_v13 = vand.u32 4294901760, %v1420_v24  ;;  %v1196_v61 = vand.u32 4294901760, %v1195_v20 }
  0xb6   :  { %1177 = vmatprep.subr.mxu0 %v7557_v31  ;;  %1402 = vmatprep.subr.mxu1 %v7557_v31  ;;  %v7845_v24 = vand.u32 4294901760, %v5637_v54  ;;  %v7846_v20 = vand.u32 4294901760, %v5642_v21  ;;  %v7521_v50 = vand.u32 4294901760, %v5679_v56 }
  0xb7   :  { %1179 = vmatpush2.msra.mxu0 %v5589_v0  ;;  %1408 = vmatpush2.msra.mxu1 %v1407_v8  ;;  %v1434_v8 = vsub.f32 %v5621_v58, %v7844_v34  ;;  %v1428_v60 = vand.u32 4294901760, %v1427_v3 }
  0xb8   :  { %1180 = vmatprep.subr.mxu0 %v7557_v31  ;;  %1409 = vmatprep.subr.mxu1 %v7557_v31  ;;  %v1210_v15 = vsub.f32 %v5637_v54, %v7845_v24  ;;  %v1441_v34 = vsub.f32 %v5642_v21, %v7846_v20  ;;  %v7847_v24 = vand.u32 4294901760, %v5661_v39  ;;  %v7853_v20 = vld [vmem:[#allocation20_spill] sm:$0xff] }
  0xb9   :  { %1182 = vmatpush2.msra.mxu0 %v5610_v25  ;;  %1415 = vmatpush2.msra.mxu1 %v1414_v7  ;;  %v1205_v7 = vand.u32 4294901760, %v1204_v6  ;;  %v1435_v3 = vand.u32 4294901760, %v1434_v8  ;;  %v7848_v25 = vand.u32 4294901760, %v5665_v49  ;;  %v1225_v6 = vsub.f32 %v5679_v56, %v7521_v50 }
  0xba   :  { %1183 = vmatprep.subr.mxu0 %v7557_v31  ;;  %1416 = vmatprep.subr.mxu1 %v7557_v31  ;;  %v1219_v22 = vsub.f32 %v5661_v39, %v7847_v24  ;;  %v7857_v24 = vld [vmem:[#allocation26_spill] sm:$0xff] }
  0xbb   :  { %1185 = vmatpush2.msra.mxu0 %v5623_v9  ;;  %1191 = vmatprep.mubr.f32.mxu0 %v1190_v46  ;;  %v1211_v9 = vand.u32 4294901760, %v1210_v15  ;;  %v1448_v46 = vsub.f32 %v5665_v49, %v7848_v25  ;;  %v1226_v8 = vand.u32 4294901760, %v1225_v6  ;;  %v7851_v15 = vld [vmem:[#allocation17_spill] sm:$0xff]  ;;  %v7859_v6 = vld [vmem:[#allocation6_spill] sm:$0xff] }
  0xbc   :  { %1422 = vmatpush2.msra.mxu1 %v1421_v13  ;;  %1197 = vmatmul.mubr.f32.vlgmr.msra.gmra.mxu0 %v1196_v61  ;;  %v1442_v13 = vand.u32 4294901760, %v1441_v34  ;;  %v1220_v61 = vand.u32 4294901760, %v1219_v22  ;;  %v7852_v22 = vld [vmem:[#allocation8_spill] sm:$0xff]  ;;  %v7854_v34 = vld [vmem:[#allocation10_spill] sm:$0xff] }
  0xbd   :  { %1423 = vmatprep.subr.mxu1 %v7557_v31  ;;  %1473 = vmatprep.subr.mxu0 %v7557_v31  ;;  %v1449_v25 = vand.u32 4294901760, %v1448_v46  ;;  %v7858_v46 = vld [vmem:[#allocation12_spill] sm:$0xff] }
  0xbe   :  { %1429 = vmatpush2.msra.mxu1 %v1428_v60  ;;  %1476 = vmatpush1.msra.mxu0 %v5161_v62  ;;  %v7850_v60 = vld [vmem:[#allocation25_spill] sm:$0xff] }
  0xbf   :  { %1430 = vmatprep.subr.mxu1 %v7557_v31  ;;  %1477 = vmatprep.subr.mxu0 %v7557_v31 }
  0xc0   :  { %1206 = vmatprep.mubr.f32.mxu0 %v1205_v7  ;;  %1436 = vmatpush2.msra.mxu1 %v1435_v3  ;;  %v7855_v7 = vld [vmem:[#allocation22_spill] sm:$0xff]  ;;  %v7856_v3 = vld [vmem:[#allocation11_spill] sm:$0xff] }
  0xc1   :  { %1480 = vmatpush1.msra.mxu0 %v5174_v43  ;;  %1437 = vmatprep.subr.mxu1 %v7557_v31 }
  0xc2   :  { %1212 = vmatmul.mubr.f32.gmra.mxu0 %v1211_v9  ;;  %1481 = vmatprep.subr.mxu0 %v7557_v31  ;;  %v7849_v9 = vld [vmem:[#allocation14_spill] sm:$0xff] }
  0xc3   :  { %1443 = vmatpush2.msra.mxu1 %v1442_v13  ;;  %1484 = vmatpush1.msra.mxu0 %v5192_v53 }
  0xc4   :  { %1444 = vmatprep.subr.mxu1 %v7557_v31  ;;  %1485 = vmatprep.subr.mxu0 %v7557_v31 }
  0xc5   :  { %1221 = vmatprep.mubr.f32.mxu0 %v1220_v61  ;;  %1450 = vmatpush2.msra.mxu1 %v1449_v25  ;;  %v7860_v61 = vld [vmem:[#allocation13_spill] sm:$0xff] }
  0xc6   :  { %1452 = vmatprep.mubr.f32.mxu1 %v5540_v4  ;;  %1488 = vmatpush1.msra.mxu0 %v5202_v30 }
  0xc7   :  { %1454 = vmatmul.mubr.f32.vlgmr.msra.gmra.mxu1 %v5549_v2  ;;  %1227 = vmatmul.mubr.f32.gmra.mxu0 %v1226_v8  ;;  %v7861_v8 = vld [vmem:[#allocation23_spill] sm:$0xff] }
  0xc8   :  { %1489 = vmatprep.subr.mxu0 %v7557_v31  ;;  %1627 = vmatprep.subr.mxu1 %v7557_v31 }
  0xc9   :  { %1492 = vmatpush1.msra.mxu0 %v5223_v23  ;;  %1629 = vmatpush1.msra.mxu1 %v5141_v33 }
  0xca   :  { %1493 = vmatprep.subr.mxu0 %v7557_v31  ;;  %1630 = vmatprep.subr.mxu1 %v7557_v31 }
  0xcb   :  { %1459 = vmatprep.mubr.f32.mxu1 %v5582_v16  ;;  %1496 = vmatpush1.msra.mxu0 %v5233_v14  ;;  %v5813_v16 = vld [vmem:[%s7364_s2] ss:$0 sm:$0xff] }
  0xcc   :  { %1632 = vmatpush1.msra.mxu1 %v5149_v32  ;;  %1497 = vmatprep.subr.mxu0 %v7557_v31 }
  0xcd   :  { %1461 = vmatmul.mubr.f32.gmra.mxu1 %v5602_v63  ;;  %1633 = vmatprep.subr.mxu1 %v7557_v31  ;;  %v7864_v63 = vld [vmem:[#allocation16_spill] sm:$0xff] }
  0xce   :  { %1500 = vmatpush1.msra.mxu0 %v5254_v55  ;;  %1635 = vmatpush1.msra.mxu1 %v5169_v17 }
  0xcf   :  { %1501 = vmatprep.subr.mxu0 %v7557_v31  ;;  %1636 = vmatprep.subr.mxu1 %v7557_v31 }
  0xd0   :  { %1466 = vmatprep.mubr.f32.mxu1 %v5626_v57  ;;  %1504 = vmatpush1.msra.mxu0 %v5270_v28  ;;  %v7863_v57 = vld [vmem:[#allocation27_spill] sm:$0xff] }
  0xd1   :  { %1638 = vmatpush1.msra.mxu1 %v5178_v29  ;;  %1505 = vmatprep.subr.mxu0 %v7557_v31 }
  0xd2   :  { %1468 = vmatmul.mubr.f32.gmra.mxu1 %v5652_v18  ;;  %1639 = vmatprep.subr.mxu1 %v7557_v31  ;;  %v7862_v18 = vld [vmem:[#allocation15_spill] sm:$0xff] }
  0xd3   :  { %1508 = vmatpush1.msra.mxu0 %v5283_v51  ;;  %1641 = vmatpush1.msra.mxu1 %v5196_v45 }
  0xd4   :  { %1509 = vmatprep.subr.mxu0 %v7557_v31  ;;  %1642 = vmatprep.subr.mxu1 %v7557_v31 }
  0xd5   :  { %1512 = vmatpush1.msra.mxu0 %v5302_v36  ;;  %1644 = vmatpush1.msra.mxu1 %v5204_v59 }
  0xd6   :  { %1513 = vmatprep.subr.mxu0 %v7557_v31  ;;  %1645 = vmatprep.subr.mxu1 %v7557_v31 }
  0xd7   :  { %1516 = vmatpush1.msra.mxu0 %v5307_v26  ;;  %1647 = vmatpush1.msra.mxu1 %v5228_v5 }
  0xd8   :  { %1517 = vmatprep.subr.mxu0 %v7557_v31  ;;  %1648 = vmatprep.subr.mxu1 %v7557_v31 }
  0xd9   :  { %1520 = vmatpush1.msra.mxu0 %v5322_v47  ;;  %1650 = vmatpush1.msra.mxu1 %v5241_v10 }
  0xda   :  { %1521 = vmatprep.subr.mxu0 %v7557_v31  ;;  %1651 = vmatprep.subr.mxu1 %v7557_v31 }
  0xdb   :  { %1524 = vmatpush1.msra.mxu0 %v5346_v19  ;;  %1653 = vmatpush1.msra.mxu1 %v5256_v48 }
  0xdc   :  { %1525 = vmatprep.subr.mxu0 %v7557_v31  ;;  %1654 = vmatprep.subr.mxu1 %v7557_v31 }
  0xdd   :  { %1528 = vmatpush1.msra.mxu0 %v5359_v42  ;;  %1656 = vmatpush1.msra.mxu1 %v5272_v37 }
  0xde   :  { %1529 = vmatprep.subr.mxu0 %v7557_v31  ;;  %1657 = vmatprep.subr.mxu1 %v7557_v31 }
  0xdf   :  { %1532 = vmatpush1.msra.mxu0 %v5375_v44  ;;  %1659 = vmatpush1.msra.mxu1 %v5279_v38 }
  0xe0   :  { %1533 = vmatprep.subr.mxu0 %v7557_v31  ;;  %1660 = vmatprep.subr.mxu1 %v7557_v31 }
  0xe1   :  { %1536 = vmatpush1.msra.mxu0 %v5383_v27  ;;  %1662 = vmatpush1.msra.mxu1 %v5294_v1 }
  0xe2   :  { %1539 = vmatprep.subr.mxu0 %v7557_v31  ;;  %1663 = vmatprep.subr.mxu1 %v7557_v31 }
  0xe3   :  { %1542 = vmatpush2.msra.mxu0 %v5402_v35  ;;  %1665 = vmatpush1.msra.mxu1 %v5317_v41 }
  0xe4   :  { %1543 = vmatprep.subr.mxu0 %v7557_v31  ;;  %1666 = vmatprep.subr.mxu1 %v7557_v31 }
  0xe5   :  { %1546 = vmatpush2.msra.mxu0 %v7849_v9  ;;  %1668 = vmatpush1.msra.mxu1 %v7850_v60 }
  0xe6   :  { %1547 = vmatprep.subr.mxu0 %v7557_v31  ;;  %1669 = vmatprep.subr.mxu1 %v7557_v31 }
  0xe7   :  { %1550 = vmatpush2.msra.mxu0 %v7851_v15  ;;  %1671 = vmatpush1.msra.mxu1 %v7852_v22 }
  0xe8   :  { %1551 = vmatprep.subr.mxu0 %v7557_v31  ;;  %1672 = vmatprep.subr.mxu1 %v7557_v31 }
  0xe9   :  { %1554 = vmatpush2.msra.mxu0 %v7853_v20  ;;  %1674 = vmatpush1.msra.mxu1 %v7854_v34 }
  0xea   :  { %1555 = vmatprep.subr.mxu0 %v7557_v31  ;;  %1677 = vmatprep.subr.mxu1 %v7557_v31 }
  0xeb   :  { %1558 = vmatpush2.msra.mxu0 %v7855_v7  ;;  %1679 = vmatpush2.msra.mxu1 %v7856_v3 }
  0xec   :  { %1559 = vmatprep.subr.mxu0 %v7557_v31  ;;  %1680 = vmatprep.subr.mxu1 %v7557_v31 }
  0xed   :  { %1562 = vmatpush2.msra.mxu0 %v7857_v24  ;;  %1682 = vmatpush2.msra.mxu1 %v7858_v46  ;;  %v4121_v13 = vpop.f32.mrf.mxu0 }
  0xee   :  { %1563 = vmatprep.subr.mxu0 %v7557_v31  ;;  %1683 = vmatprep.subr.mxu1 %v7557_v31 }
  0xef   :  { %1566 = vmatpush2.msra.mxu0 %v7859_v6  ;;  %1685 = vmatpush2.msra.mxu1 %v7860_v61  ;;  %v4122_v25 = vpop.f32.mrf.mxu0 }
  0xf0   :  { %1567 = vmatprep.subr.mxu0 %v7557_v31  ;;  %1686 = vmatprep.subr.mxu1 %v7557_v31  ;;  %v4123_v50 = vadd.f32 %v4122_v25, %v4121_v13  ;;  %v7865_v13 = vld [vmem:[#allocation30_spill] sm:$0xff] }
  0xf1   :  { %1570 = vmatpush2.msra.mxu0 %v7861_v8  ;;  %1688 = vmatpush2.msra.mxu1 %v7862_v18  ;;  %v7866_v25 = vld [vmem:[#allocation18_spill] sm:$0xff] }
  0xf2   :  { %1571 = vmatprep.subr.mxu0 %v7557_v31  ;;  %1689 = vmatprep.subr.mxu1 %v7557_v31  ;;  %v226_v4 = vadd.f32 %v4123_v50, %v5813_v16  ;;  %v7869_v50 = vld [vmem:[#allocation21_spill] sm:$0xff] }
  0xf3   :  { %1574 = vmatpush2.msra.mxu0 %v7863_v57  ;;  %1691 = vmatpush2.msra.mxu1 %v7864_v63  ;;  %v7867_v63 = vld [vmem:[#allocation24_spill] sm:$0xff] }
  0xf4   :  { %1575 = vmatprep.subr.mxu0 %v7557_v31  ;;  %1692 = vmatprep.subr.mxu1 %v7557_v31 }
  0xf5   :  { %1578 = vmatpush2.msra.mxu0 %v7865_v13  ;;  %1694 = vmatpush2.msra.mxu1 %v7866_v25  ;;  %v7868_v25 = vld [vmem:[#allocation5_spill] sm:$0xff] }
  0xf6   :  { %1579 = vmatprep.subr.mxu0 %v7557_v31  ;;  %v4162_v2 = vpop.f32.mrf.mxu1  ;;  %1695 = vmatprep.subr.mxu1 %v7557_v31 }
  0xf7   :  { %1582 = vmatpush2.msra.mxu0 %v5571_v12  ;;  %1697 = vmatpush2.msra.mxu1 %v7867_v63 }
  0xf8   :  { %1583 = vmatprep.subr.mxu0 %v7557_v31  ;;  %v4163_v57 = vpop.f32.mrf.mxu1  ;;  %1698 = vmatprep.subr.mxu1 %v7557_v31 }
  0xf9   :  { %1586 = vmatpush2.msra.mxu0 %v5587_v52  ;;  %v4164_v13 = vadd.f32 %v4163_v57, %v4162_v2  ;;  %1700 = vmatpush2.msra.mxu1 %v7868_v25  ;;  %v7870_v52 = vld [vmem:[#allocation7_spill] sm:$0xff]  ;;  %v7871_v57 = vld [vmem:[#allocation32_spill] sm:$0xff] }
  0xfa   :  { %1587 = vmatprep.subr.mxu0 %v7557_v31  ;;  %1701 = vmatprep.subr.mxu1 %v7557_v31  ;;  %v7873_v2 = vld [vmem:[#allocation31_spill] sm:$0xff] }
  0xfb   :  { %1590 = vmatpush2.msra.mxu0 %v5621_v58  ;;  %v5830_v12 = vadd.f32 %v4164_v13, %v226_v4  ;;  %1703 = vmatpush2.msra.mxu1 %v7869_v50  ;;  %v7872_v4 = vld [vmem:[#allocation9_spill] sm:$0xff]  ;;  %v7874_v13 = vand.u32 4294901760, %v5161_v62 }
  0xfc   :  { %1591 = vmatprep.subr.mxu0 %v7557_v31  ;;  %1704 = vmatprep.subr.mxu1 %v7557_v31 }
  0xfd   :  { %1594 = vmatpush2.msra.mxu0 %v5642_v21  ;;  %1706 = vmatpush2.msra.mxu1 %v7870_v52  ;;  %v7880_v52 = vand.u32 4294901760, %v5202_v30  ;;  %v7883_v30 = vand.u32 4294901760, %v5616_v40 }
  0xfe   :  { %1595 = vmatprep.subr.mxu0 %v7557_v31  ;;  %1707 = vmatprep.subr.mxu1 %v7557_v31 }
  0xff   :  { %1598 = vmatpush2.msra.mxu0 %v5665_v49  ;;  %1601 = vmatprep.mubr.f32.mxu0 %v7871_v57 }
 0x100   :  { %1709 = vmatpush2.msra.mxu1 %v7872_v4  ;;  %1604 = vmatmul.mubr.f32.vlgmr.msra.gmra.mxu0 %v5592_v11  ;;  %v7875_v4 = vand.u32 4294901760, %v5174_v43 }
 0x101   :  { %1710 = vmatprep.subr.mxu1 %v7557_v31  ;;  %1756 = vmatprep.subr.mxu0 %v7557_v31 }
 0x102   :  { %1712 = vmatpush2.msra.mxu1 %v7873_v2  ;;  %1760 = vmatpush1.msra.mxu0 %v7874_v13  ;;  %v7876_v2 = vld [vmem:[#allocation37_spill] sm:$0xff]  ;;  %v7877_v13 = vand.u32 4294901760, %v5192_v53 }
 0x103   :  { %1713 = vmatprep.subr.mxu1 %v7557_v31  ;;  %1761 = vmatprep.subr.mxu0 %v7557_v31 }
 0x104   :  { %1610 = vmatprep.mubr.f32.mxu0 %v5616_v40  ;;  %1715 = vmatpush2.msra.mxu1 %v5589_v0  ;;  %v7879_v0 = vand.u32 4294901760, %v7871_v57 }
 0x105   :  { %1765 = vmatpush1.msra.mxu0 %v7875_v4  ;;  %1716 = vmatprep.subr.mxu1 %v7557_v31  ;;  %v7878_v4 = vld [vmem:[#allocation38_spill] sm:$0xff] }
 0x106   :  { %1613 = vmatmul.mubr.f32.gmra.mxu0 %v5637_v54  ;;  %1766 = vmatprep.subr.mxu0 %v7557_v31  ;;  %v4124_v62 = vpop.f32.mrf.mxu0 }
 0x107   :  { %1718 = vmatpush2.msra.mxu1 %v7876_v2  ;;  %1770 = vmatpush1.msra.mxu0 %v7877_v13  ;;  %v7881_v2 = vand.u32 4294901760, %v5592_v11  ;;  %v7882_v13 = vand.u32 4294901760, %v5223_v23  ;;  %v7884_v11 = vand.u32 4294901760, %v5233_v14  ;;  %v7885_v23 = vand.u32 4294901760, %v5637_v54 }
 0x108   :  { %1719 = vmatprep.subr.mxu1 %v7557_v31  ;;  %1771 = vmatprep.subr.mxu0 %v7557_v31  ;;  %v4125_v43 = vpop.f32.mrf.mxu0  ;;  %v7887_v14 = vand.u32 4294901760, %v5661_v39 }
 0x109   :  { %1619 = vmatprep.mubr.f32.mxu0 %v5661_v39  ;;  %1721 = vmatpush2.msra.mxu1 %v7878_v4  ;;  %v4126_v49 = vadd.f32 %v4125_v43, %v4124_v62 }
 0x10a   :  { %1725 = vmatprep.mubr.f32.mxu1 %v7879_v0  ;;  %1775 = vmatpush1.msra.mxu0 %v7880_v52 }
 0x10b   :  { %1729 = vmatmul.mubr.f32.vlgmr.msra.gmra.mxu1 %v7881_v2  ;;  %1622 = vmatmul.mubr.f32.gmra.mxu0 %v5679_v56  ;;  %v4127_v53 = vpop.f32.mrf.mxu0  ;;  %v7886_v2 = vand.u32 4294901760, %v5254_v55 }
 0x10c   :  { %1776 = vmatprep.subr.mxu0 %v7557_v31  ;;  %1935 = vmatprep.subr.mxu1 %v7557_v31 }
 0x10d   :  { %1780 = vmatpush1.msra.mxu0 %v7882_v13  ;;  %1937 = vmatpush1.msra.mxu1 %v5141_v33  ;;  %v4128_v0 = vpop.f32.mrf.mxu0  ;;  %v241_v33 = vadd.f32 %v4126_v49, %v5813_v16  ;;  %v7888_v49 = vand.u32 4294901760, %v5270_v28  ;;  %v7890_v13 = vand.u32 4294901760, %v5283_v51 }
 0x10e   :  { %1781 = vmatprep.subr.mxu0 %v7557_v31  ;;  %1938 = vmatprep.subr.mxu1 %v7557_v31  ;;  %v4129_v52 = vadd.f32 %v4128_v0, %v4127_v53  ;;  %v7889_v53 = vand.u32 4294901760, %v5679_v56  ;;  %v7891_v56 = vand.u32 4294901760, %v5302_v36  ;;  %v7893_v36 = vand.u32 4294901760, %v5322_v47 }
 0x10f   :  { %1736 = vmatprep.mubr.f32.mxu1 %v7883_v30  ;;  %1785 = vmatpush1.msra.mxu0 %v7884_v11  ;;  %v4165_v57 = vpop.f32.mrf.mxu1 }
 0x110   :  { %1940 = vmatpush1.msra.mxu1 %v5149_v32  ;;  %1786 = vmatprep.subr.mxu0 %v7557_v31  ;;  %v256_v39 = vadd.f32 %v4129_v52, %v5813_v16  ;;  %v7892_v16 = vand.u32 4294901760, %v5307_v26  ;;  %v7894_v26 = vand.u32 4294901760, %v5346_v19 }
 0x111   :  { %1740 = vmatmul.mubr.f32.gmra.mxu1 %v7885_v23  ;;  %1941 = vmatprep.subr.mxu1 %v7557_v31  ;;  %v4203_v40 = vpop.f32.mrf.mxu0  ;;  %v4166_v62 = vpop.f32.mrf.mxu1  ;;  %v7895_v23 = vand.u32 4294901760, %v5359_v42  ;;  %v7897_v42 = vand.u32 4294901760, %v5383_v27  ;;  %v7899_v27 = vand.u32 4294901760, %v7849_v9  ;;  %v7901_v9 = vand.u32 4294901760, %v7853_v20 }
 0x112   :  { %1790 = vmatpush1.msra.mxu0 %v7886_v2  ;;  %1943 = vmatpush1.msra.mxu1 %v5169_v17  ;;  %v4167_v32 = vadd.f32 %v4166_v62, %v4165_v57  ;;  %v7905_v20 = vand.u32 4294901760, %v7861_v8 }
 0x113   :  { %1791 = vmatprep.subr.mxu0 %v7557_v31  ;;  %1944 = vmatprep.subr.mxu1 %v7557_v31  ;;  %v4204_v54 = vpop.f32.mrf.mxu0 }
 0x114   :  { %1747 = vmatprep.mubr.f32.mxu1 %v7887_v14  ;;  %1795 = vmatpush1.msra.mxu0 %v7888_v49  ;;  %v495_v55 = vadd.f32 %v4167_v32, %v241_v33  ;;  %v4205_v43 = vadd.f32 %v4204_v54, %v4203_v40  ;;  %v7914_v49 = vld [vmem:[#allocation34_spill] sm:$0xff] }
 0x115   :  { %1946 = vmatpush1.msra.mxu1 %v5178_v29  ;;  %1796 = vmatprep.subr.mxu0 %v7557_v31  ;;  %v4168_v17 = vpop.f32.mrf.mxu1 }
 0x116   :  { %1751 = vmatmul.mubr.f32.gmra.mxu1 %v7889_v53  ;;  %1947 = vmatprep.subr.mxu1 %v7557_v31  ;;  %v640_v28 = vadd.f32 %v4205_v43, %v5830_v12 }
 0x117   :  { %1800 = vmatpush1.msra.mxu0 %v7890_v13  ;;  %1949 = vmatpush1.msra.mxu1 %v5196_v45  ;;  %v4169_v0 = vpop.f32.mrf.mxu1  ;;  %v7917_v13 = vand.u32 4294901760, %v5642_v21  ;;  %v7923_v21 = vld [vmem:[#allocation29_spill] sm:$0xff] }
 0x118   :  { %1801 = vmatprep.subr.mxu0 %v7557_v31  ;;  %v4206_v29 = vpop.f32.mrf.mxu0  ;;  %1950 = vmatprep.subr.mxu1 %v7557_v31  ;;  %v4170_v30 = vadd.f32 %v4169_v0, %v4168_v17  ;;  %v7916_v17 = vand.u32 4294901760, %v5621_v58  ;;  %v7921_v0 = vld [vmem:[#allocation28_spill] sm:$0xff] }
 0x119   :  { %1805 = vmatpush1.msra.mxu0 %v7891_v56  ;;  %1952 = vmatpush1.msra.mxu1 %v5204_v59  ;;  %v7922_v56 = vld [vmem:[#allocation9_spill] sm:$0xff] }
 0x11a   :  { %1806 = vmatprep.subr.mxu0 %v7557_v31  ;;  %v4207_v51 = vpop.f32.mrf.mxu0  ;;  %1953 = vmatprep.subr.mxu1 %v7557_v31  ;;  %v502_v45 = vadd.f32 %v4170_v30, %v256_v39  ;;  %v7918_v39 = vld [vmem:[#allocation7_spill] sm:$0xff] }
 0x11b   :  { %1810 = vmatpush1.msra.mxu0 %v7892_v16  ;;  %v4208_v12 = vadd.f32 %v4207_v51, %v4206_v29  ;;  %1955 = vmatpush1.msra.mxu1 %v5228_v5  ;;  %v7924_v16 = vld [vmem:[#allocation31_spill] sm:$0xff] }
 0x11c   :  { %1811 = vmatprep.subr.mxu0 %v7557_v31  ;;  %1956 = vmatprep.subr.mxu1 %v7557_v31 }
 0x11d   :  { %1815 = vmatpush1.msra.mxu0 %v7893_v36  ;;  %v649_v59 = vadd.f32 %v4208_v12, %v495_v55  ;;  %v4244_v52 = vpop.f32.mrf.mxu1  ;;  %1958 = vmatpush1.msra.mxu1 %v5241_v10  ;;  %v4209_v11 = vpop.f32.mrf.mxu0  ;;  %v7915_v55 = vand.u32 4294901760, %v7914_v49 }
 0x11e   :  { %1816 = vmatprep.subr.mxu0 %v7557_v31  ;;  %1959 = vmatprep.subr.mxu1 %v7557_v31 }
 0x11f   :  { %1820 = vmatpush1.msra.mxu0 %v7894_v26  ;;  %v4245_v5 = vpop.f32.mrf.mxu1  ;;  %1961 = vmatpush1.msra.mxu1 %v5256_v48  ;;  %v4210_v57 = vpop.f32.mrf.mxu0  ;;  %v7896_v48 = vand.u32 4294901760, %v5375_v44  ;;  %v7898_v44 = vand.u32 4294901760, %v5402_v35  ;;  %v7900_v35 = vand.u32 4294901760, %v7851_v15  ;;  %v7903_v15 = vand.u32 4294901760, %v7857_v24  ;;  %v7909_v24 = vld [vmem:[#allocation30_spill] sm:$0xff]  ;;  %v7927_v26 = vld [vmem:[#allocation36_spill] sm:$0xff] }
 0x120   :  { %1821 = vmatprep.subr.mxu0 %v7557_v31  ;;  %v4246_v47 = vadd.f32 %v4245_v5, %v4244_v52  ;;  %1962 = vmatprep.subr.mxu1 %v7557_v31  ;;  %v4211_v10 = vadd.f32 %v4210_v57, %v4209_v11  ;;  %v7926_v52 = vld [vmem:[#allocation35_spill] sm:$0xff] }
 0x121   :  { %1825 = vmatpush1.msra.mxu0 %v7895_v23  ;;  %1964 = vmatpush1.msra.mxu1 %v5272_v37  ;;  %v7929_v23 = vld [vmem:[#allocation39_spill] sm:$0xff] }
 0x122   :  { %1826 = vmatprep.subr.mxu0 %v7557_v31  ;;  %v5933_v33 = vadd.f32 %v4246_v47, %v640_v28  ;;  %1965 = vmatprep.subr.mxu1 %v7557_v31  ;;  %v658_v19 = vadd.f32 %v4211_v10, %v502_v45  ;;  %v7919_v28 = vld [vmem:[#allocation41_spill] sm:$0xff] }
 0x123   :  { %1830 = vmatpush1.msra.mxu0 %v7896_v48  ;;  %v4247_v2 = vpop.f32.mrf.mxu1  ;;  %1967 = vmatpush1.msra.mxu1 %v5279_v38  ;;  %v7920_v58 = vand.u32 4294901760, %v7919_v28  ;;  %v7925_v45 = vld [vmem:[#allocation33_spill] sm:$0xff]  ;;  %v7930_v48 = vld [vmem:[#allocation40_spill] sm:$0xff] }
 0x124   :  { %1831 = vmatprep.subr.mxu0 %v7557_v31  ;;  %1968 = vmatprep.subr.mxu1 %v7557_v31  ;;  %v7928_v47 = vld [vmem:[#allocation37_spill] sm:$0xff] }
 0x125   :  { %1835 = vmatpush1.msra.mxu0 %v7897_v42  ;;  %v4248_v37 = vpop.f32.mrf.mxu1  ;;  %1970 = vmatpush1.msra.mxu1 %v5294_v1 }
 0x126   :  { %1838 = vmatprep.subr.mxu0 %v7557_v31  ;;  %v4249_v40 = vadd.f32 %v4248_v37, %v4247_v2  ;;  %1971 = vmatprep.subr.mxu1 %v7557_v31 }
 0x127   :  { %1842 = vmatpush2.msra.mxu0 %v7898_v44  ;;  %1973 = vmatpush1.msra.mxu1 %v5317_v41  ;;  %v2115_v44 = vld [vmem:[%s7365_s3 + $0x1e0] sm:$0xff] }
 0x128   :  { %1843 = vmatprep.subr.mxu0 %v7557_v31  ;;  %v5950_v38 = vadd.f32 %v4249_v40, %v649_v59  ;;  %v4250_v62 = vpop.f32.mrf.mxu1  ;;  %1974 = vmatprep.subr.mxu1 %v7557_v31 }
 0x129   :  { %1847 = vmatpush2.msra.mxu0 %v7899_v27  ;;  %1976 = vmatpush1.msra.mxu1 %v7850_v60  ;;  %v7902_v60 = vand.u32 4294901760, %v7855_v7  ;;  %v6065_v27 = vand.u32 4294901760, %v2115_v44 }
 0x12a   :  { %1848 = vmatprep.subr.mxu0 %v7557_v31  ;;  %v4251_v1 = vpop.f32.mrf.mxu1  ;;  %1977 = vmatprep.subr.mxu1 %v7557_v31 }
 0x12b   :  { %1852 = vmatpush2.msra.mxu0 %v7900_v35  ;;  %v4252_v41 = vadd.f32 %v4251_v1, %v4250_v62  ;;  %1979 = vmatpush1.msra.mxu1 %v7852_v22  ;;  %v7904_v22 = vand.u32 4294901760, %v7859_v6  ;;  %v2111_v35 = vld [vmem:[%s7365_s3 + $0x1c0] sm:$0xff] }
 0x12c   :  { %1853 = vmatprep.subr.mxu0 %v7557_v31  ;;  %1980 = vmatprep.subr.mxu1 %v7557_v31 }
 0x12d   :  { %1857 = vmatpush2.msra.mxu0 %v7901_v9  ;;  %v5965_v32 = vadd.f32 %v4252_v41, %v658_v19  ;;  %1982 = vmatpush1.msra.mxu1 %v7854_v34  ;;  %v7906_v34 = vld [vmem:[#allocation27_spill] sm:$0xff]  ;;  %v2108_v41 = vld [vmem:[%s7365_s3 + $0x1a8] sm:$0xff]  ;;  %v2107_v9 = vld [vmem:[%s7365_s3 + $0x1a0] sm:$0xff] }
 0x12e   :  { %1858 = vmatprep.subr.mxu0 %v7557_v31  ;;  %1985 = vmatprep.subr.mxu1 %v7557_v31  ;;  %v7907_v7 = vand.u32 4294901760, %v7906_v34 }
 0x12f   :  { %1862 = vmatpush2.msra.mxu0 %v7902_v60  ;;  %1987 = vmatpush2.msra.mxu1 %v7856_v3  ;;  %v7908_v3 = vld [vmem:[#allocation16_spill] sm:$0xff]  ;;  %v6080_v60 = vand.u32 4294901760, %v2108_v41 }
 0x130   :  { %1863 = vmatprep.subr.mxu0 %v7557_v31  ;;  %1988 = vmatprep.subr.mxu1 %v7557_v31 }
 0x131   :  { %1867 = vmatpush2.msra.mxu0 %v7903_v15  ;;  %1990 = vmatpush2.msra.mxu1 %v7858_v46  ;;  %v7910_v46 = vand.u32 4294901760, %v7909_v24  ;;  %v6082_v15 = vand.u32 4294901760, %v2107_v9 }
 0x132   :  { %1868 = vmatprep.subr.mxu0 %v7557_v31  ;;  %1991 = vmatprep.subr.mxu1 %v7557_v31 }
 0x133   :  { %1872 = vmatpush2.msra.mxu0 %v7904_v22  ;;  %1993 = vmatpush2.msra.mxu1 %v7860_v61  ;;  %v7911_v61 = vld [vmem:[#allocation18_spill] sm:$0xff] }
 0x134   :  { %1873 = vmatprep.subr.mxu0 %v7557_v31  ;;  %1994 = vmatprep.subr.mxu1 %v7557_v31  ;;  %v2104_v22 = vld [vmem:[%s7365_s3 + $0x188] sm:$0xff] }
 0x135   :  { %1877 = vmatpush2.msra.mxu0 %v7905_v20  ;;  %1996 = vmatpush2.msra.mxu1 %v7862_v18  ;;  %v7912_v18 = vld [vmem:[#allocation19_spill] sm:$0xff]  ;;  %v2103_v20 = vld [vmem:[%s7365_s3 + $0x180] sm:$0xff]  ;;  %v6099_v24 = vand.u32 4294901760, %v2104_v22 }
 0x136   :  { %1878 = vmatprep.subr.mxu0 %v7557_v31  ;;  %1997 = vmatprep.subr.mxu1 %v7557_v31  ;;  %v7913_v8 = vand.u32 4294901760, %v7912_v18  ;;  %v6111_v18 = vand.u32 4294901760, %v2103_v20 }
 0x137   :  { %1882 = vmatpush2.msra.mxu0 %v7907_v7  ;;  %1999 = vmatpush2.msra.mxu1 %v7908_v3  ;;  %v6094_v7 = vsub.f32 %v2115_v44, %v6065_v27  ;;  %v6118_v49 = vsub.f32 %v2104_v22, %v6099_v24 }
 0x138   :  { %1883 = vmatprep.subr.mxu0 %v7557_v31  ;;  %2000 = vmatprep.subr.mxu1 %v7557_v31  ;;  %v4285_v6 = vpop.f32.mrf.mxu0 }
 0x139   :  { %1887 = vmatpush2.msra.mxu0 %v7910_v46  ;;  %2002 = vmatpush2.msra.mxu1 %v7911_v61  ;;  %v6109_v61 = vsub.f32 %v2107_v9, %v6082_v15 }
 0x13a   :  { %1888 = vmatprep.subr.mxu0 %v7557_v31  ;;  %2003 = vmatprep.subr.mxu1 %v7557_v31  ;;  %v4286_v14 = vpop.f32.mrf.mxu0 }
 0x13b   :  { %1892 = vmatpush2.msra.mxu0 %v7913_v8  ;;  %2005 = vmatpush2.msra.mxu1 %v7867_v63  ;;  %v4287_v54 = vadd.f32 %v4286_v14, %v4285_v6  ;;  %v6106_v6 = vsub.f32 %v2108_v41, %v6080_v60  ;;  %v7555_v14 = vand.u32 4294901760, %v6094_v7 }
 0x13c   :  { %1893 = vmatprep.subr.mxu0 %v7557_v31  ;;  %2006 = vmatprep.subr.mxu1 %v7557_v31 }
 0x13d   :  { %1897 = vmatpush2.msra.mxu0 %v7915_v55  ;;  %2008 = vmatpush2.msra.mxu1 %v7868_v25  ;;  %v956_v43 = vadd.f32 %v4287_v54, %v5933_v33 }
 0x13e   :  { %1898 = vmatprep.subr.mxu0 %v7557_v31  ;;  %v4288_v53 = vpop.f32.mrf.mxu0  ;;  %2009 = vmatprep.subr.mxu1 %v7557_v31 }
 0x13f   :  { %1902 = vmatpush2.msra.mxu0 %v7916_v17  ;;  %2011 = vmatpush2.msra.mxu1 %v7869_v50  ;;  %v6125_v17 = vsub.f32 %v2103_v20, %v6111_v18 }
 0x140   :  { %1903 = vmatprep.subr.mxu0 %v7557_v31  ;;  %v4289_v63 = vpop.f32.mrf.mxu0  ;;  %2012 = vmatprep.subr.mxu1 %v7557_v31 }
 0x141   :  { %1907 = vmatpush2.msra.mxu0 %v7917_v13  ;;  %v4290_v25 = vadd.f32 %v4289_v63, %v4288_v53  ;;  %2014 = vmatpush2.msra.mxu1 %v7918_v39  ;;  %v7550_v53 = vand.u32 4294901760, %v6109_v61  ;;  %v2280_v13 = vsub.f32 %v6094_v7, %v7555_v14  ;;  %v7549_v39 = vand.u32 4294901760, %v6118_v49 }
 0x142   :  { %1908 = vmatprep.subr.mxu0 %v7557_v31  ;;  %2015 = vmatprep.subr.mxu1 %v7557_v31 }
 0x143   :  { %1912 = vmatpush2.msra.mxu0 %v7920_v58  ;;  %v963_v50 = vadd.f32 %v4290_v25, %v5950_v38  ;;  %v4326_v29 = vpop.f32.mrf.mxu1  ;;  %1914 = vmatprep.mubr.f32.mxu0 %v7921_v0  ;;  %v4291_v30 = vpop.f32.mrf.mxu0  ;;  %v2112_v38 = vld [vmem:[%s7365_s3 + $0x1c8] sm:$0xff] }
 0x144   :  { %2017 = vmatpush2.msra.mxu1 %v7922_v56  ;;  %1916 = vmatmul.mubr.f32.vlgmr.msra.gmra.mxu0 %v7923_v21  ;;  %v6067_v1 = vand.u32 4294901760, %v2112_v38  ;;  %v2099_v56 = vld [vmem:[%s7365_s3 + $0x160] sm:$0xff] }
 0x145   :  { %2018 = vmatprep.subr.mxu1 %v7557_v31  ;;  %v4327_v51 = vpop.f32.mrf.mxu1  ;;  %1921 = vmatprep.mubr.f32.mxu0 %v7925_v45  ;;  %v4292_v12 = vpop.f32.mrf.mxu0 }
 0x146   :  { %2020 = vmatpush2.msra.mxu1 %v7924_v16  ;;  %v4328_v36 = vadd.f32 %v4327_v51, %v4326_v29  ;;  %2031 = vmatprep.mubr.f32.mxu1 %v7921_v0  ;;  %v4293_v59 = vadd.f32 %v4292_v12, %v4291_v30  ;;  %v6097_v3 = vsub.f32 %v2112_v38, %v6067_v1  ;;  %v7548_v29 = vand.u32 4294901760, %v6125_v17  ;;  %v2100_v0 = vld [vmem:[%s7365_s3 + $0x168] sm:$0xff]  ;;  %v2095_v12 = vld [vmem:[%s7365_s3 + $0x140] sm:$0xff] }
 0x147   :  { %2021 = vmatprep.subr.mxu1 %v7557_v31  ;;  %v2096_v30 = vld [vmem:[%s7365_s3 + $0x148] sm:$0xff]  ;;  %v2281_v51 = vand.u32 4294901760, %v2280_v13 }
 0x148   :  { %2023 = vmatpush2.msra.mxu1 %v7926_v52  ;;  %v6033_v11 = vadd.f32 %v4328_v36, %v956_v43  ;;  %1923 = vmatmul.mubr.f32.gmra.mxu0 %v7927_v26  ;;  %v970_v5 = vadd.f32 %v4293_v59, %v5965_v32  ;;  %v6078_v32 = vand.u32 4294901760, %v2111_v35  ;;  %v7553_v54 = vand.u32 4294901760, %v6097_v3  ;;  %v2092_v36 = vld [vmem:[%s7365_s3 + $0x128] sm:$0xff]  ;;  %v2091_v59 = vld [vmem:[%s7365_s3 + $0x120] sm:$0xff] }
 0x149   :  { %2024 = vmatprep.subr.mxu1 %v7557_v31  ;;  %v4329_v57 = vpop.f32.mrf.mxu1  ;;  %1928 = vmatprep.mubr.f32.mxu0 %v7929_v23  ;;  %v7551_v43 = vand.u32 4294901760, %v6106_v6  ;;  %v6192_v44 = vand.u32 4294901760, %v2091_v59 }
 0x14a   :  { %2026 = vmatpush2.msra.mxu1 %v7928_v47  ;;  %v6103_v46 = vsub.f32 %v2111_v35, %v6078_v32  ;;  %v2286_v25 = vsub.f32 %v6097_v3, %v7553_v54  ;;  %v2088_v47 = vld [vmem:[%s7365_s3 + $0x108] sm:$0xff] }
 0x14b   :  { %2027 = vmatprep.subr.mxu1 %v7557_v31  ;;  %v4330_v10 = vpop.f32.mrf.mxu1  ;;  %v2298_v58 = vsub.f32 %v6106_v6, %v7551_v43  ;;  %v6203_v9 = vand.u32 4294901760, %v2088_v47 }
 0x14c   :  { %2029 = vmatpush2.msra.mxu1 %v7878_v4  ;;  %v4331_v33 = vadd.f32 %v4330_v10, %v4329_v57  ;;  %1930 = vmatmul.mubr.f32.gmra.mxu0 %v7930_v48  ;;  %v2116_v4 = vld [vmem:[%s7365_s3 + $0x1e8] sm:$0xff]  ;;  %v7552_v55 = vand.u32 4294901760, %v6103_v46  ;;  %v2287_v16 = vand.u32 4294901760, %v2286_v25  ;;  %v2316_v57 = vsub.f32 %v6125_v17, %v7548_v29 }
 0x14d   :  { %2033 = vmatmul.mubr.f32.vlgmr.msra.gmra.mxu1 %v7923_v21  ;;  %2237 = vmatprep.mubr.f32.mxu0 %v7557_v31  ;;  %v6063_v62 = vand.u32 4294901760, %v2116_v4  ;;  %v6179_v10 = vand.u32 4294901760, %v2100_v0 }
 0x14e   :  { %2038 = vmatprep.mubr.f32.mxu1 %v7925_v45  ;;  %v4332_v19 = vpop.f32.mrf.mxu1  ;;  %v6045_v2 = vadd.f32 %v4331_v33, %v963_v50  ;;  %v2292_v28 = vsub.f32 %v6103_v46, %v7552_v55  ;;  %v2304_v50 = vsub.f32 %v6109_v61, %v7550_v53  ;;  %v2310_v45 = vsub.f32 %v6118_v49, %v7549_v39 }
 0x14f   :  { %7931 = vst [vmem:[#allocation14_spill] sm:$0xff] %v6063_v62  ;;  %v6091_v34 = vsub.f32 %v2116_v4, %v6063_v62  ;;  %2142 = vmatprep.subr.mxu0 %v6063_v62  ;;  %v6181_v33 = vand.u32 4294901760, %v2099_v56  ;;  %v6190_v4 = vand.u32 4294901760, %v2092_v36  ;;  %v6195_v38 = vsub.f32 %v2100_v0, %v6179_v10 }
 0x150   :  { %v4333_v42 = vpop.f32.mrf.mxu1  ;;  %2144 = vmatpush1.msra.mxu0 %v6065_v27  ;;  %v2293_v52 = vand.u32 4294901760, %v2292_v28 }
 0x151   :  { %2040 = vmatmul.mubr.f32.gmra.mxu1 %v7927_v26  ;;  %v4334_v37 = vadd.f32 %v4333_v42, %v4332_v19  ;;  %7932 = vst [vmem:[#allocation25_spill] sm:$0xff] %v6091_v34  ;;  %v7556_v8 = vand.u32 4294901760, %v6091_v34  ;;  %2146 = vmatprep.subr.mxu0 %v6067_v1  ;;  %v2299_v26 = vand.u32 4294901760, %v2298_v58  ;;  %v2087_v19 = vld [vmem:[%s7365_s3 + $0x100] sm:$0xff]  ;;  %v2317_v42 = vand.u32 4294901760, %v2316_v57 }
 0x152   :  { %2045 = vmatprep.mubr.f32.mxu1 %v7929_v23  ;;  %2148 = vmatpush1.msra.mxu0 %v6078_v32  ;;  %v2311_v23 = vand.u32 4294901760, %v2310_v45  ;;  %v6198_v35 = vsub.f32 %v2099_v56, %v6181_v33  ;;  %v6210_v20 = vsub.f32 %v2092_v36, %v6190_v4  ;;  %v6215_v13 = vand.u32 4294901760, %v2087_v19  ;;  %v2083_v57 = vld [vmem:[%s7365_s3 + $0xe0] sm:$0xff] }
 0x153   :  { %v6050_v40 = vadd.f32 %v4334_v37, %v970_v5  ;;  %v2274_v63 = vsub.f32 %v6091_v34, %v7556_v8  ;;  %2150 = vmatprep.subr.mxu0 %v6080_v60  ;;  %v2305_v5 = vand.u32 4294901760, %v2304_v50  ;;  %v6188_v37 = vand.u32 4294901760, %v2095_v12  ;;  %v2064_v8 = vld [vmem:[%s7365_s3 + $0x48] sm:$0xff] }
 0x154   :  { %2152 = vmatpush1.msra.mxu0 %v6082_v15  ;;  %v7547_v25 = vand.u32 4294901760, %v6195_v38  ;;  %v7546_v28 = vand.u32 4294901760, %v6198_v35  ;;  %v6222_v50 = vsub.f32 %v2088_v47, %v6203_v9  ;;  %v7539_v56 = vand.u32 4294901760, %v6210_v20 }
 0x155   :  { %2047 = vmatmul.mubr.f32.gmra.mxu1 %v7930_v48  ;;  %v2275_v21 = vand.u32 4294901760, %v2274_v63  ;;  %2154 = vmatprep.subr.mxu0 %v6099_v24  ;;  %v6183_v48 = vand.u32 4294901760, %v2096_v30  ;;  %v6207_v22 = vsub.f32 %v2095_v12, %v6188_v37  ;;  %v6213_v63 = vsub.f32 %v2091_v59, %v6192_v44 }
 0x156   :  { %2495 = vmatprep.mubr.f32.mxu1 %v7557_v31  ;;  %2156 = vmatpush1.msra.mxu0 %v6111_v18  ;;  %v7542_v12 = vand.u32 4294901760, %v6222_v50  ;;  %v2346_v59 = vsub.f32 %v6210_v20, %v7539_v56 }
 0x157   :  { %2276 = vmatprep.subr.mxu1 %v2275_v21  ;;  %v6201_v41 = vsub.f32 %v2096_v30, %v6183_v48  ;;  %2158 = vmatprep.subr.mxu0 %v6179_v10  ;;  %v7540_v0 = vand.u32 4294901760, %v6207_v22  ;;  %v7538_v30 = vand.u32 4294901760, %v6213_v63  ;;  %v6229_v21 = vsub.f32 %v2087_v19, %v6215_v13 }
 0x158   :  { %2282 = vmatpush1.msra.mxu1 %v2281_v51  ;;  %2160 = vmatpush1.msra.mxu0 %v6181_v33  ;;  %v2322_v51 = vsub.f32 %v6195_v38, %v7547_v25 }
 0x159   :  { %2288 = vmatprep.subr.mxu1 %v2287_v16  ;;  %v7541_v58 = vand.u32 4294901760, %v6201_v41  ;;  %2162 = vmatprep.subr.mxu0 %v6183_v48  ;;  %7933 = vst [vmem:[#allocation17_spill] sm:$0xff] %v6229_v21  ;;  %v2328_v16 = vsub.f32 %v6198_v35, %v7546_v28  ;;  %v2340_v36 = vsub.f32 %v6207_v22, %v7540_v0  ;;  %v2347_v0 = vand.u32 4294901760, %v2346_v59 }
 0x15a   :  { %2294 = vmatpush1.msra.mxu1 %v2293_v52  ;;  %2164 = vmatpush1.msra.mxu0 %v6188_v37  ;;  %v2352_v52 = vsub.f32 %v6213_v63, %v7538_v30  ;;  %v2323_v47 = vand.u32 4294901760, %v2322_v51  ;;  %v6270_v51 = vand.u32 4294901760, %v2083_v57 }
 0x15b   :  { %2300 = vmatprep.subr.mxu1 %v2299_v26  ;;  %v2334_v45 = vsub.f32 %v6201_v41, %v7541_v58  ;;  %2166 = vmatprep.subr.mxu0 %v6190_v4  ;;  %v7543_v26 = vand.u32 4294901760, %v6229_v21  ;;  %v2341_v30 = vand.u32 4294901760, %v2340_v36 }
 0x15c   :  { %2306 = vmatpush1.msra.mxu1 %v2305_v5  ;;  %v2084_v5 = vld [vmem:[%s7365_s3 + $0xe8] sm:$0xff]  ;;  %2168 = vmatpush1.msra.mxu0 %v6192_v44  ;;  %v6276_v36 = vsub.f32 %v2083_v57, %v6270_v51 }
 0x15d   :  { %2312 = vmatprep.subr.mxu1 %v2311_v23  ;;  %v2329_v23 = vand.u32 4294901760, %v2328_v16  ;;  %v2335_v19 = vand.u32 4294901760, %v2334_v45  ;;  %2170 = vmatprep.subr.mxu0 %v6203_v9  ;;  %v2364_v56 = vsub.f32 %v6229_v21, %v7543_v26  ;;  %v6268_v58 = vand.u32 4294901760, %v2084_v5 }
 0x15e   :  { %2318 = vmatpush1.msra.mxu1 %v2317_v42  ;;  %v2358_v42 = vsub.f32 %v6222_v50, %v7542_v12  ;;  %2172 = vmatpush1.msra.mxu0 %v6215_v13  ;;  %v2353_v16 = vand.u32 4294901760, %v2352_v52  ;;  %7935 = vst [vmem:[#allocation20_spill] sm:$0xff] %v6276_v36 }
 0x15f   :  { %2324 = vmatprep.subr.mxu1 %v2323_v47  ;;  %v6273_v12 = vsub.f32 %v2084_v5, %v6268_v58  ;;  %2174 = vmatprep.subr.mxu0 %v6268_v58  ;;  %v2365_v26 = vand.u32 4294901760, %v2364_v56  ;;  %v7544_v47 = vand.u32 4294901760, %v6276_v36 }
 0x160   :  { %2330 = vmatpush1.msra.mxu1 %v2329_v23  ;;  %v2359_v45 = vand.u32 4294901760, %v2358_v42  ;;  %2176 = vmatpush1.msra.mxu0 %v6270_v51  ;;  %v2079_v23 = vld [vmem:[%s7365_s3 + $0xc0] sm:$0xff] }
 0x161   :  { %2336 = vmatprep.subr.mxu1 %v2335_v19  ;;  %7934 = vst [vmem:[#allocation8_spill] sm:$0xff] %v6273_v12  ;;  %v7545_v59 = vand.u32 4294901760, %v6273_v12  ;;  %v2376_v5 = vsub.f32 %v6276_v36, %v7544_v47  ;;  %v6296_v19 = vand.u32 4294901760, %v2079_v23 }
 0x162   :  { %2342 = vmatpush1.msra.mxu1 %v2341_v30 }
 0x163   :  { %2348 = vmatprep.subr.mxu1 %v2347_v0  ;;  %v2370_v52 = vsub.f32 %v6273_v12, %v7545_v59  ;;  %v2377_v56 = vand.u32 4294901760, %v2376_v5  ;;  %v2080_v0 = vld [vmem:[%s7365_s3 + $0xc8] sm:$0xff] }
 0x164   :  { %2354 = vmatpush1.msra.mxu1 %v2353_v16  ;;  %v6291_v57 = vand.u32 4294901760, %v2080_v0 }
 0x165   :  { %2360 = vmatprep.subr.mxu1 %v2359_v45  ;;  %v2371_v30 = vand.u32 4294901760, %v2370_v52  ;;  %v2075_v52 = vld [vmem:[%s7365_s3 + $0xa0] sm:$0xff] }
 0x166   :  { %2366 = vmatpush1.msra.mxu1 %v2365_v26  ;;  %v2076_v26 = vld [vmem:[%s7365_s3 + $0xa8] sm:$0xff]  ;;  %v6302_v16 = vsub.f32 %v2080_v0, %v6291_v57  ;;  %2178 = vmatprep.subr.mxu0 %v6291_v57 }
 0x167   :  { %2372 = vmatprep.subr.mxu1 %v2371_v30  ;;  %v6304_v45 = vand.u32 4294901760, %v2076_v26  ;;  %v6312_v30 = vsub.f32 %v2079_v23, %v6296_v19  ;;  %v2072_v0 = vld [vmem:[%s7365_s3 + $0x88] sm:$0xff]  ;;  %2180 = vmatpush1.msra.mxu0 %v6296_v19 }
 0x168   :  { %2378 = vmatpush1.msra.mxu1 %v2377_v56  ;;  %7936 = vst [vmem:[#allocation10_spill] sm:$0xff] %v6302_v16  ;;  %v6314_v56 = vand.u32 4294901760, %v2075_v52  ;;  %v7554_v59 = vand.u32 4294901760, %v6302_v16  ;;  %v6324_v25 = vand.u32 4294901760, %v2072_v0 }
 0x169   :  { %7937 = vst [vmem:[#allocation22_spill] sm:$0xff] %v6312_v30  ;;  %v6322_v28 = vsub.f32 %v2076_v26, %v6304_v45  ;;  %2182 = vmatprep.subr.mxu0 %v6304_v45  ;;  %v7561_v23 = vand.u32 4294901760, %v6312_v30 }
 0x16a   :  { %2184 = vmatpush1.msra.mxu0 %v6314_v56  ;;  %v2382_v26 = vsub.f32 %v6302_v16, %v7554_v59  ;;  %v6345_v53 = vsub.f32 %v2072_v0, %v6324_v25 }
 0x16b   :  { %7938 = vst [vmem:[#allocation11_spill] sm:$0xff] %v6322_v28  ;;  %2186 = vmatprep.subr.mxu0 %v6324_v25  ;;  %v2388_v54 = vsub.f32 %v6312_v30, %v7561_v23  ;;  %v7944_v16 = vand.u32 4294901760, %v6322_v28 }
 0x16c   :  { %7940 = vst [vmem:[#allocation12_spill] sm:$0xff] %v6345_v53  ;;  %v2383_v39 = vand.u32 4294901760, %v2382_v26 }
 0x16d   :  { %v2394_v23 = vsub.f32 %v6322_v28, %v7944_v16  ;;  %v2389_v36 = vand.u32 4294901760, %v2388_v54  ;;  %v2060_v16 = vld [vmem:[%s7365_s3 + $0x28] sm:$0xff] }
 0x16e   :  { %2384 = vmatprep.subr.mxu1 %v2383_v39 }
 0x16f   :  { %v2395_v59 = vand.u32 4294901760, %v2394_v23  ;;  %2390 = vmatpush1.msra.mxu1 %v2389_v36  ;;  %v2059_v36 = vld [vmem:[%s7365_s3 + $0x20] sm:$0xff] }
 0x171   :  { %2396 = vmatprep.subr.mxu1 %v2395_v59 }
 0x17c   :  { %v1198_v42 = vpop.f32.mrf.mxu0 }
 0x17d   :  { %v1199_v5 = vadd.f32 %v1198_v42, %v6033_v11  ;;  %v2071_v11 = vld [vmem:[%s7365_s3 + $0x80] sm:$0xff]  ;;  %v6332_v42 = vsub.f32 %v2075_v52, %v6314_v56 }
 0x17e   :  { %v1200_v47 = vpop.f32.mrf.mxu0  ;;  %v6334_v29 = vand.u32 4294901760, %v2071_v11  ;;  %v2067_v52 = vld [vmem:[%s7365_s3 + $0x60] sm:$0xff] }
 0x17f   :  { %7939 = vst [vmem:[#allocation26_spill] sm:$0xff] %v6332_v42  ;;  %v2068_v47 = vld [vmem:[%s7365_s3 + $0x68] sm:$0xff]  ;;  %v6360_v0 = vand.u32 4294901760, %v2067_v52  ;;  %v7945_v12 = vand.u32 4294901760, %v6332_v42 }
 0x180   :  { %v6347_v43 = vand.u32 4294901760, %v2068_v47  ;;  %v6358_v14 = vsub.f32 %v2071_v11, %v6334_v29  ;;  %2188 = vmatpush1.msra.mxu0 %v6334_v29  ;;  %v2063_v11 = vld [vmem:[%s7365_s3 + $0x40] sm:$0xff] }
 0x181   :  { %7943 = vst [vmem:[#allocation23_spill] sm:$0xff] %v6360_v0  ;;  %v6392_v28 = vsub.f32 %v2067_v52, %v6360_v0  ;;  %v6400_v21 = vand.u32 4294901760, %v2063_v11 }
 0x182   :  { %7941 = vst [vmem:[#allocation6_spill] sm:$0xff] %v6347_v43  ;;  %v1213_v55 = vpop.f32.mrf.mxu0  ;;  %7942 = vst [vmem:[#allocation13_spill] sm:$0xff] %v6358_v14  ;;  %2190 = vmatprep.subr.mxu0 %v6347_v43  ;;  %v6382_v26 = vsub.f32 %v2068_v47, %v6347_v43 }
 0x183   :  { %v6367_v31 = vadd.f32 %v1213_v55, %v6045_v2  ;;  %v2400_v2 = vsub.f32 %v6332_v42, %v7945_v12  ;;  %v7578_v55 = vand.u32 4294901760, %v6358_v14  ;;  %2192 = vmatpush1.msra.mxu0 %v6360_v0  ;;  %7948 = vst [vmem:[#allocation24_spill] sm:$0xff] %v6392_v28  ;;  %v6394_v12 = vand.u32 4294901760, %v2064_v8  ;;  %7950 = vst [vmem:[#allocation21_spill] sm:$0xff] %v6400_v21 }
 0x184   :  { %v1215_v30 = vpop.f32.mrf.mxu0  ;;  %7946 = vst [vmem:[#allocation15_spill] sm:$0xff] %v6382_v26  ;;  %v7585_v43 = vand.u32 4294901760, %v6382_v26 }
 0x185   :  { %v7947_v30 = vand.u32 4294901760, %v6345_v53  ;;  %7949 = vst [vmem:[#allocation5_spill] sm:$0xff] %v6394_v12  ;;  %v2401_v47 = vand.u32 4294901760, %v2400_v2  ;;  %v2412_v42 = vsub.f32 %v6358_v14, %v7578_v55  ;;  %v6404_v52 = vsub.f32 %v2064_v8, %v6394_v12  ;;  %v2056_v2 = vld [vmem:[%s7365_s3 + $0x8] sm:$0xff]  ;;  %2194 = vmatprep.subr.mxu0 %v6394_v12  ;;  %v2055_v14 = vld [vmem:[%s7365_s3] sm:$0xff] }
 0x186   :  { %v2418_v8 = vsub.f32 %v6382_v26, %v7585_v43  ;;  %2196 = vmatpush1.msra.mxu0 %v6400_v21 }
 0x187   :  { %v2406_v54 = vsub.f32 %v6345_v53, %v7947_v30  ;;  %v1455_v39 = vpop.f32.mrf.mxu1  ;;  %7951 = vst [vmem:[#allocation32_spill] sm:$0xff] %v6404_v52  ;;  %v6406_v53 = vand.u32 4294901760, %v2060_v16  ;;  %v1228_v55 = vpop.f32.mrf.mxu0  ;;  %2402 = vmatpush1.msra.mxu1 %v2401_v47  ;;  %v6419_v30 = vsub.f32 %v2063_v11, %v6400_v21  ;;  %v7590_v47 = vand.u32 4294901760, %v6404_v52 }
 0x188   :  { %v1456_v59 = vadd.f32 %v1455_v39, %v1199_v5  ;;  %v1229_v0 = vadd.f32 %v1228_v55, %v6050_v40  ;;  %v7953_v5 = vand.u32 4294901760, %v6392_v28  ;;  %v2419_v43 = vand.u32 4294901760, %v2418_v8 }
 0x189   :  { %v2407_v23 = vand.u32 4294901760, %v2406_v54  ;;  %v2413_v54 = vand.u32 4294901760, %v2412_v42  ;;  %7952 = vst [vmem:[#allocation38_spill] sm:$0xff] %v6419_v30  ;;  %v1457_v12 = vpop.f32.mrf.mxu1  ;;  %v6431_v39 = vsub.f32 %v2060_v16, %v6406_v53  ;;  %2198 = vmatprep.subr.mxu0 %v6406_v53  ;;  %v1230_v11 = vpop.f32.mrf.mxu0  ;;  %v7591_v26 = vand.u32 4294901760, %v6419_v30 }
 0x18a   :  { %v2424_v42 = vsub.f32 %v6392_v28, %v7953_v5  ;;  %v6435_v21 = vand.u32 4294901760, %v2059_v36  ;;  %v6437_v40 = vand.u32 4294901760, %v2056_v2  ;;  %v2430_v12 = vsub.f32 %v6404_v52, %v7590_v47 }
 0x18b   :  { %2408 = vmatprep.subr.mxu1 %v2407_v23  ;;  %7954 = vst [vmem:[#allocation27_spill] sm:$0xff] %v6431_v39  ;;  %v7596_v23 = vand.u32 4294901760, %v6431_v39  ;;  %v6443_v16 = vand.u32 4294901760, %v2055_v14 }
 0x18c   :  { %2414 = vmatpush1.msra.mxu1 %v2413_v54  ;;  %7955 = vst [vmem:[#allocation16_spill] sm:$0xff] %v6435_v21  ;;  %7956 = vst [vmem:[#allocation30_spill] sm:$0xff] %v6437_v40  ;;  %v2425_v55 = vand.u32 4294901760, %v2424_v42  ;;  %v2436_v54 = vsub.f32 %v6419_v30, %v7591_v26  ;;  %v6449_v8 = vsub.f32 %v2059_v36, %v6435_v21  ;;  %2200 = vmatpush1.msra.mxu0 %v6435_v21 }
 0x18d   :  { %7957 = vst [vmem:[#allocation18_spill] sm:$0xff] %v6443_v16  ;;  %2420 = vmatprep.subr.mxu1 %v2419_v43  ;;  %v6452_v5 = vsub.f32 %v2056_v2, %v6437_v40  ;;  %v1462_v42 = vpop.f32.mrf.mxu1  ;;  %v2431_v11 = vand.u32 4294901760, %v2430_v12  ;;  %v2442_v47 = vsub.f32 %v6431_v39, %v7596_v23  ;;  %v6459_v43 = vsub.f32 %v2055_v14, %v6443_v16 }
 0x18e   :  { %7958 = vst [vmem:[#allocation19_spill] sm:$0xff] %v6449_v8  ;;  %2426 = vmatpush1.msra.mxu1 %v2425_v55  ;;  %2202 = vmatprep.subr.mxu0 %v6437_v40  ;;  %v1463_v36 = vadd.f32 %v1462_v42, %v6367_v31  ;;  %v2437_v26 = vand.u32 4294901760, %v2436_v54  ;;  %v7598_v2 = vand.u32 4294901760, %v6449_v8 }
 0x18f   :  { %7959 = vst [vmem:[#allocation34_spill] sm:$0xff] %v6452_v5  ;;  %7960 = vst [vmem:[#allocation7_spill] sm:$0xff] %v6459_v43  ;;  %v7601_v30 = vand.u32 4294901760, %v6452_v5  ;;  %2204 = vmatpush1.msra.mxu0 %v6443_v16  ;;  %v1464_v55 = vpop.f32.mrf.mxu1  ;;  %2432 = vmatprep.subr.mxu1 %v2431_v11  ;;  %v2443_v12 = vand.u32 4294901760, %v2442_v47  ;;  %v7608_v52 = vand.u32 4294901760, %v6459_v43 }
 0x190   :  { %2519 = vmatprep.subr.mxu0 %v6091_v34  ;;  %2438 = vmatpush1.msra.mxu1 %v2437_v26  ;;  %v2448_v14 = vsub.f32 %v6449_v8, %v7598_v2 }
 0x191   :  { %v2454_v31 = vsub.f32 %v6452_v5, %v7601_v30  ;;  %2444 = vmatprep.subr.mxu1 %v2443_v12  ;;  %v2460_v54 = vsub.f32 %v6459_v43, %v7608_v52 }
 0x192   :  { %v1469_v42 = vpop.f32.mrf.mxu1  ;;  %v2449_v47 = vand.u32 4294901760, %v2448_v14 }
 0x193   :  { %v2455_v11 = vand.u32 4294901760, %v2454_v31  ;;  %v1470_v55 = vadd.f32 %v1469_v42, %v1229_v0  ;;  %v2461_v23 = vand.u32 4294901760, %v2460_v54 }
 0x194   :  { %v1471_v34 = vpop.f32.mrf.mxu1  ;;  %2450 = vmatpush1.msra.mxu1 %v2449_v47 }
 0x195   :  { %2456 = vmatprep.subr.mxu1 %v2455_v11 }
 0x196   :  { %2462 = vmatpush1.msra.mxu1 %v2461_v23 }
 0x197   :  { %2671 = vmatprep.subr.mxu1 %v6063_v62 }
 0x1c0   :  { %v1605_v26 = vpop.f32.mrf.mxu0 }
 0x1c1   :  { %v1606_v2 = vadd.f32 %v1605_v26, %v1456_v59 }
 0x1c2   :  { %v1607_v8 = vpop.f32.mrf.mxu0 }
 0x1c6   :  { %v1614_v30 = vpop.f32.mrf.mxu0 }
 0x1c7   :  { %v1615_v12 = vadd.f32 %v1614_v30, %v1463_v36 }
 0x1c8   :  { %v1616_v5 = vpop.f32.mrf.mxu0 }
 0x1cb   :  { %v1730_v39 = vpop.f32.mrf.mxu1  ;;  %v1623_v28 = vpop.f32.mrf.mxu0 }
 0x1cc   :  { %v1624_v52 = vadd.f32 %v1623_v28, %v1470_v55  ;;  %v1731_v11 = vadd.f32 %v1730_v39, %v1606_v2 }
 0x1cd   :  { %v1732_v43 = vpop.f32.mrf.mxu1  ;;  %v1625_v14 = vpop.f32.mrf.mxu0 }
 0x1d1   :  { %v1741_v31 = vpop.f32.mrf.mxu1 }
 0x1d2   :  { %v1742_v26 = vadd.f32 %v1741_v31, %v1615_v12 }
 0x1d3   :  { %v1743_v0 = vpop.f32.mrf.mxu1 }
 0x1d6   :  { %v1752_v54 = vpop.f32.mrf.mxu1 }
 0x1d7   :  { %v1753_v55 = vadd.f32 %v1752_v54, %v1624_v52 }
 0x1d8   :  { %v1754_v34 = vpop.f32.mrf.mxu1 }
 0x204   :  { %v1917_v42 = vpop.f32.mrf.mxu0 }
 0x205   :  { %v1918_v16 = vadd.f32 %v1917_v42, %v1731_v11 }
 0x206   :  { %v1919_v47 = vpop.f32.mrf.mxu0 }
 0x208   :  { %v1924_v23 = vpop.f32.mrf.mxu0 }
 0x209   :  { %v1925_v40 = vadd.f32 %v1924_v23, %v1742_v26 }
 0x20a   :  { %v1926_v62 = vpop.f32.mrf.mxu0 }
 0x20c   :  { %v1931_v59 = vpop.f32.mrf.mxu0 }
 0x20d   :  { %v2034_v8 = vpop.f32.mrf.mxu1  ;;  %v1932_v21 = vadd.f32 %v1931_v59, %v1753_v55  ;;  %v7976_v55 = vld [vmem:[#allocation8_spill] sm:$0xff] }
 0x20e   :  { %v2035_v30 = vadd.f32 %v2034_v8, %v1918_v16  ;;  %v1933_v36 = vpop.f32.mrf.mxu0  ;;  %v7963_v16 = vmov 0.0  }
 0x20f   :  { %v2036_v5 = vpop.f32.mrf.mxu1 }
 0x210   :  { %v2052_v28 = vmax.f32 %v2035_v30, 0.0 }
 0x211   :  { %v2041_v43 = vpop.f32.mrf.mxu1 }
 0x212   :  { %v6478_v14 = vand.u32 4294901760, %v2052_v28  ;;  %v2042_v0 = vadd.f32 %v2041_v43, %v1925_v40  ;;  %v7975_v43 = vld [vmem:[#allocation6_spill] sm:$0xff] }
 0x213   :  { %v2043_v34 = vpop.f32.mrf.mxu1 }
 0x214   :  { %7961 = vst [vmem:[#allocation41_spill] sm:$0xff] %v6478_v14  ;;  %v6481_v47 = vsub.f32 %v2052_v28, %v6478_v14  ;;  %v2053_v62 = vmax.f32 %v2042_v0, 0.0  ;;  %2497 = vmatmul.mubr.f32.vlgmr.msra.gmra.mxu1 %v6478_v14  ;;  %v7974_v28 = vld [vmem:[#allocation17_spill] sm:$0xff]  ;;  %v7977_v0 = vld [vmem:[#allocation23_spill] sm:$0xff]  ;;  %v7978_v34 = vld [vmem:[#allocation20_spill] sm:$0xff] }
 0x215   :  { %2673 = vmatpush1.msra.mxu1 %v6065_v27  ;;  %v2048_v39 = vpop.f32.mrf.mxu1  ;;  %2502 = vmatprep.mubr.f32.mxu1 %v7963_v16  ;;  %v7992_v14 = vld [vmem:[#allocation24_spill] sm:$0xff] }
 0x216   :  { %7962 = vst [vmem:[#allocation28_spill] sm:$0xff] %v6481_v47  ;;  %v6487_v2 = vand.u32 4294901760, %v6481_v47  ;;  %v6489_v52 = vand.u32 4294901760, %v2053_v62  ;;  %v2049_v12 = vadd.f32 %v2048_v39, %v1932_v21  ;;  %2675 = vmatprep.subr.mxu1 %v6067_v1  ;;  %v7980_v39 = vld [vmem:[#allocation10_spill] sm:$0xff] }
 0x217   :  { %2677 = vmatpush1.msra.mxu1 %v6078_v32  ;;  %v2050_v40 = vpop.f32.mrf.mxu1 }
 0x218   :  { %7964 = vst [vmem:[#allocation9_spill] sm:$0xff] %v6487_v2  ;;  %7965 = vst [vmem:[#allocation29_spill] sm:$0xff] %v6489_v52  ;;  %v2241_v31 = vsub.f32 %v6481_v47, %v6487_v2  ;;  %v6496_v54 = vsub.f32 %v2053_v62, %v6489_v52  ;;  %v2054_v42 = vmax.f32 %v2049_v12, 0.0  ;;  %2679 = vmatprep.subr.mxu1 %v6080_v60  ;;  %2504 = vmatmul.mubr.f32.gmra.mxu1 %v6489_v52  ;;  %v7979_v62 = vld [vmem:[#allocation5_spill] sm:$0xff]  ;;  %v7982_v40 = vld [vmem:[#allocation22_spill] sm:$0xff] }
 0x219   :  { %2681 = vmatpush1.msra.mxu1 %v6082_v15  ;;  %2509 = vmatprep.mubr.f32.mxu1 %v7963_v16  ;;  %v7981_v12 = vld [vmem:[#allocation21_spill] sm:$0xff]  ;;  %v7991_v52 = vld [vmem:[#allocation14_spill] sm:$0xff] }
 0x21a   :  { %7966 = vst [vmem:[#allocation31_spill] sm:$0xff] %v6496_v54  ;;  %v6502_v21 = vand.u32 4294901760, %v2241_v31  ;;  %v6504_v23 = vand.u32 4294901760, %v2054_v42  ;;  %2683 = vmatprep.subr.mxu1 %v6099_v24  ;;  %v6508_v11 = vand.u32 4294901760, %v6496_v54  ;;  %v7983_v31 = vld [vmem:[#allocation11_spill] sm:$0xff] }
 0x21b   :  { %2685 = vmatpush1.msra.mxu1 %v6111_v18 }
 0x21c   :  { %7967 = vst [vmem:[#allocation33_spill] sm:$0xff] %v6502_v21  ;;  %7968 = vst [vmem:[#allocation35_spill] sm:$0xff] %v6504_v23  ;;  %v6512_v59 = vsub.f32 %v2054_v42, %v6504_v23  ;;  %2687 = vmatprep.subr.mxu1 %v6179_v10  ;;  %2243 = vmatmul.mubr.f32.vlgmr.msra.gmra.mxu0 %v6502_v21  ;;  %v2252_v8 = vsub.f32 %v6496_v54, %v6508_v11  ;;  %v7984_v42 = vld [vmem:[#allocation16_spill] sm:$0xff]  ;;  %v7989_v21 = vld [vmem:[#allocation13_spill] sm:$0xff] }
 0x21d   :  { %7969 = vst [vmem:[#allocation36_spill] sm:$0xff] %v6508_v11  ;;  %2511 = vmatmul.mubr.f32.gmra.mxu1 %v6504_v23  ;;  %2522 = vmatpush1.msra.mxu0 %v6094_v7  ;;  %v7990_v23 = vld [vmem:[#allocation15_spill] sm:$0xff] }
 0x21e   :  { %7970 = vst [vmem:[#allocation37_spill] sm:$0xff] %v6512_v59  ;;  %2689 = vmatpush1.msra.mxu1 %v6181_v33  ;;  %2525 = vmatprep.subr.mxu0 %v6097_v3  ;;  %v6522_v26 = vand.u32 4294901760, %v2252_v8  ;;  %v6525_v30 = vand.u32 4294901760, %v6512_v59  ;;  %v7985_v8 = vld [vmem:[#allocation26_spill] sm:$0xff] }
 0x21f   :  { %2691 = vmatprep.subr.mxu1 %v6183_v48  ;;  %2528 = vmatpush1.msra.mxu0 %v6103_v46 }
 0x220   :  { %7971 = vst [vmem:[#allocation39_spill] sm:$0xff] %v6522_v26  ;;  %7972 = vst [vmem:[#allocation40_spill] sm:$0xff] %v6525_v30  ;;  %2693 = vmatpush1.msra.mxu1 %v6188_v37  ;;  %2248 = vmatprep.mubr.f32.mxu0 %v7963_v16  ;;  %v2263_v5 = vsub.f32 %v6512_v59, %v6525_v30 }
 0x221   :  { %2531 = vmatprep.subr.mxu0 %v6106_v6  ;;  %2695 = vmatprep.subr.mxu1 %v6190_v4 }
 0x222   :  { %2254 = vmatmul.mubr.f32.gmra.mxu0 %v6522_v26  ;;  %2697 = vmatpush1.msra.mxu1 %v6192_v44  ;;  %v6539_v36 = vand.u32 4294901760, %v2263_v5  ;;  %v7986_v5 = vld [vmem:[#allocation30_spill] sm:$0xff] }
 0x223   :  { %2534 = vmatpush1.msra.mxu0 %v6109_v61  ;;  %2699 = vmatprep.subr.mxu1 %v6203_v9  ;;  %v7988_v26 = vld [vmem:[#allocation18_spill] sm:$0xff] }
 0x224   :  { %7973 = vst [vmem:[#allocation42_spill] sm:$0xff] %v6539_v36  ;;  %2537 = vmatprep.subr.mxu0 %v6118_v49  ;;  %2701 = vmatpush1.msra.mxu1 %v6215_v13 }
 0x225   :  { %2540 = vmatpush1.msra.mxu0 %v6125_v17  ;;  %2259 = vmatprep.mubr.f32.mxu0 %v7963_v16 }
 0x226   :  { %2543 = vmatprep.subr.mxu0 %v6195_v38  ;;  %2703 = vmatprep.subr.mxu1 %v6268_v58 }
 0x227   :  { %2265 = vmatmul.mubr.f32.gmra.mxu0 %v6539_v36  ;;  %2705 = vmatpush1.msra.mxu1 %v6270_v51  ;;  %v7987_v36 = vld [vmem:[#allocation12_spill] sm:$0xff] }
 0x228   :  { %2546 = vmatpush1.msra.mxu0 %v6198_v35  ;;  %2707 = vmatprep.subr.mxu1 %v6291_v57 }
 0x229   :  { %2549 = vmatprep.subr.mxu0 %v6201_v41  ;;  %2709 = vmatpush1.msra.mxu1 %v6296_v19 }
 0x22a   :  { %2552 = vmatpush1.msra.mxu0 %v6207_v22  ;;  %2711 = vmatprep.subr.mxu1 %v6304_v45 }
 0x22b   :  { %2555 = vmatprep.subr.mxu0 %v6210_v20  ;;  %2713 = vmatpush1.msra.mxu1 %v6314_v56 }
 0x22c   :  { %2558 = vmatpush1.msra.mxu0 %v6213_v63  ;;  %2715 = vmatprep.subr.mxu1 %v6324_v25 }
 0x22d   :  { %2561 = vmatprep.subr.mxu0 %v6222_v50  ;;  %2717 = vmatpush1.msra.mxu1 %v6334_v29 }
 0x22e   :  { %2564 = vmatpush1.msra.mxu0 %v7974_v28  ;;  %2719 = vmatprep.subr.mxu1 %v7975_v43 }
 0x22f   :  { %2567 = vmatprep.subr.mxu0 %v7976_v55  ;;  %2721 = vmatpush1.msra.mxu1 %v7977_v0 }
 0x230   :  { %2570 = vmatpush1.msra.mxu0 %v7978_v34  ;;  %2723 = vmatprep.subr.mxu1 %v7979_v62 }
 0x231   :  { %2573 = vmatprep.subr.mxu0 %v7980_v39  ;;  %2725 = vmatpush1.msra.mxu1 %v7981_v12 }
 0x232   :  { %2576 = vmatpush1.msra.mxu0 %v7982_v40  ;;  %2727 = vmatprep.subr.mxu1 %v6406_v53 }
 0x233   :  { %2579 = vmatprep.subr.mxu0 %v7983_v31  ;;  %2729 = vmatpush1.msra.mxu1 %v7984_v42  ;;  %v7993_v42 = vld [vmem:[#allocation32_spill] sm:$0xff] }
 0x234   :  { %2582 = vmatpush1.msra.mxu0 %v7985_v8  ;;  %2731 = vmatprep.subr.mxu1 %v7986_v5  ;;  %v7994_v5 = vld [vmem:[#allocation38_spill] sm:$0xff] }
 0x235   :  { %2585 = vmatprep.subr.mxu0 %v7987_v36  ;;  %2733 = vmatpush1.msra.mxu1 %v7988_v26  ;;  %v7995_v26 = vld [vmem:[#allocation27_spill] sm:$0xff] }
 0x236   :  { %2588 = vmatpush1.msra.mxu0 %v7989_v21  ;;  %2766 = vmatprep.mubr.f32.mxu1 %v7963_v16 }
 0x237   :  { %2591 = vmatprep.subr.mxu0 %v7990_v23  ;;  %2770 = vmatmul.mubr.f32.vlgmr.msra.gmra.mxu1 %v6487_v2  ;;  %v2073_v2 = vld [vmem:[%s7365_s3 + $0x90] sm:$0xff] }
 0x238   :  { %2977 = vmatprep.subr.mxu1 %v7991_v52  ;;  %2594 = vmatpush1.msra.mxu0 %v7992_v14  ;;  %v7996_v52 = vld [vmem:[#allocation19_spill] sm:$0xff] }
 0x239   :  { %2979 = vmatpush1.msra.mxu1 %v6065_v27  ;;  %2597 = vmatprep.subr.mxu0 %v7993_v42  ;;  %v7997_v27 = vld [vmem:[#allocation34_spill] sm:$0xff] }
 0x23a   :  { %2981 = vmatprep.subr.mxu1 %v6067_v1  ;;  %2600 = vmatpush1.msra.mxu0 %v7994_v5  ;;  %v7998_v1 = vld [vmem:[#allocation7_spill] sm:$0xff] }
 0x23b   :  { %2775 = vmatprep.mubr.f32.mxu1 %v7963_v16  ;;  %2983 = vmatpush1.msra.mxu1 %v6078_v32  ;;  %v7999_v32 = vld [vmem:[#allocation25_spill] sm:$0xff] }
 0x23c   :  { %2603 = vmatprep.subr.mxu0 %v7995_v26  ;;  %2779 = vmatmul.mubr.f32.gmra.mxu1 %v6508_v11 }
 0x23d   :  { %2985 = vmatprep.subr.mxu1 %v6080_v60  ;;  %2606 = vmatpush1.msra.mxu0 %v7996_v52  ;;  %v8000_v60 = vand.u32 4294901760, %v7999_v32  ;;  %v8009_v32 = vand.u32 4294901760, %v6198_v35  ;;  %v2106_v35 = vld [vmem:[%s7365_s3 + $0x198] sm:$0xff] }
 0x23e   :  { %2987 = vmatpush1.msra.mxu1 %v6082_v15  ;;  %2609 = vmatprep.subr.mxu0 %v7997_v27  ;;  %v8001_v15 = vand.u32 4294901760, %v6094_v7  ;;  %v2118_v7 = vld [vmem:[%s7365_s3 + $0x1f8] sm:$0xff] }
 0x23f   :  { %2989 = vmatprep.subr.mxu1 %v6099_v24  ;;  %2612 = vmatpush1.msra.mxu0 %v7998_v1  ;;  %v8002_v24 = vand.u32 4294901760, %v6097_v3  ;;  %v2117_v3 = vld [vmem:[%s7365_s3 + $0x1f0] sm:$0xff] }
 0x240   :  { %2645 = vmatprep.mubr.f32.mxu0 %v7963_v16  ;;  %2784 = vmatprep.mubr.f32.mxu1 %v7963_v16 }
 0x241   :  { %2991 = vmatpush1.msra.mxu1 %v6111_v18  ;;  %2648 = vmatmul.mubr.f32.vlgmr.msra.gmra.mxu0 %v6481_v47  ;;  %v8003_v18 = vand.u32 4294901760, %v6103_v46  ;;  %v8005_v46 = vand.u32 4294901760, %v6109_v61  ;;  %v2113_v61 = vld [vmem:[%s7365_s3 + $0x1d0] sm:$0xff]  ;;  %v2074_v47 = vld [vmem:[%s7365_s3 + $0x98] sm:$0xff] }
 0x242   :  { %2788 = vmatmul.mubr.f32.gmra.mxu1 %v6525_v30  ;;  %2797 = vmatprep.subr.mxu0 %v8000_v60 }
 0x243   :  { %2993 = vmatprep.subr.mxu1 %v6179_v10  ;;  %2801 = vmatpush1.msra.mxu0 %v8001_v15  ;;  %v8004_v10 = vand.u32 4294901760, %v6106_v6  ;;  %v2114_v6 = vld [vmem:[%s7365_s3 + $0x1d8] sm:$0xff] }
 0x244   :  { %2995 = vmatpush1.msra.mxu1 %v6181_v33  ;;  %2805 = vmatprep.subr.mxu0 %v8002_v24  ;;  %v8006_v33 = vand.u32 4294901760, %v6118_v49  ;;  %v8008_v49 = vand.u32 4294901760, %v6195_v38  ;;  %v8010_v38 = vand.u32 4294901760, %v6201_v41  ;;  %v2105_v41 = vld [vmem:[%s7365_s3 + $0x190] sm:$0xff] }
 0x245   :  { %2997 = vmatprep.subr.mxu1 %v6183_v48  ;;  %2653 = vmatprep.mubr.f32.mxu0 %v7963_v16  ;;  %v6635_v48 = vand.u32 4294901760, %v2118_v7 }
 0x246   :  { %2809 = vmatpush1.msra.mxu0 %v8003_v18  ;;  %2999 = vmatpush1.msra.mxu1 %v6188_v37  ;;  %v6637_v37 = vand.u32 4294901760, %v2117_v3 }
 0x247   :  { %2656 = vmatmul.mubr.f32.gmra.mxu0 %v6496_v54  ;;  %2813 = vmatprep.subr.mxu0 %v8004_v10  ;;  %v6665_v60 = vsub.f32 %v2118_v7, %v6635_v48  ;;  %v8053_v54 = vld [vmem:[#allocation29_spill] sm:$0xff] }
 0x248   :  { %3001 = vmatprep.subr.mxu1 %v6190_v4  ;;  %2817 = vmatpush1.msra.mxu0 %v8005_v46  ;;  %v8007_v4 = vand.u32 4294901760, %v6125_v17  ;;  %v6656_v17 = vand.u32 4294901760, %v2113_v61  ;;  %v6668_v15 = vsub.f32 %v2117_v3, %v6637_v37  ;;  %v8018_v3 = vand.u32 4294901760, %v6222_v50 }
 0x249   :  { %3003 = vmatpush1.msra.mxu1 %v6192_v44  ;;  %2821 = vmatprep.subr.mxu0 %v8006_v33  ;;  %v6648_v44 = vand.u32 4294901760, %v2114_v6  ;;  %8011 = vst [vmem:[#allocation17_spill] sm:$0xff] %v6665_v60  ;;  %v7630_v46 = vand.u32 4294901760, %v6665_v60  ;;  %v2098_v33 = vld [vmem:[%s7365_s3 + $0x158] sm:$0xff] }
 0x24a   :  { %3005 = vmatprep.subr.mxu1 %v6203_v9  ;;  %2661 = vmatprep.mubr.f32.mxu0 %v7963_v16  ;;  %v2110_v9 = vld [vmem:[%s7365_s3 + $0x1b8] sm:$0xff]  ;;  %8012 = vst [vmem:[#allocation6_spill] sm:$0xff] %v6668_v15  ;;  %v6696_v7 = vsub.f32 %v2113_v61, %v6656_v17  ;;  %v2097_v61 = vld [vmem:[%s7365_s3 + $0x150] sm:$0xff] }
 0x24b   :  { %2825 = vmatpush1.msra.mxu0 %v8007_v4  ;;  %3007 = vmatpush1.msra.mxu1 %v6215_v13  ;;  %v2109_v13 = vld [vmem:[%s7365_s3 + $0x1b0] sm:$0xff]  ;;  %v6676_v24 = vand.u32 4294901760, %v2110_v9  ;;  %v6685_v18 = vsub.f32 %v2114_v6, %v6648_v44  ;;  %v8019_v6 = vand.u32 4294901760, %v7974_v28  ;;  %v8021_v4 = vand.u32 4294901760, %v7976_v55 }
 0x24c   :  { %2664 = vmatmul.mubr.f32.gmra.mxu0 %v6512_v59  ;;  %2829 = vmatprep.subr.mxu0 %v8008_v49  ;;  %v6687_v10 = vand.u32 4294901760, %v2109_v13  ;;  %8017 = vst [vmem:[#allocation23_spill] sm:$0xff] %v6696_v7  ;;  %v8052_v59 = vand.u32 4294901760, %v7995_v26 }
 0x24d   :  { %3009 = vmatprep.subr.mxu1 %v6268_v58  ;;  %2833 = vmatpush1.msra.mxu0 %v8009_v32  ;;  %v8013_v58 = vand.u32 4294901760, %v6207_v22  ;;  %8015 = vst [vmem:[#allocation8_spill] sm:$0xff] %v6685_v18  ;;  %v2102_v22 = vld [vmem:[%s7365_s3 + $0x178] sm:$0xff]  ;;  %v7627_v49 = vand.u32 4294901760, %v6685_v18  ;;  %v8023_v32 = vand.u32 4294901760, %v7978_v34 }
 0x24e   :  { %3011 = vmatpush1.msra.mxu1 %v6270_v51  ;;  %2837 = vmatprep.subr.mxu0 %v8010_v38  ;;  %v8014_v51 = vand.u32 4294901760, %v6210_v20  ;;  %v2101_v20 = vld [vmem:[%s7365_s3 + $0x170] sm:$0xff]  ;;  %v6719_v50 = vand.u32 4294901760, %v2102_v22  ;;  %v6743_v38 = vand.u32 4294901760, %v2098_v33 }
 0x24f   :  { %3013 = vmatprep.subr.mxu1 %v6291_v57  ;;  %2841 = vmatpush1.msra.mxu0 %v8013_v58  ;;  %v8016_v57 = vand.u32 4294901760, %v6213_v63  ;;  %v6708_v63 = vand.u32 4294901760, %v2105_v41  ;;  %v6731_v28 = vand.u32 4294901760, %v2101_v20  ;;  %v8025_v58 = vand.u32 4294901760, %v7980_v39 }
 0x250   :  { %3015 = vmatpush1.msra.mxu1 %v6296_v19  ;;  %2845 = vmatprep.subr.mxu0 %v8014_v51  ;;  %v6698_v19 = vand.u32 4294901760, %v2106_v35  ;;  %v6760_v51 = vand.u32 4294901760, %v2097_v61  ;;  %v8027_v39 = vand.u32 4294901760, %v7982_v40 }
 0x251   :  { %3017 = vmatprep.subr.mxu1 %v6304_v45  ;;  %2849 = vmatpush1.msra.mxu0 %v8016_v57  ;;  %v7628_v45 = vand.u32 4294901760, %v6668_v15  ;;  %v6782_v40 = vsub.f32 %v2101_v20, %v6731_v28  ;;  %v6797_v20 = vsub.f32 %v2098_v33, %v6743_v38 }
 0x252   :  { %3019 = vmatpush1.msra.mxu1 %v6314_v56  ;;  %2853 = vmatprep.subr.mxu0 %v8018_v3  ;;  %v6717_v56 = vsub.f32 %v2110_v9, %v6676_v24  ;;  %v2094_v9 = vld [vmem:[%s7365_s3 + $0x138] sm:$0xff]  ;;  %v6741_v55 = vsub.f32 %v2106_v35, %v6698_v19  ;;  %v6758_v35 = vsub.f32 %v2105_v41, %v6708_v63  ;;  %v8029_v41 = vand.u32 4294901760, %v7983_v31 }
 0x253   :  { %3021 = vmatprep.subr.mxu1 %v6324_v25  ;;  %2857 = vmatpush1.msra.mxu0 %v8019_v6  ;;  %v6729_v25 = vsub.f32 %v2109_v13, %v6687_v10  ;;  %v2093_v13 = vld [vmem:[%s7365_s3 + $0x130] sm:$0xff]  ;;  %v3233_v34 = vsub.f32 %v6668_v15, %v7628_v45  ;;  %v6770_v3 = vsub.f32 %v2102_v22, %v6719_v50  ;;  %v6772_v6 = vand.u32 4294901760, %v2094_v9 }
 0x254   :  { %8020 = vst [vmem:[#allocation20_spill] sm:$0xff] %v6717_v56  ;;  %3023 = vmatpush1.msra.mxu1 %v6334_v29  ;;  %2861 = vmatprep.subr.mxu0 %v8021_v4  ;;  %v7629_v29 = vand.u32 4294901760, %v6696_v7  ;;  %8024 = vst [vmem:[#allocation10_spill] sm:$0xff] %v6741_v55  ;;  %v7631_v57 = vand.u32 4294901760, %v6717_v56  ;;  %v3239_v4 = vsub.f32 %v6685_v18, %v7627_v49  ;;  %v2089_v22 = vld [vmem:[%s7365_s3 + $0x110] sm:$0xff]  ;;  %v8034_v49 = vand.u32 4294901760, %v7987_v36 }
 0x255   :  { %8022 = vst [vmem:[#allocation5_spill] sm:$0xff] %v6729_v25  ;;  %3025 = vmatprep.subr.mxu1 %v7975_v43  ;;  %2865 = vmatpush1.msra.mxu0 %v8023_v32  ;;  %v3227_v43 = vsub.f32 %v6665_v60, %v7630_v46  ;;  %8026 = vst [vmem:[#allocation21_spill] sm:$0xff] %v6758_v35  ;;  %v6784_v32 = vand.u32 4294901760, %v2093_v13  ;;  %v3234_v45 = vand.u32 4294901760, %v3233_v34  ;;  %v8037_v46 = vand.u32 4294901760, %v7989_v21 }
 0x256   :  { %3027 = vmatpush1.msra.mxu1 %v7977_v0  ;;  %2869 = vmatprep.subr.mxu0 %v8025_v58  ;;  %v2090_v0 = vld [vmem:[%s7365_s3 + $0x118] sm:$0xff]  ;;  %8028 = vst [vmem:[#allocation22_spill] sm:$0xff] %v6770_v3  ;;  %8030 = vst [vmem:[#allocation11_spill] sm:$0xff] %v6782_v40  ;;  %v3245_v31 = vsub.f32 %v6696_v7, %v7629_v29  ;;  %v7633_v58 = vand.u32 4294901760, %v6741_v55  ;;  %v8036_v29 = vld [vmem:[#allocation30_spill] sm:$0xff]  ;;  %v3251_v33 = vsub.f32 %v6717_v56, %v7631_v57 }
 0x257   :  { %3029 = vmatprep.subr.mxu1 %v7979_v62  ;;  %2873 = vmatpush1.msra.mxu0 %v8027_v39  ;;  %v7632_v62 = vand.u32 4294901760, %v6729_v25  ;;  %8032 = vst [vmem:[#allocation26_spill] sm:$0xff] %v6797_v20  ;;  %v6799_v39 = vand.u32 4294901760, %v2090_v0  ;;  %v6816_v36 = vsub.f32 %v2094_v9, %v6772_v6  ;;  %v3240_v21 = vand.u32 4294901760, %v3239_v4  ;;  %v8042_v57 = vld [vmem:[#allocation41_spill] sm:$0xff] }
 0x258   :  { %3031 = vmatpush1.msra.mxu1 %v7981_v12  ;;  %2877 = vmatprep.subr.mxu0 %v8029_v41  ;;  %v8031_v12 = vand.u32 4294901760, %v7985_v8  ;;  %v8033_v41 = vld [vmem:[#allocation16_spill] sm:$0xff]  ;;  %v6830_v9 = vsub.f32 %v2093_v13, %v6784_v32  ;;  %v8041_v34 = vand.u32 4294901760, %v7990_v23  ;;  %v2085_v13 = vld [vmem:[%s7365_s3 + $0xf0] sm:$0xff]  ;;  %v8044_v23 = vand.u32 4294901760, %v7992_v14 }
 0x259   :  { %3033 = vmatprep.subr.mxu1 %v6406_v53  ;;  %v3228_v53 = vand.u32 4294901760, %v3227_v43  ;;  %8038 = vst [vmem:[#allocation13_spill] sm:$0xff] %v6816_v36  ;;  %v8039_v43 = vld [vmem:[#allocation18_spill] sm:$0xff]  ;;  %3072 = vmatprep.mubr.f32.mxu1 %v7963_v16  ;;  %v6840_v8 = vsub.f32 %v2090_v0, %v6799_v39  ;;  %v2082_v0 = vld [vmem:[%s7365_s3 + $0xd8] sm:$0xff]  ;;  %v8046_v4 = vand.u32 4294901760, %v7993_v42  ;;  %v8047_v14 = vand.u32 4294901760, %v6770_v3 }
 0x25a   :  { %2881 = vmatpush1.msra.mxu0 %v8031_v12  ;;  %3035 = vmatpush1.msra.mxu1 %v8033_v41  ;;  %v6806_v12 = vsub.f32 %v2097_v61, %v6760_v51  ;;  %v2086_v61 = vld [vmem:[%s7365_s3 + $0xf8] sm:$0xff]  ;;  %8040 = vst [vmem:[#allocation15_spill] sm:$0xff] %v6830_v9  ;;  %v3246_v41 = vand.u32 4294901760, %v3245_v31 }
 0x25b   :  { %2885 = vmatprep.subr.mxu0 %v8034_v49  ;;  %3037 = vmatprep.subr.mxu1 %v8036_v29  ;;  %v6818_v49 = vand.u32 4294901760, %v2089_v22  ;;  %8043 = vst [vmem:[#allocation14_spill] sm:$0xff] %v6840_v8  ;;  %v2081_v29 = vld [vmem:[%s7365_s3 + $0xd0] sm:$0xff] }
 0x25c   :  { %8035 = vst [vmem:[#allocation12_spill] sm:$0xff] %v6806_v12  ;;  %2889 = vmatpush1.msra.mxu0 %v8037_v46  ;;  %3039 = vmatpush1.msra.mxu1 %v8039_v43  ;;  %v3257_v46 = vsub.f32 %v6729_v25, %v7632_v62  ;;  %v3263_v43 = vsub.f32 %v6741_v55, %v7633_v58  ;;  %v6851_v58 = vand.u32 4294901760, %v2086_v61  ;;  %v2058_v55 = vld [vmem:[%s7365_s3 + $0x18] sm:$0xff] }
 0x25d   :  { %2893 = vmatprep.subr.mxu0 %v8041_v34  ;;  %3074 = vmatmul.mubr.f32.vlgmr.msra.gmra.mxu1 %v8042_v57  ;;  %v8045_v34 = vand.u32 4294901760, %v6758_v35  ;;  %v6865_v62 = vsub.f32 %v2089_v22, %v6818_v49  ;;  %v2078_v22 = vld [vmem:[%s7365_s3 + $0xb8] sm:$0xff] }
 0x25e   :  { %3229 = vmatprep.subr.mxu1 %v3228_v53  ;;  %2897 = vmatpush1.msra.mxu0 %v8044_v23  ;;  %v3252_v53 = vand.u32 4294901760, %v3251_v33  ;;  %v6861_v23 = vsub.f32 %v6770_v3, %v8047_v14  ;;  %v3258_v42 = vand.u32 4294901760, %v3257_v46  ;;  %v8050_v33 = vand.u32 4294901760, %v6782_v40  ;;  %v2077_v14 = vld [vmem:[%s7365_s3 + $0xb0] sm:$0xff] }
 0x25f   :  { %v3269_v31 = vsub.f32 %v6758_v35, %v8045_v34  ;;  %3235 = vmatpush1.msra.mxu1 %v3234_v45  ;;  %2901 = vmatprep.subr.mxu0 %v8046_v4  ;;  %8048 = vst [vmem:[#allocation24_spill] sm:$0xff] %v6865_v62  ;;  %v8049_v45 = vand.u32 4294901760, %v7994_v5  ;;  %v6878_v34 = vand.u32 4294901760, %v2085_v13  ;;  %v8051_v5 = vand.u32 4294901760, %v6797_v20 }
 0x260   :  { %3241 = vmatprep.subr.mxu1 %v3240_v21  ;;  %v6875_v4 = vsub.f32 %v6782_v40, %v8050_v33  ;;  %3079 = vmatprep.mubr.f32.mxu1 %v7963_v16  ;;  %v3264_v21 = vand.u32 4294901760, %v3263_v43  ;;  %v6890_v33 = vand.u32 4294901760, %v2082_v0  ;;  %v8054_v43 = vand.u32 4294901760, %v6806_v12 }
 0x261   :  { %2905 = vmatpush1.msra.mxu0 %v8049_v45  ;;  %3247 = vmatpush1.msra.mxu1 %v3246_v41  ;;  %v6887_v46 = vsub.f32 %v6797_v20, %v8051_v5  ;;  %v3270_v41 = vand.u32 4294901760, %v3269_v31  ;;  %v6904_v5 = vsub.f32 %v2086_v61, %v6851_v58  ;;  %v6906_v45 = vand.u32 4294901760, %v2081_v29  ;;  %v8066_v20 = vld [vmem:[#allocation35_spill] sm:$0xff] }
 0x262   :  { %2909 = vmatprep.subr.mxu0 %v8052_v59  ;;  %3081 = vmatmul.mubr.f32.gmra.mxu1 %v8053_v54  ;;  %v6901_v30 = vsub.f32 %v6806_v12, %v8054_v43  ;;  %v8056_v59 = vand.u32 4294901760, %v7996_v52  ;;  %v3276_v26 = vand.u32 4294901760, %v6861_v23  ;;  %v8057_v31 = vand.u32 4294901760, %v6816_v36  ;;  %v2065_v12 = vld [vmem:[%s7365_s3 + $0x50] sm:$0xff] }
 0x263   :  { %8055 = vst [vmem:[#allocation32_spill] sm:$0xff] %v6904_v5  ;;  %3253 = vmatprep.subr.mxu1 %v3252_v53  ;;  %v6920_v11 = vand.u32 4294901760, %v2078_v22  ;;  %v8058_v53 = vand.u32 4294901760, %v7997_v27  ;;  %v3282_v52 = vand.u32 4294901760, %v6875_v4  ;;  %v8059_v23 = vand.u32 4294901760, %v6830_v9  ;;  %2954 = vmatprep.mubr.f32.mxu0 %v7963_v16 }
 0x264   :  { %2913 = vmatpush1.msra.mxu0 %v8056_v59  ;;  %v6917_v43 = vsub.f32 %v6816_v36, %v8057_v31  ;;  %3259 = vmatpush1.msra.mxu1 %v3258_v42  ;;  %v6934_v31 = vsub.f32 %v2085_v13, %v6878_v34  ;;  %v6936_v61 = vand.u32 4294901760, %v2077_v14  ;;  %v2070_v36 = vld [vmem:[%s7365_s3 + $0x78] sm:$0xff]  ;;  %v8061_v27 = vand.u32 4294901760, %v7998_v1 }
 0x265   :  { %2917 = vmatprep.subr.mxu0 %v8058_v53  ;;  %v6931_v59 = vsub.f32 %v6830_v9, %v8059_v23  ;;  %3265 = vmatprep.subr.mxu1 %v3264_v21  ;;  %v3288_v42 = vand.u32 4294901760, %v6887_v46  ;;  %v8062_v4 = vand.u32 4294901760, %v6840_v8  ;;  %v6950_v13 = vsub.f32 %v2082_v0, %v6890_v33  ;;  %v2069_v9 = vld [vmem:[%s7365_s3 + $0x70] sm:$0xff]  ;;  %v2066_v0 = vld [vmem:[%s7365_s3 + $0x58] sm:$0xff] }
 0x266   :  { %8060 = vst [vmem:[#allocation38_spill] sm:$0xff] %v6934_v31  ;;  %2921 = vmatpush1.msra.mxu0 %v8061_v27  ;;  %v6952_v23 = vand.u32 4294901760, %v2074_v47  ;;  %3086 = vmatprep.mubr.f32.mxu1 %v7963_v16  ;;  %v3294_v1 = vand.u32 4294901760, %v6901_v30  ;;  %v6962_v46 = vsub.f32 %v2081_v29, %v6906_v45  ;;  %v6964_v27 = vand.u32 4294901760, %v2073_v2 }
 0x267   :  { %v6947_v53 = vsub.f32 %v6840_v8, %v8062_v4  ;;  %8063 = vst [vmem:[#allocation27_spill] sm:$0xff] %v6950_v13  ;;  %3271 = vmatpush1.msra.mxu1 %v3270_v41  ;;  %2956 = vmatmul.mubr.f32.vlgmr.msra.gmra.mxu0 %v8042_v57  ;;  %v3300_v4 = vand.u32 4294901760, %v6917_v43  ;;  %v8064_v8 = vand.u32 4294901760, %v6865_v62  ;;  %v6977_v21 = vsub.f32 %v2078_v22, %v6920_v11  ;;  %v2062_v22 = vld [vmem:[%s7365_s3 + $0x38] sm:$0xff] }
 0x268   :  { %v6979_v29 = vand.u32 4294901760, %v2070_v36  ;;  %3088 = vmatmul.mubr.f32.gmra.mxu1 %v8066_v20  ;;  %3095 = vmatprep.subr.mxu0 %v6635_v48  ;;  %v3306_v41 = vand.u32 4294901760, %v6931_v59  ;;  %v7000_v59 = vsub.f32 %v2074_v47, %v6952_v23  ;;  %v7002_v43 = vand.u32 4294901760, %v2066_v0 }
 0x269   :  { %v6974_v30 = vsub.f32 %v6865_v62, %v8064_v8  ;;  %v6989_v8 = vsub.f32 %v2077_v14, %v6936_v61  ;;  %v6991_v62 = vand.u32 4294901760, %v2069_v9  ;;  %3277 = vmatprep.subr.mxu1 %v3276_v26  ;;  %3097 = vmatpush1.msra.mxu0 %v6637_v37  ;;  %v3312_v40 = vand.u32 4294901760, %v6947_v53  ;;  %v2061_v14 = vld [vmem:[%s7365_s3 + $0x30] sm:$0xff] }
 0x26a   :  { %8065 = vst [vmem:[#allocation19_spill] sm:$0xff] %v6979_v29  ;;  %8067 = vst [vmem:[#allocation34_spill] sm:$0xff] %v7000_v59  ;;  %3283 = vmatpush1.msra.mxu1 %v3282_v52  ;;  %3099 = vmatprep.subr.mxu0 %v6648_v44  ;;  %v8068_v26 = vand.u32 4294901760, %v6904_v5  ;;  %v7013_v3 = vsub.f32 %v2073_v2, %v6964_v27  ;;  %v7015_v47 = vand.u32 4294901760, %v2065_v12  ;;  %v7026_v53 = vand.u32 4294901760, %v2062_v22  ;;  %v2057_v2 = vld [vmem:[%s7365_s3 + $0x10] sm:$0xff] }
 0x26b   :  { %3289 = vmatprep.subr.mxu1 %v3288_v42  ;;  %2961 = vmatprep.mubr.f32.mxu0 %v7963_v16  ;;  %v3318_v52 = vand.u32 4294901760, %v6974_v30  ;;  %v8071_v42 = vand.u32 4294901760, %v6934_v31  ;;  %v7037_v25 = vsub.f32 %v2069_v9, %v6991_v62  ;;  %v8072_v56 = vand.u32 4294901760, %v6950_v13 }
 0x26c   :  { %v3323_v35 = vsub.f32 %v6904_v5, %v8068_v26  ;;  %8069 = vst [vmem:[#allocation7_spill] sm:$0xff] %v7015_v47  ;;  %v7024_v26 = vsub.f32 %v2070_v36, %v6979_v29  ;;  %3101 = vmatpush1.msra.mxu0 %v6656_v17  ;;  %3295 = vmatpush1.msra.mxu1 %v3294_v1  ;;  %v7039_v36 = vand.u32 4294901760, %v2061_v14  ;;  %v8073_v9 = vand.u32 4294901760, %v6962_v46 }
 0x26d   :  { %v3329_v5 = vsub.f32 %v6934_v31, %v8071_v42  ;;  %2963 = vmatmul.mubr.f32.gmra.mxu0 %v8053_v54  ;;  %3103 = vmatprep.subr.mxu0 %v6676_v24  ;;  %v3335_v7 = vsub.f32 %v6950_v13, %v8072_v56  ;;  %v7048_v18 = vsub.f32 %v2066_v0, %v7002_v43  ;;  %v7050_v42 = vand.u32 4294901760, %v2058_v55 }
 0x26e   :  { %8070 = vst [vmem:[#allocation25_spill] sm:$0xff] %v7024_v26  ;;  %3301 = vmatprep.subr.mxu1 %v3300_v4  ;;  %3105 = vmatpush1.msra.mxu0 %v6687_v10  ;;  %v3341_v30 = vsub.f32 %v6962_v46, %v8073_v9  ;;  %v7058_v15 = vsub.f32 %v2065_v12, %v7015_v47  ;;  %v7060_v56 = vand.u32 4294901760, %v2057_v2  ;;  %v3324_v0 = vand.u32 4294901760, %v3323_v35 }
 0x26f   :  { %3307 = vmatpush1.msra.mxu1 %v3306_v41  ;;  %3107 = vmatprep.subr.mxu0 %v6698_v19  ;;  %v8074_v1 = vand.u32 4294901760, %v6977_v21  ;;  %v7068_v60 = vsub.f32 %v2062_v22, %v7026_v53  ;;  %v3330_v12 = vand.u32 4294901760, %v3329_v5  ;;  %v8075_v9 = vand.u32 4294901760, %v6989_v8 }
 0x270   :  { %3313 = vmatprep.subr.mxu1 %v3312_v40  ;;  %2968 = vmatprep.mubr.f32.mxu0 %v7963_v16  ;;  %v7076_v35 = vsub.f32 %v2061_v14, %v7039_v36  ;;  %v8076_v22 = vand.u32 4294901760, %v7000_v59  ;;  %v7084_v5 = vsub.f32 %v2058_v55, %v7050_v42  ;;  %v8077_v14 = vand.u32 4294901760, %v7013_v3 }
 0x271   :  { %v3347_v4 = vsub.f32 %v6977_v21, %v8074_v1  ;;  %v3353_v41 = vsub.f32 %v6989_v8, %v8075_v9  ;;  %3109 = vmatpush1.msra.mxu0 %v6708_v63  ;;  %3319 = vmatpush1.msra.mxu1 %v3318_v52  ;;  %v3336_v1 = vand.u32 4294901760, %v3335_v7  ;;  %v3342_v9 = vand.u32 4294901760, %v3341_v30 }
 0x272   :  { %v3359_v40 = vsub.f32 %v7000_v59, %v8076_v22  ;;  %2970 = vmatmul.mubr.f32.gmra.mxu0 %v8066_v20  ;;  %3111 = vmatprep.subr.mxu0 %v6719_v50  ;;  %v3365_v31 = vsub.f32 %v7013_v3, %v8077_v14  ;;  %v7093_v52 = vsub.f32 %v2057_v2, %v7060_v56  ;;  %v8078_v55 = vand.u32 4294901760, %v7024_v26 }
 0x273   :  { %3325 = vmatprep.subr.mxu1 %v3324_v0  ;;  %3113 = vmatpush1.msra.mxu0 %v6731_v28  ;;  %v3348_v22 = vand.u32 4294901760, %v3347_v4  ;;  %v3354_v30 = vand.u32 4294901760, %v3353_v41  ;;  %v8079_v14 = vand.u32 4294901760, %v7037_v25  ;;  %v8080_v4 = vand.u32 4294901760, %v7048_v18 }
 0x274   :  { %v3371_v13 = vsub.f32 %v7024_v26, %v8078_v55  ;;  %3331 = vmatpush1.msra.mxu1 %v3330_v12  ;;  %3115 = vmatprep.subr.mxu0 %v6743_v38  ;;  %v3360_v0 = vand.u32 4294901760, %v3359_v40  ;;  %v3366_v12 = vand.u32 4294901760, %v3365_v31  ;;  %v8081_v41 = vand.u32 4294901760, %v7058_v15 }
 0x275   :  { %v3377_v7 = vsub.f32 %v7037_v25, %v8079_v14  ;;  %3337 = vmatprep.subr.mxu1 %v3336_v1  ;;  %3117 = vmatpush1.msra.mxu0 %v6760_v51  ;;  %v3383_v55 = vsub.f32 %v7048_v18, %v8080_v4  ;;  %v7680_v2 = vand.u32 4294901760, %v7093_v52  ;;  %v8082_v40 = vand.u32 4294901760, %v7068_v60 }
 0x276   :  { %3343 = vmatpush1.msra.mxu1 %v3342_v9  ;;  %3119 = vmatprep.subr.mxu0 %v6772_v6  ;;  %v3389_v14 = vsub.f32 %v7058_v15, %v8081_v41  ;;  %v3372_v1 = vand.u32 4294901760, %v3371_v13  ;;  %v8083_v31 = vand.u32 4294901760, %v7076_v35 }
 0x277   :  { %3349 = vmatprep.subr.mxu1 %v3348_v22  ;;  %3121 = vmatpush1.msra.mxu0 %v6784_v32  ;;  %v3395_v4 = vsub.f32 %v7068_v60, %v8082_v40  ;;  %v3378_v9 = vand.u32 4294901760, %v3377_v7  ;;  %v3384_v41 = vand.u32 4294901760, %v3383_v55  ;;  %v8084_v22 = vand.u32 4294901760, %v7084_v5 }
 0x278   :  { %3355 = vmatpush1.msra.mxu1 %v3354_v30  ;;  %3123 = vmatprep.subr.mxu0 %v6799_v39  ;;  %v3401_v59 = vsub.f32 %v7076_v35, %v8083_v31  ;;  %v3390_v40 = vand.u32 4294901760, %v3389_v14  ;;  %v3413_v7 = vsub.f32 %v7093_v52, %v7680_v2  ;;  %v8086_v14 = vld [vmem:[#allocation17_spill] sm:$0xff]  ;;  %v8090_v31 = vld [vmem:[#allocation39_spill] sm:$0xff]  ;;  %v8103_v2 = vld [vmem:[#allocation24_spill] sm:$0xff] }
 0x279   :  { %3361 = vmatprep.subr.mxu1 %v3360_v0  ;;  %3125 = vmatpush1.msra.mxu0 %v6818_v49  ;;  %v3407_v13 = vsub.f32 %v7084_v5, %v8084_v22  ;;  %v3396_v30 = vand.u32 4294901760, %v3395_v4  ;;  %v8088_v4 = vld [vmem:[#allocation8_spill] sm:$0xff]  ;;  %v8092_v22 = vld [vmem:[#allocation5_spill] sm:$0xff] }
 0x27a   :  { %3367 = vmatpush1.msra.mxu1 %v3366_v12  ;;  %3127 = vmatprep.subr.mxu0 %v6851_v58  ;;  %v3402_v0 = vand.u32 4294901760, %v3401_v59  ;;  %v3414_v12 = vand.u32 4294901760, %v3413_v7  ;;  %v8085_v59 = vld [vmem:[#allocation33_spill] sm:$0xff]  ;;  %v8095_v7 = vld [vmem:[#allocation42_spill] sm:$0xff] }
 0x27b   :  { %3373 = vmatprep.subr.mxu1 %v3372_v1  ;;  %3129 = vmatpush1.msra.mxu0 %v6878_v34  ;;  %v3408_v55 = vand.u32 4294901760, %v3407_v13  ;;  %v8087_v1 = vld [vmem:[#allocation6_spill] sm:$0xff] }
 0x27c   :  { %3379 = vmatpush1.msra.mxu1 %v3378_v9  ;;  %3131 = vmatprep.subr.mxu0 %v6890_v33  ;;  %v8089_v9 = vld [vmem:[#allocation23_spill] sm:$0xff]  ;;  %v8093_v13 = vld [vmem:[#allocation10_spill] sm:$0xff] }
 0x27d   :  { %3385 = vmatprep.subr.mxu1 %v3384_v41  ;;  %3133 = vmatpush1.msra.mxu0 %v6906_v45  ;;  %v8091_v41 = vld [vmem:[#allocation20_spill] sm:$0xff] }
 0x27e   :  { %3391 = vmatpush1.msra.mxu1 %v3390_v40  ;;  %3135 = vmatprep.subr.mxu0 %v6920_v11  ;;  %v8094_v40 = vld [vmem:[#allocation21_spill] sm:$0xff] }
 0x27f   :  { %3397 = vmatprep.subr.mxu1 %v3396_v30  ;;  %3137 = vmatpush1.msra.mxu0 %v6936_v61  ;;  %v8096_v30 = vld [vmem:[#allocation22_spill] sm:$0xff] }
 0x280   :  { %3403 = vmatpush1.msra.mxu1 %v3402_v0  ;;  %3139 = vmatprep.subr.mxu0 %v6952_v23  ;;  %v8097_v0 = vld [vmem:[#allocation11_spill] sm:$0xff] }
 0x281   :  { %3409 = vmatprep.subr.mxu1 %v3408_v55  ;;  %3141 = vmatpush1.msra.mxu0 %v6964_v27  ;;  %v8098_v55 = vld [vmem:[#allocation26_spill] sm:$0xff] }
 0x282   :  { %3415 = vmatpush1.msra.mxu1 %v3414_v12  ;;  %3448 = vmatprep.mubr.f32.mxu1 %v7963_v16  ;;  %v8099_v12 = vld [vmem:[#allocation12_spill] sm:$0xff] }
 0x283   :  { %3143 = vmatprep.subr.mxu0 %v6979_v29  ;;  %3450 = vmatmul.mubr.f32.vlgmr.msra.gmra.mxu1 %v8042_v57  ;;  %v8106_v57 = vld [vmem:[#allocation27_spill] sm:$0xff] }
 0x284   :  { %3624 = vmatprep.subr.mxu1 %v6635_v48  ;;  %3145 = vmatpush1.msra.mxu0 %v6991_v62 }
 0x285   :  { %3626 = vmatpush1.msra.mxu1 %v6637_v37  ;;  %3147 = vmatprep.subr.mxu0 %v7002_v43 }
 0x286   :  { %3628 = vmatprep.subr.mxu1 %v6648_v44  ;;  %3149 = vmatpush1.msra.mxu0 %v7015_v47 }
 0x287   :  { %3455 = vmatprep.mubr.f32.mxu1 %v7963_v16  ;;  %3630 = vmatpush1.msra.mxu1 %v6656_v17 }
 0x288   :  { %3151 = vmatprep.subr.mxu0 %v7026_v53  ;;  %3457 = vmatmul.mubr.f32.gmra.mxu1 %v8053_v54  ;;  %v8105_v54 = vld [vmem:[#allocation38_spill] sm:$0xff] }
 0x289   :  { %3632 = vmatprep.subr.mxu1 %v6676_v24  ;;  %3153 = vmatpush1.msra.mxu0 %v7039_v36 }
 0x28a   :  { %3634 = vmatpush1.msra.mxu1 %v6687_v10  ;;  %3155 = vmatprep.subr.mxu0 %v7050_v42 }
 0x28b   :  { %3636 = vmatprep.subr.mxu1 %v6698_v19  ;;  %3157 = vmatpush1.msra.mxu0 %v7060_v56 }
 0x28c   :  { %3190 = vmatprep.mubr.f32.mxu0 %v7963_v16  ;;  %3462 = vmatprep.mubr.f32.mxu1 %v7963_v16 }
 0x28d   :  { %3638 = vmatpush1.msra.mxu1 %v6708_v63  ;;  %3196 = vmatmul.mubr.f32.vlgmr.msra.gmra.mxu0 %v8085_v59  ;;  %v8100_v59 = vld [vmem:[#allocation13_spill] sm:$0xff] }
 0x28e   :  { %3464 = vmatmul.mubr.f32.gmra.mxu1 %v8066_v20  ;;  %3472 = vmatprep.subr.mxu0 %v8086_v14  ;;  %v8104_v20 = vld [vmem:[#allocation32_spill] sm:$0xff] }
 0x28f   :  { %3640 = vmatprep.subr.mxu1 %v6719_v50  ;;  %3475 = vmatpush1.msra.mxu0 %v8087_v1 }
 0x290   :  { %3642 = vmatpush1.msra.mxu1 %v6731_v28  ;;  %3478 = vmatprep.subr.mxu0 %v8088_v4 }
 0x291   :  { %3644 = vmatprep.subr.mxu1 %v6743_v38  ;;  %3201 = vmatprep.mubr.f32.mxu0 %v7963_v16 }
 0x292   :  { %3481 = vmatpush1.msra.mxu0 %v8089_v9  ;;  %3646 = vmatpush1.msra.mxu1 %v6760_v51 }
 0x293   :  { %3207 = vmatmul.mubr.f32.gmra.mxu0 %v8090_v31  ;;  %3484 = vmatprep.subr.mxu0 %v8091_v41  ;;  %v8101_v31 = vld [vmem:[#allocation15_spill] sm:$0xff] }
 0x294   :  { %3648 = vmatprep.subr.mxu1 %v6772_v6  ;;  %3487 = vmatpush1.msra.mxu0 %v8092_v22 }
 0x295   :  { %3650 = vmatpush1.msra.mxu1 %v6784_v32  ;;  %3490 = vmatprep.subr.mxu0 %v8093_v13 }
 0x296   :  { %3652 = vmatprep.subr.mxu1 %v6799_v39  ;;  %3212 = vmatprep.mubr.f32.mxu0 %v7963_v16 }
 0x297   :  { %3493 = vmatpush1.msra.mxu0 %v8094_v40  ;;  %3654 = vmatpush1.msra.mxu1 %v6818_v49 }
 0x298   :  { %3218 = vmatmul.mubr.f32.gmra.mxu0 %v8095_v7  ;;  %3496 = vmatprep.subr.mxu0 %v8096_v30  ;;  %v8102_v7 = vld [vmem:[#allocation14_spill] sm:$0xff] }
 0x299   :  { %3656 = vmatprep.subr.mxu1 %v6851_v58  ;;  %3499 = vmatpush1.msra.mxu0 %v8097_v0 }
 0x29a   :  { %3658 = vmatpush1.msra.mxu1 %v6878_v34  ;;  %3502 = vmatprep.subr.mxu0 %v8098_v55 }
 0x29b   :  { %3660 = vmatprep.subr.mxu1 %v6890_v33  ;;  %3505 = vmatpush1.msra.mxu0 %v8099_v12 }
 0x29c   :  { %3662 = vmatpush1.msra.mxu1 %v6906_v45  ;;  %3508 = vmatprep.subr.mxu0 %v8100_v59 }
 0x29d   :  { %3664 = vmatprep.subr.mxu1 %v6920_v11  ;;  %3511 = vmatpush1.msra.mxu0 %v8101_v31 }
 0x29e   :  { %3666 = vmatpush1.msra.mxu1 %v6936_v61  ;;  %3514 = vmatprep.subr.mxu0 %v8102_v7 }
 0x29f   :  { %3668 = vmatprep.subr.mxu1 %v6952_v23  ;;  %3517 = vmatpush1.msra.mxu0 %v8103_v2 }
 0x2a0   :  { %3670 = vmatpush1.msra.mxu1 %v6964_v27  ;;  %3520 = vmatprep.subr.mxu0 %v8104_v20 }
 0x2a1   :  { %3672 = vmatprep.subr.mxu1 %v6979_v29  ;;  %3523 = vmatpush1.msra.mxu0 %v8105_v54  ;;  %v8107_v29 = vld [vmem:[#allocation34_spill] sm:$0xff] }
 0x2a2   :  { %3674 = vmatpush1.msra.mxu1 %v6991_v62  ;;  %3526 = vmatprep.subr.mxu0 %v8106_v57 }
 0x2a3   :  { %3676 = vmatprep.subr.mxu1 %v7002_v43  ;;  %3529 = vmatpush1.msra.mxu0 %v6962_v46 }
 0x2a4   :  { %3678 = vmatpush1.msra.mxu1 %v7015_v47  ;;  %3532 = vmatprep.subr.mxu0 %v6977_v21  ;;  %v8108_v47 = vld [vmem:[#allocation9_spill] sm:$0xff] }
 0x2a5   :  { %3680 = vmatprep.subr.mxu1 %v7026_v53  ;;  %3535 = vmatpush1.msra.mxu0 %v6989_v8 }
 0x2a6   :  { %3682 = vmatpush1.msra.mxu1 %v7039_v36  ;;  %3538 = vmatprep.subr.mxu0 %v8107_v29 }
 0x2a7   :  { %3684 = vmatprep.subr.mxu1 %v7050_v42  ;;  %3541 = vmatpush1.msra.mxu0 %v7013_v3 }
 0x2a8   :  { %3686 = vmatpush1.msra.mxu1 %v7060_v56  ;;  %3719 = vmatprep.mubr.f32.mxu1 %v7963_v16 }
 0x2a9   :  { %3544 = vmatprep.subr.mxu0 %v7024_v26  ;;  %3723 = vmatmul.mubr.f32.vlgmr.msra.gmra.mxu1 %v8108_v47  ;;  %v8109_v26 = vld [vmem:[#allocation36_spill] sm:$0xff]  ;;  %v8125_v47 = vand.u32 4294901760, %v8099_v12 }
 0x2aa   :  { %3930 = vmatprep.subr.mxu1 %v6635_v48  ;;  %3547 = vmatpush1.msra.mxu0 %v7037_v25  ;;  %v8110_v48 = vld [vmem:[#allocation28_spill] sm:$0xff] }
 0x2ab   :  { %3932 = vmatpush1.msra.mxu1 %v6637_v37  ;;  %3550 = vmatprep.subr.mxu0 %v7048_v18  ;;  %v8111_v37 = vld [vmem:[#allocation40_spill] sm:$0xff] }
 0x2ac   :  { %3934 = vmatprep.subr.mxu1 %v6648_v44  ;;  %3553 = vmatpush1.msra.mxu0 %v7058_v15  ;;  %v8112_v44 = vand.u32 4294901760, %v8086_v14 }
 0x2ad   :  { %3728 = vmatprep.mubr.f32.mxu1 %v7963_v16  ;;  %3936 = vmatpush1.msra.mxu1 %v6656_v17  ;;  %v8113_v17 = vand.u32 4294901760, %v8087_v1 }
 0x2ae   :  { %3556 = vmatprep.subr.mxu0 %v7068_v60  ;;  %3732 = vmatmul.mubr.f32.gmra.mxu1 %v8109_v26  ;;  %v8131_v26 = vld [vmem:[#allocation19_spill] sm:$0xff] }
 0x2af   :  { %3938 = vmatprep.subr.mxu1 %v6676_v24  ;;  %3559 = vmatpush1.msra.mxu0 %v7076_v35  ;;  %v8114_v24 = vand.u32 4294901760, %v8088_v4 }
 0x2b0   :  { %3940 = vmatpush1.msra.mxu1 %v6687_v10  ;;  %3562 = vmatprep.subr.mxu0 %v7084_v5  ;;  %v8115_v10 = vand.u32 4294901760, %v8089_v9 }
 0x2b1   :  { %3942 = vmatprep.subr.mxu1 %v6698_v19  ;;  %3565 = vmatpush1.msra.mxu0 %v7093_v52  ;;  %v8116_v19 = vld [vmem:[#allocation31_spill] sm:$0xff] }
 0x2b2   :  { %3598 = vmatprep.mubr.f32.mxu0 %v7963_v16  ;;  %3737 = vmatprep.mubr.f32.mxu1 %v7963_v16 }
 0x2b3   :  { %3944 = vmatpush1.msra.mxu1 %v6708_v63  ;;  %3601 = vmatmul.mubr.f32.vlgmr.msra.gmra.mxu0 %v8110_v48  ;;  %v8117_v63 = vand.u32 4294901760, %v8091_v41 }
 0x2b4   :  { %3741 = vmatmul.mubr.f32.gmra.mxu1 %v8111_v37  ;;  %3750 = vmatprep.subr.mxu0 %v8112_v44 }
 0x2b5   :  { %3946 = vmatprep.subr.mxu1 %v6719_v50  ;;  %3754 = vmatpush1.msra.mxu0 %v8113_v17  ;;  %v8118_v50 = vand.u32 4294901760, %v8092_v22  ;;  %v2121_v22 = vlaneseq }
 0x2b6   :  { %3948 = vmatpush1.msra.mxu1 %v6731_v28  ;;  %3758 = vmatprep.subr.mxu0 %v8114_v24  ;;  %v8119_v28 = vand.u32 4294901760, %v8093_v13 }
 0x2b7   :  { %3950 = vmatprep.subr.mxu1 %v6743_v38  ;;  %3606 = vmatprep.mubr.f32.mxu0 %v7963_v16  ;;  %v8120_v38 = vand.u32 4294901760, %v8094_v40 }
 0x2b8   :  { %3762 = vmatpush1.msra.mxu0 %v8115_v10  ;;  %3952 = vmatpush1.msra.mxu1 %v6760_v51  ;;  %v8121_v51 = vld [vmem:[#allocation37_spill] sm:$0xff] }
 0x2b9   :  { %3609 = vmatmul.mubr.f32.gmra.mxu0 %v8116_v19  ;;  %3766 = vmatprep.subr.mxu0 %v8117_v63 }
 0x2ba   :  { %3954 = vmatprep.subr.mxu1 %v6772_v6  ;;  %3770 = vmatpush1.msra.mxu0 %v8118_v50  ;;  %v8122_v6 = vand.u32 4294901760, %v8096_v30  ;;  %v7342_v30 = vshrl.u32 %v2121_v22, 7 }
 0x2bb   :  { %3956 = vmatpush1.msra.mxu1 %v6784_v32  ;;  %3774 = vmatprep.subr.mxu0 %v8119_v28  ;;  %v8123_v32 = vand.u32 4294901760, %v8097_v0 }
 0x2bc   :  { %3958 = vmatprep.subr.mxu1 %v6799_v39  ;;  %3614 = vmatprep.mubr.f32.mxu0 %v7963_v16  ;;  %v8124_v39 = vand.u32 4294901760, %v8098_v55  ;;  %v2123_v55 = vsub.s32 0, %v7342_v30 }
 0x2bd   :  { %3778 = vmatpush1.msra.mxu0 %v8120_v38  ;;  %3960 = vmatpush1.msra.mxu1 %v6818_v49  ;;  %v8126_v49 = vand.u32 4294901760, %v8100_v59  ;;  %v7348_v59 = vld [vmem:[%s7366_s4] sm:$0xf]  ;;  %s4362_s4 = smov [#allocation2]  }
 0x2be   :  { %3617 = vmatmul.mubr.f32.gmra.mxu0 %v8121_v51  ;;  %3782 = vmatprep.subr.mxu0 %v8122_v6  ;;  %v2124_v48 = vrot.slane %v7348_v59, %v2123_v55  ;;  %s4077_s9 = sshll.u32 %s4362_s4, 4  ;;  %s4078_s9 = int_to_ptr.vmem [resolvable:$true] %s4077_s9 }
 0x2bf   :  { %3962 = vmatprep.subr.mxu1 %v6851_v58  ;;  %3786 = vmatpush1.msra.mxu0 %v8123_v32  ;;  %v8127_v58 = vand.u32 4294901760, %v8101_v31  ;;  %s4339_s10 = scalar_lea.vmem %s4078_s9, 1536  ;;  %p4344_p1 = scmp.lt.s32.totalorder %s4078_s9, %s4078_s9 }
 0x2c0   :  { %3964 = vmatpush1.msra.mxu1 %v6878_v34  ;;  %3790 = vmatprep.subr.mxu0 %v8124_v39  ;;  %v8128_v34 = vand.u32 4294901760, %v8102_v7  ;;  %v2127_v7 = vsub.s32 1, %v7342_v30  ;;  %p4340_p0 = scmp.ne.s32.totalorder %s4078_s9, %s4339_s10  ;;  %p4345_p2 = scmp.lt.s32.totalorder %s4339_s10, %s4339_s10 }
 0x2c1   :  { %3966 = vmatprep.subr.mxu1 %v6890_v33  ;;  %3794 = vmatpush1.msra.mxu0 %v8125_v47  ;;  %v8129_v33 = vand.u32 4294901760, %v8103_v2  ;;  %v8135_v2 = vld [vmem:[#allocation7_spill] sm:$0xff] }
 0x2c2   :  { %3968 = vmatpush1.msra.mxu1 %v6906_v45  ;;  %3798 = vmatprep.subr.mxu0 %v8126_v49  ;;  %v8130_v45 = vand.u32 4294901760, %v8104_v20  ;;  %v8136_v20 = vand.u32 4294901760, %v6977_v21  ;;  %v8140_v21 = vld [vmem:[#allocation25_spill] sm:$0xff]  ;;  %v2128_v17 = vrot.slane %v7348_v59, %v2127_v7  ;;  %p4346_p3 = por %p4345_p2, %p4344_p1 }
 0x2c3   :  { %3970 = vmatprep.subr.mxu1 %v6920_v11  ;;  %3802 = vmatpush1.msra.mxu0 %v8127_v58  ;;  %v8132_v11 = vand.u32 4294901760, %v8105_v54  ;;  %v8137_v54 = vand.u32 4294901760, %v6989_v8  ;;  %v8146_v8 = vand.u32 4294901760, %v7068_v60 }
 0x2c4   :  { %3972 = vmatpush1.msra.mxu1 %v6936_v61  ;;  %3806 = vmatprep.subr.mxu0 %v8128_v34  ;;  %v8133_v61 = vand.u32 4294901760, %v8106_v57  ;;  %v8138_v57 = vand.u32 4294901760, %v8107_v29  ;;  %v8144_v29 = vand.u32 4294901760, %v7048_v18  ;;  %v8150_v18 = vand.u32 4294901760, %v7093_v52  ;;  %p4347_p4 = pnand %p4346_p3, %p4340_p0 }
 0x2c5   :  { %3974 = vmatprep.subr.mxu1 %v6952_v23  ;;  %3810 = vmatpush1.msra.mxu0 %v8129_v33  ;;  %v8134_v23 = vand.u32 4294901760, %v6962_v46  ;;  %v8141_v46 = vand.u32 4294901760, %v8140_v21 }
 0x2c6   :  { %3976 = vmatpush1.msra.mxu1 %v6964_v27  ;;  %3814 = vmatprep.subr.mxu0 %v8130_v45  ;;  %v8142_v27 = vld [vmem:[#allocation41_spill] sm:$0xff] }
 0x2c7   :  { %3978 = vmatprep.subr.mxu1 %v8131_v26  ;;  %3818 = vmatpush1.msra.mxu0 %v8132_v11 }
 0x2c8   :  { %3980 = vmatpush1.msra.mxu1 %v6991_v62  ;;  %3822 = vmatprep.subr.mxu0 %v8133_v61  ;;  %v8139_v62 = vand.u32 4294901760, %v7013_v3  ;;  %v8145_v3 = vand.u32 4294901760, %v7058_v15  ;;  %v8151_v15 = vld [vmem:[#allocation35_spill] sm:$0xff] }
 0x2c9   :  { %3982 = vmatprep.subr.mxu1 %v7002_v43  ;;  %3826 = vmatpush1.msra.mxu0 %v8134_v23  ;;  %v8143_v43 = vand.u32 4294901760, %v7037_v25  ;;  %v8149_v25 = vand.u32 4294901760, %v7084_v5 }
 0x2ca   :  { %3984 = vmatpush1.msra.mxu1 %v8135_v2  ;;  %3830 = vmatprep.subr.mxu0 %v8136_v20 }
 0x2cb   :  { %3986 = vmatprep.subr.mxu1 %v7026_v53  ;;  %3834 = vmatpush1.msra.mxu0 %v8137_v54  ;;  %v8147_v53 = vld [vmem:[#allocation29_spill] sm:$0xff] }
 0x2cc   :  { %3988 = vmatpush1.msra.mxu1 %v7039_v36  ;;  %3838 = vmatprep.subr.mxu0 %v8138_v57  ;;  %v8148_v36 = vand.u32 4294901760, %v7076_v35 }
 0x2cd   :  { %3990 = vmatprep.subr.mxu1 %v7050_v42  ;;  %3842 = vmatpush1.msra.mxu0 %v8139_v62 }
 0x2ce   :  { %3992 = vmatpush1.msra.mxu1 %v7060_v56  ;;  %4025 = vmatprep.mubr.f32.mxu1 %v7963_v16 }
 0x2cf   :  { %3846 = vmatprep.subr.mxu0 %v8141_v46  ;;  %4027 = vmatmul.mubr.f32.vlgmr.msra.gmra.mxu1 %v8142_v27 }
 0x2d0   :  { %3850 = vmatpush1.msra.mxu0 %v8143_v43  ;;  %4032 = vmatprep.mubr.f32.mxu1 %v7963_v16 }
 0x2d1   :  { %3854 = vmatprep.subr.mxu0 %v8144_v29  ;;  %3907 = vmatprep.mubr.f32.mxu0 %v7963_v16 }
 0x2d2   :  { %3858 = vmatpush1.msra.mxu0 %v8145_v3 }
 0x2d3   :  { %3862 = vmatprep.subr.mxu0 %v8146_v8  ;;  %4034 = vmatmul.mubr.f32.gmra.mxu1 %v8147_v53 }
 0x2d4   :  { %3866 = vmatpush1.msra.mxu0 %v8148_v36  ;;  %4039 = vmatprep.mubr.f32.mxu1 %v7963_v16  ;;  %v2498_v60 = vpop.f32.mrf.mxu1 }
 0x2d5   :  { %3870 = vmatprep.subr.mxu0 %v8149_v25 }
 0x2d6   :  { %3874 = vmatpush1.msra.mxu0 %v8150_v18  ;;  %v2500_v42 = vpop.f32.mrf.mxu1 }
 0x2d7   :  { %3909 = vmatmul.mubr.f32.vlgmr.msra.gmra.mxu0 %v8142_v27  ;;  %4041 = vmatmul.mubr.f32.gmra.mxu1 %v8151_v15 }
 0x2d8   :  { %3914 = vmatprep.mubr.f32.mxu0 %v7963_v16  ;;  %v2505_v35 = vpop.f32.mrf.mxu1 }
 0x2da   :  { %v2507_v14 = vpop.f32.mrf.mxu1 }
 0x2db   :  { %3916 = vmatmul.mubr.f32.gmra.mxu0 %v8147_v53 }
 0x2dc   :  { %3921 = vmatprep.mubr.f32.mxu0 %v7963_v16  ;;  %v2244_v56 = vpop.f32.mrf.mxu0 }
 0x2dd   :  { %v2512_v1 = vpop.f32.mrf.mxu1  ;;  %v2245_v24 = vadd.f32 %v2244_v56, %v2124_v48 }
 0x2de   :  { %v2246_v5 = vpop.f32.mrf.mxu0 }
 0x2df   :  { %3923 = vmatmul.mubr.f32.gmra.mxu0 %v8151_v15  ;;  %v2514_v9 = vpop.f32.mrf.mxu1  ;;  %v2247_v63 = vadd.f32 %v2246_v5, %v2128_v17  ;;  %v2499_v50 = vadd.f32 %v2498_v60, %v2245_v24 }
 0x2e1   :  { %v2501_v32 = vadd.f32 %v2500_v42, %v2247_v63 }
 0x2e2   :  { %v2255_v52 = vpop.f32.mrf.mxu0 }
 0x2e3   :  { %v2256_v51 = vadd.f32 %v2255_v52, %v2124_v48 }
 0x2e4   :  { %v2257_v4 = vpop.f32.mrf.mxu0 }
 0x2e5   :  { %v2258_v47 = vadd.f32 %v2257_v4, %v2128_v17  ;;  %v2506_v34 = vadd.f32 %v2505_v35, %v2256_v51 }
 0x2e7   :  { %v2266_v41 = vpop.f32.mrf.mxu0  ;;  %v2508_v23 = vadd.f32 %v2507_v14, %v2258_v47 }
 0x2e8   :  { %v2267_v26 = vadd.f32 %v2266_v41, %v2124_v48 }
 0x2e9   :  { %v2268_v40 = vpop.f32.mrf.mxu0 }
 0x2ea   :  { %v2269_v54 = vadd.f32 %v2268_v40, %v2128_v17  ;;  %v2513_v43 = vadd.f32 %v2512_v1, %v2267_v26 }
 0x2ec   :  { %v2515_v36 = vadd.f32 %v2514_v9, %v2269_v54 }
 0x2f7   :  { %v2771_v13 = vpop.f32.mrf.mxu1 }
 0x2f9   :  { %v2773_v0 = vpop.f32.mrf.mxu1 }
 0x2fc   :  { %v2780_v12 = vpop.f32.mrf.mxu1 }
 0x2fe   :  { %v2782_v37 = vpop.f32.mrf.mxu1 }
 0x301   :  { %v2649_v16 = vpop.f32.mrf.mxu0 }
 0x302   :  { %v2789_v10 = vpop.f32.mrf.mxu1  ;;  %v2650_v6 = vadd.f32 %v2649_v16, %v2499_v50 }
 0x303   :  { %v2651_v31 = vpop.f32.mrf.mxu0 }
 0x304   :  { %v2791_v28 = vpop.f32.mrf.mxu1  ;;  %v2652_v49 = vadd.f32 %v2651_v31, %v2501_v32  ;;  %v2772_v45 = vadd.f32 %v2771_v13, %v2650_v6 }
 0x306   :  { %v2774_v20 = vadd.f32 %v2773_v0, %v2652_v49 }
 0x307   :  { %v2657_v44 = vpop.f32.mrf.mxu0 }
 0x308   :  { %v2658_v61 = vadd.f32 %v2657_v44, %v2506_v34 }
 0x309   :  { %v2659_v19 = vpop.f32.mrf.mxu0 }
 0x30a   :  { %v2660_v62 = vadd.f32 %v2659_v19, %v2508_v23  ;;  %v2781_v8 = vadd.f32 %v2780_v12, %v2658_v61 }
 0x30c   :  { %v2665_v38 = vpop.f32.mrf.mxu0  ;;  %v2783_v42 = vadd.f32 %v2782_v37, %v2660_v62 }
 0x30d   :  { %v2666_v53 = vadd.f32 %v2665_v38, %v2513_v43 }
 0x30e   :  { %v2667_v58 = vpop.f32.mrf.mxu0 }
 0x30f   :  { %v2668_v56 = vadd.f32 %v2667_v58, %v2515_v36  ;;  %v2790_v52 = vadd.f32 %v2789_v10, %v2666_v53  ;;  %v2131_v58 = vsub.s32 2, %v7342_v30 }
 0x311   :  { %v2792_v40 = vadd.f32 %v2791_v28, %v2668_v56  ;;  %v2132_v26 = vrot.slane %v7348_v59, %v2131_v58 }
 0x31d   :  { %v3075_v39 = vpop.f32.mrf.mxu1 }
 0x31f   :  { %v3077_v33 = vpop.f32.mrf.mxu1 }
 0x322   :  { %v3082_v21 = vpop.f32.mrf.mxu1 }
 0x324   :  { %v3084_v18 = vpop.f32.mrf.mxu1 }
 0x327   :  { %v2957_v11 = vpop.f32.mrf.mxu0 }
 0x328   :  { %v2958_v2 = vadd.f32 %v2957_v11, %v2772_v45  ;;  %v3089_v4 = vpop.f32.mrf.mxu1  ;;  %v2135_v45 = vsub.s32 3, %v7342_v30 }
 0x329   :  { %v2959_v57 = vpop.f32.mrf.mxu0 }
 0x32a   :  { %v3076_v46 = vadd.f32 %v3075_v39, %v2958_v2  ;;  %v2960_v27 = vadd.f32 %v2959_v57, %v2774_v20  ;;  %v3091_v12 = vpop.f32.mrf.mxu1  ;;  %v2136_v23 = vrot.slane %v7348_v59, %v2135_v45 }
 0x32c   :  { %v4047_v29 = vmax.f32 %v3076_v46, 0.0  ;;  %v3078_v3 = vadd.f32 %v3077_v33, %v2960_v27 }
 0x32d   :  { %v2964_v25 = vpop.f32.mrf.mxu0 }
 0x32e   :  { %4059 = vst [vmem:[#allocation2] sm:$0xff] %v4047_v29  ;;  %v4048_v15 = vmax.f32 %v3078_v3, 0.0  ;;  %v2965_v60 = vadd.f32 %v2964_v25, %v2781_v8 }
 0x32f   :  { %v2966_v35 = vpop.f32.mrf.mxu0 }
 0x330   :  { %4060 = vst [vmem:[#allocation2 + $0x8] sm:$0xff] %v4048_v15  ;;  %v3083_v5 = vadd.f32 %v3082_v21, %v2965_v60  ;;  %v2967_v14 = vadd.f32 %v2966_v35, %v2783_v42 }
 0x332   :  { %v4051_v41 = vmax.f32 %v3083_v5, 0.0  ;;  %v3085_v1 = vadd.f32 %v3084_v18, %v2967_v14  ;;  %v2971_v22 = vpop.f32.mrf.mxu0 }
 0x333   :  { %v2972_v13 = vadd.f32 %v2971_v22, %v2790_v52 }
 0x334   :  { %4063 = vst [vmem:[#allocation2 + $0x20] sm:$0xff] %v4051_v41  ;;  %v4052_v9 = vmax.f32 %v3085_v1, 0.0  ;;  %v2973_v0 = vpop.f32.mrf.mxu0 }
 0x335   :  { %v3090_v16 = vadd.f32 %v3089_v4, %v2972_v13  ;;  %v2974_v55 = vadd.f32 %v2973_v0, %v2792_v40 }
 0x336   :  { %4064 = vst [vmem:[#allocation2 + $0x28] sm:$0xff] %v4052_v9 }
 0x337   :  { %v4055_v31 = vmax.f32 %v3090_v16, 0.0  ;;  %v3092_v7 = vadd.f32 %v3091_v12, %v2974_v55 }
 0x339   :  { %4067 = vst [vmem:[#allocation2 + $0x40] sm:$0xf] %v4055_v31  ;;  %v4056_v48 = vmax.f32 %v3092_v7, 0.0 }
 0x33b   :  { %4068 = vst [vmem:[#allocation2 + $0x48] sm:$0xf] %v4056_v48 }
 0x343   :  { %v3451_v37 = vpop.f32.mrf.mxu1 }
 0x345   :  { %v3453_v44 = vpop.f32.mrf.mxu1 }
 0x348   :  { %v3458_v17 = vpop.f32.mrf.mxu1 }
 0x34a   :  { %v3460_v10 = vpop.f32.mrf.mxu1 }
 0x34d   :  { %v3197_v24 = vpop.f32.mrf.mxu0 }
 0x34e   :  { %v3465_v63 = vpop.f32.mrf.mxu1  ;;  %v3198_v2 = vadd.f32 %v3197_v24, %v2132_v26 }
 0x34f   :  { %v3199_v19 = vpop.f32.mrf.mxu0 }
 0x350   :  { %v3467_v28 = vpop.f32.mrf.mxu1  ;;  %v3200_v57 = vadd.f32 %v3199_v19, %v2136_v23  ;;  %v3452_v46 = vadd.f32 %v3451_v37, %v3198_v2 }
 0x352   :  { %v3454_v3 = vadd.f32 %v3453_v44, %v3200_v57 }
 0x353   :  { %v3208_v50 = vpop.f32.mrf.mxu0 }
 0x354   :  { %v3209_v21 = vadd.f32 %v3208_v50, %v2132_v26 }
 0x355   :  { %v3210_v38 = vpop.f32.mrf.mxu0 }
 0x356   :  { %v3211_v27 = vadd.f32 %v3210_v38, %v2136_v23  ;;  %v3459_v36 = vadd.f32 %v3458_v17, %v3209_v21 }
 0x358   :  { %v3219_v6 = vpop.f32.mrf.mxu0  ;;  %v3461_v18 = vadd.f32 %v3460_v10, %v3211_v27 }
 0x359   :  { %v3220_v53 = vadd.f32 %v3219_v6, %v2132_v26 }
 0x35a   :  { %v3221_v39 = vpop.f32.mrf.mxu0 }
 0x35b   :  { %v3222_v25 = vadd.f32 %v3221_v39, %v2136_v23  ;;  %v3466_v5 = vadd.f32 %v3465_v63, %v3220_v53 }
 0x35d   :  { %v3468_v4 = vadd.f32 %v3467_v28, %v3222_v25 }
 0x369   :  { %v3724_v51 = vpop.f32.mrf.mxu1 }
 0x36b   :  { %v3726_v32 = vpop.f32.mrf.mxu1 }
 0x36e   :  { %v3733_v47 = vpop.f32.mrf.mxu1 }
 0x370   :  { %v3735_v34 = vpop.f32.mrf.mxu1 }
 0x373   :  { %v3602_v49 = vpop.f32.mrf.mxu0 }
 0x374   :  { %v3742_v11 = vpop.f32.mrf.mxu1  ;;  %v3603_v29 = vadd.f32 %v3602_v49, %v3452_v46 }
 0x375   :  { %v3604_v33 = vpop.f32.mrf.mxu0 }
 0x376   :  { %v3744_v20 = vpop.f32.mrf.mxu1  ;;  %v3605_v30 = vadd.f32 %v3604_v33, %v3454_v3  ;;  %v3725_v59 = vadd.f32 %v3724_v51, %v3603_v29 }
 0x378   :  { %v3727_v52 = vadd.f32 %v3726_v32, %v3605_v30 }
 0x379   :  { %v3610_v61 = vpop.f32.mrf.mxu0 }
 0x37a   :  { %v3611_v60 = vadd.f32 %v3610_v61, %v3459_v36 }
 0x37b   :  { %v3612_v54 = vpop.f32.mrf.mxu0 }
 0x37c   :  { %v3613_v42 = vadd.f32 %v3612_v54, %v3461_v18  ;;  %v3734_v40 = vadd.f32 %v3733_v47, %v3611_v60 }
 0x37e   :  { %v3618_v43 = vpop.f32.mrf.mxu0  ;;  %v3736_v16 = vadd.f32 %v3735_v34, %v3613_v42 }
 0x37f   :  { %v3619_v1 = vadd.f32 %v3618_v43, %v3466_v5 }
 0x380   :  { %v3620_v15 = vpop.f32.mrf.mxu0 }
 0x381   :  { %v3621_v55 = vadd.f32 %v3620_v15, %v3468_v4  ;;  %v3743_v24 = vadd.f32 %v3742_v11, %v3619_v1 }
 0x383   :  { %v3745_v38 = vadd.f32 %v3744_v20, %v3621_v55 }
 0x38f   :  { %v4028_v62 = vpop.f32.mrf.mxu1 }
 0x391   :  { %v4030_v8 = vpop.f32.mrf.mxu1 }
 0x393   :  { %v4035_v56 = vpop.f32.mrf.mxu1 }
 0x395   :  { %v4037_v9 = vpop.f32.mrf.mxu1 }
 0x397   :  { %v3910_v35 = vpop.f32.mrf.mxu0  ;;  %v4042_v10 = vpop.f32.mrf.mxu1 }
 0x398   :  { %v3911_v14 = vadd.f32 %v3910_v35, %v3725_v59 }
 0x399   :  { %v3912_v41 = vpop.f32.mrf.mxu0  ;;  %v4044_v47 = vpop.f32.mrf.mxu1 }
 0x39a   :  { %v4029_v22 = vadd.f32 %v4028_v62, %v3911_v14  ;;  %v3913_v13 = vadd.f32 %v3912_v41, %v3727_v52 }
 0x39b   :  { %v3917_v0 = vpop.f32.mrf.mxu0 }
 0x39c   :  { %v4049_v12 = vmax.f32 %v4029_v22, 0.0  ;;  %v4031_v31 = vadd.f32 %v4030_v8, %v3913_v13  ;;  %v3918_v7 = vadd.f32 %v3917_v0, %v3734_v40 }
 0x39d   :  { %v3919_v48 = vpop.f32.mrf.mxu0 }
 0x39e   :  { %4061 = vst [vmem:[#allocation2 + $0x10] sm:$0xff] %v4049_v12  ;;  %v4050_v37 = vmax.f32 %v4031_v31, 0.0  ;;  %v4036_v44 = vadd.f32 %v4035_v56, %v3918_v7  ;;  %v3920_v17 = vadd.f32 %v3919_v48, %v3736_v16 }
 0x39f   :  { %v3924_v19 = vpop.f32.mrf.mxu0 }
 0x3a0   :  { %4062 = vst.msk [vmem:[#allocation2 + $0x18] sm:$0xff] %vm103_vm1, %v4050_v37  ;;  %v4053_v63 = vmax.f32 %v4036_v44, 0.0  ;;  %v4038_v50 = vadd.f32 %v4037_v9, %v3920_v17  ;;  %v3925_v28 = vadd.f32 %v3924_v19, %v3743_v24 }
 0x3a1   :  { %v3926_v51 = vpop.f32.mrf.mxu0 }
 0x3a2   :  { %4065 = vst [vmem:[#allocation2 + $0x30] sm:$0xff] %v4053_v63  ;;  %v4054_v6 = vmax.f32 %v4038_v50, 0.0  ;;  %v4043_v32 = vadd.f32 %v4042_v10, %v3925_v28  ;;  %v3927_v39 = vadd.f32 %v3926_v51, %v3745_v38 }
 0x3a4   :  { %4066 = vst.msk [vmem:[#allocation2 + $0x38] sm:$0xff] %vm103_vm1, %v4054_v6  ;;  %v4057_v49 = vmax.f32 %v4043_v32, 0.0  ;;  %v4045_v58 = vadd.f32 %v4044_v47, %v3927_v39 }
 0x3a6   :  { %4069 = vst [vmem:[#allocation2 + $0x50] sm:$0xf] %v4057_v49  ;;  %v4058_v34 = vmax.f32 %v4045_v58, 0.0 }
 0x3a8   :  { %4071 = vst.msk [vmem:[#allocation2 + $0x58] sm:$0xf] %vm4070_vm2, %v4058_v34 }
 0x3a9   :  { %4350 = shalt.err (!%p4347_p4)
}
 0x3aa   :  { %s4363_s11 = smov 512   ;;  %s4364_s12 = smov 32  }
 0x3ab   :  { %4083 = dma.vmem_to_hbm [thread:$0]  %s4078_s9, 1536, %s7367_s5, [#allocation3], %s4363_s11, %s4363_s11, %s4364_s12  }
 0x3ac   :  { %4359 = dma.done.wait [#allocation3], 1536  }
 0x3ad   :  { %4360 = vsyncadd [#allocation3], 4294965760 }
 0x3ae   :  { %4087 = vsyncpa [#allocation3], 1 }

</bundles_post_ra>
